<compile_context>
chip_gen: v7x
topology: tpu7x:2x2x1
jax: 0.10.0
libtpu: 0.0.40
codegen_flags: <defaults>
</compile_context>

<pallas_src>
import functools

import jax
import jax.numpy as jnp
from jax.experimental import pallas as pl
from jax.experimental.pallas import tpu as pltpu


def _round_up(x, m):
    return (x + m - 1) // m * m


# ----------------------------- Pallas kernels ------------------------------


def _conv_pool_bn_relu_kernel(p_ref, w_ref, scale_ref, shift_ref, o_ref):
    """Fused Conv2d(valid) -> MaxPool2d(2,2) -> BatchNorm2d(eval) -> ReLU.

    One grid step == one image.

    p_ref     : (4, R, K) bf16  im2col patches, one slab per pooling quadrant
                (R = Hp*Wp pooled positions, K = kh*kw*Cin).
    w_ref     : (K, 128)  bf16  flattened conv weights, Cout zero-padded to
                128 lanes (bias folded away).
    scale_ref : (1, 128)  f32   folded BatchNorm scale (zero in padded lanes).
    shift_ref : (1, 128)  f32   folded shift (already includes scale * bias).
    o_ref     : (R, 128)  bf16  pooled / normalized / ReLU'd activations.
    """
    w = w_ref[...]
    # Same RHS for all four pooling quadrants; fold the 2x2 max into result
    # consumption so no (4R, 128) f32 intermediate is ever materialized.
    acc = jnp.dot(p_ref[0], w, preferred_element_type=jnp.float32)
    for q in range(1, 4):
        acc = jnp.maximum(
            acc, jnp.dot(p_ref[q], w, preferred_element_type=jnp.float32))
    # BatchNorm folded to per-channel affine (inference / running stats),
    # computed in f32 on the VPU (v5e has no bf16 VPU), cast on the store.
    # TODO(synk): training-mode BatchNorm (batch statistics) not implemented.
    y = jnp.maximum(acc * scale_ref[...] + shift_ref[...], 0.0)
    o_ref[...] = y.astype(o_ref.dtype)


def _linear_heads_kernel(x_ref, w_ref, b_ref, o_ref):
    """Fused mu_layer + log_var_layer: one (B, 2176) @ (2176, 128) matmul."""
    o_ref[...] = (
        jnp.dot(x_ref[...], w_ref[...], preferred_element_type=jnp.float32)
        + b_ref[...])


# ------------------------------- JAX glue ----------------------------------


def _im2col_quadrants(x_nhwc, k):
    """Patches for a 'valid' conv (kernel k) followed by MaxPool2d(2,2).

    Returns (B, 4, Hp*Wp, k*k*C): quadrant q = 2*dy+dx, row r = i*Wp + j is
    the receptive field of conv output (2i+dy, 2j+dx), i.e. the q-th pooling
    candidate of pooled output (i, j).
    """
    B, H, W, C = x_nhwc.shape
    Hc, Wc = H - k + 1, W - k + 1
    Hp, Wp = Hc // 2, Wc // 2
    taps = []
    for kh in range(k):
        for kw in range(k):
            taps.append(jax.lax.slice(
                x_nhwc, (0, kh, kw, 0), (B, kh + 2 * Hp, kw + 2 * Wp, C)))
    p = jnp.stack(taps, axis=-2)                   # (B, 2Hp, 2Wp, k*k, C)
    p = p.reshape(B, Hp, 2, Wp, 2, k * k * C)
    p = p.transpose(0, 2, 4, 1, 3, 5)              # (B, dy, dx, Hp, Wp, K)
    return p.reshape(B, 4, Hp * Wp, k * k * C), (Hp, Wp)


def _conv_block(x_nhwc, w_hwio, b, bn_scale, bn_shift):
    """One Conv -> MaxPool -> BN -> ReLU block; returns NHWC bf16 features."""
    B = x_nhwc.shape[0]
    k, _, cin, cout = w_hwio.shape
    quads, (Hp, Wp) = _im2col_quadrants(x_nhwc, k)
    quads = quads.astype(jnp.bfloat16)             # bf16 MXU inputs, f32 acc
    R = Hp * Wp
    K = k * k * cin

    cpad = _round_up(cout, 128)                    # lane-dense output width
    w_flat = w_hwio.reshape(K, cout).astype(jnp.bfloat16)
    w_flat = jnp.pad(w_flat, ((0, 0), (0, cpad - cout)))
    # Fold the conv bias into the BN shift (a per-channel constant commutes
    # with the quadrant max): shift' = shift + scale * b.
    scale = jnp.pad(bn_scale.astype(jnp.float32), (0, cpad - cout))
    shift = jnp.pad((bn_shift + bn_scale * b).astype(jnp.float32),
                    (0, cpad - cout))

    out = pl.pallas_call(
        _conv_pool_bn_relu_kernel,
        out_shape=jax.ShapeDtypeStruct((B, R, cpad), jnp.bfloat16),
        grid=(B,),
        in_specs=[
            pl.BlockSpec((None, 4, R, K), lambda i: (i, 0, 0, 0)),   # patches
            pl.BlockSpec((K, cpad), lambda i: (0, 0)),               # weights
            pl.BlockSpec((1, cpad), lambda i: (0, 0)),               # bn scale
            pl.BlockSpec((1, cpad), lambda i: (0, 0)),               # bn shift'
        ],
        out_specs=pl.BlockSpec((None, R, cpad), lambda i: (i, 0, 0)),
        compiler_params=pltpu.CompilerParams(
            dimension_semantics=("parallel",),   # v7x: 2 TCs split the batch
            # Per-step footprint (double-buffered per-image slabs + f32
            # accumulator) is well under 1 MiB, inside every generation's
            # default scoped VMEM (16 MiB v5e, 32 MiB v6e/v7x); explicit
            # limit kept only as headroom for larger batches.
            vmem_limit_bytes=32 * 1024 * 1024),
    )(quads, w_flat, scale.reshape(1, cpad), shift.reshape(1, cpad))

    return out[:, :, :cout].reshape(B, Hp, Wp, cout)


def cnn_encoder_forward(params, x_obs, y_map):
    """Matches CNNEncoder.forward.  x_obs is NCHW (PyTorch convention)."""
    B = x_obs.shape[0]
    # NCHW -> NHWC (channels on TPU lanes); bf16 activations throughout.
    x = jnp.transpose(x_obs, (0, 2, 3, 1)).astype(jnp.bfloat16)

    for name in ("block1", "block2", "block3"):
        p = params[name]
        x = _conv_block(x, p["w"], p["b"], p["bn_scale"], p["bn_shift"])

    # x: (B, 4, 4, 128).  Reproduce torch's NCHW .view(-1, 512) semantics.
    feat_nchw = jnp.transpose(x, (0, 3, 1, 2))                 # (B, 128, 4, 4)
    x_obs_flat = feat_nchw.reshape(-1, 512)                    # (4B, 512)
    z_ori_flat = jnp.tile(jnp.eye(4, dtype=x_obs_flat.dtype), (B, 1))  # (4B,4)
    xz = jnp.concatenate([x_obs_flat, z_ori_flat], axis=1)     # (4B, 516)
    xz = xz.reshape(B, -1)                                     # (B, 2064)
    y_map_flat = y_map.reshape(-1, 9).astype(jnp.float32)      # (B, 9)
    cond = jnp.concatenate([xz, y_map_flat.astype(xz.dtype)], axis=1)  # (B,2073)

    latent_dim = params["w_mu"].shape[1]
    k_in = cond.shape[1]
    k_pad = _round_up(k_in, 128)                               # 2073 -> 2176
    out_pad = _round_up(2 * latent_dim, 128)                   # lane-dense out

    cond_p = jnp.pad(cond, ((0, 0), (0, k_pad - k_in)))
    w_cat = jnp.concatenate([params["w_mu"], params["w_lv"]], axis=1)
    w_cat = jnp.pad(w_cat, ((0, k_pad - k_in), (0, out_pad - 2 * latent_dim)))
    b_cat = jnp.concatenate([params["b_mu"], params["b_lv"]], axis=0)
    b_cat = jnp.pad(b_cat, (0, out_pad - 2 * latent_dim)).reshape(1, out_pad)

    heads = pl.pallas_call(
        _linear_heads_kernel,
        out_shape=jax.ShapeDtypeStruct((B, out_pad), jnp.float32),
        compiler_params=pltpu.CompilerParams(
            vmem_limit_bytes=32 * 1024 * 1024),
    )(cond_p.astype(jnp.bfloat16),
      w_cat.astype(jnp.bfloat16),
      b_cat.astype(jnp.float32))

    mu = heads[:, :latent_dim]
    log_var = heads[:, latent_dim:2 * latent_dim]
    return mu, log_var, y_map_flat


# ------------------------- deterministic parameters -------------------------


def init_params(key, latent_dim):
    eps = 1e-5

    def conv_block_params(k, kern, cin, cout):
        k1, k2, k3, k4, k5, k6 = jax.random.split(k, 6)
        w = 0.05 * jax.random.normal(k1, (kern, kern, cin, cout), jnp.float32)
        b = 0.05 * jax.random.normal(k2, (cout,), jnp.float32)
        gamma = 1.0 + 0.1 * jax.random.normal(k3, (cout,), jnp.float32)
        beta = 0.1 * jax.random.normal(k4, (cout,), jnp.float32)
        mean = 0.1 * jax.random.normal(k5, (cout,), jnp.float32)
        var = 1.0 + jnp.abs(jax.random.normal(k6, (cout,), jnp.float32))
        scale = gamma / jnp.sqrt(var + eps)
        shift = beta - mean * scale
        return {"w": w, "b": b, "bn_scale": scale, "bn_shift": shift}

    kb1, kb2, kb3, km, kv = jax.random.split(key, 5)
    km1, km2 = jax.random.split(km)
    kv1, kv2 = jax.random.split(kv)
    return {
        "block1": conv_block_params(kb1, 5, 3, 32),
        "block2": conv_block_params(kb2, 3, 32, 64),
        "block3": conv_block_params(kb3, 3, 64, 128),
        "w_mu": 0.02 * jax.random.normal(km1, (2073, latent_dim), jnp.float32),
        "b_mu": 0.02 * jax.random.normal(km2, (latent_dim,), jnp.float32),
        "w_lv": 0.02 * jax.random.normal(kv1, (2073, latent_dim), jnp.float32),
        "b_lv": 0.02 * jax.random.normal(kv2, (latent_dim,), jnp.float32),
    }


# ---------------------------------- main ------------------------------------


if __name__ == "__main__":
    latent_dim = 32
    batch_size = 2

    key = jax.random.PRNGKey(0)
    kp, kx, ky = jax.random.split(key, 3)
    params = init_params(kp, latent_dim)

    # x_obs: NCHW RGB 48x48 (the spatial size implied by Linear(2073, ...)).
    x_obs = jax.random.normal(kx, (batch_size, 3, 48, 48), jnp.float32)
    y_map = jax.random.normal(ky, (batch_size, 3, 3), jnp.float32)

    fwd = jax.jit(functools.partial(cnn_encoder_forward, params))
    mu, log_var, y_map_flat = fwd(x_obs, y_map)
    jax.block_until_ready((mu, log_var, y_map_flat))

    assert mu.shape == (batch_size, latent_dim)
    assert log_var.shape == (batch_size, latent_dim)
    assert y_map_flat.shape == (batch_size, 9)
    assert bool(jnp.all(jnp.isfinite(mu))) and bool(jnp.all(jnp.isfinite(log_var)))
    print("KERNEL_OK")
</pallas_src>

<mosaic_0001>
module attributes {stable_mosaic.version = 11 : i64} {
  func.func @_conv_pool_bn_relu_kernel(%arg0: i32, %arg1: memref<1x4x484x75xbf16, #tpu.memory_space<vmem>>, %arg2: memref<75x128xbf16, #tpu.memory_space<vmem>>, %arg3: memref<1x128xf32, #tpu.memory_space<vmem>>, %arg4: memref<1x128xf32, #tpu.memory_space<vmem>>, %arg5: memref<1x484x128xbf16, #tpu.memory_space<vmem>>) attributes {dimension_semantics = [#tpu.dimension_semantics<parallel>], iteration_bounds = array<i64: 2>, scalar_prefetch = 0 : i64, scratch_operands = 0 : i64, tpu.core_type = #tpu.core_type<tc>, window_params = [{transform_indices = @transform_0, window_bounds = array<i64: 1, 4, 484, 75>}, {pipeline_mode = #tpu.pipeline_mode<synchronous>, transform_indices = @transform_1, window_bounds = array<i64: 75, 128>}, {pipeline_mode = #tpu.pipeline_mode<synchronous>, transform_indices = @transform_2, window_bounds = array<i64: 1, 128>}, {pipeline_mode = #tpu.pipeline_mode<synchronous>, transform_indices = @transform_3, window_bounds = array<i64: 1, 128>}, {transform_indices = @transform_4, window_bounds = array<i64: 1, 484, 128>}]} {
    %c0 = arith.constant 0 : index
    %c0_0 = arith.constant 0 : index
    %0 = vector.load %arg2[%c0, %c0_0] : memref<75x128xbf16, #tpu.memory_space<vmem>>, vector<75x128xbf16>
    %c0_1 = arith.constant 0 : index
    %c0_2 = arith.constant 0 : index
    %c0_3 = arith.constant 0 : index
    %c0_4 = arith.constant 0 : index
    %1 = vector.load %arg1[%c0_1, %c0_2, %c0_3, %c0_4] : memref<1x4x484x75xbf16, #tpu.memory_space<vmem>>, vector<1x1x484x75xbf16>
    %2 = vector.shape_cast %1 : vector<1x1x484x75xbf16> to vector<484x75xbf16>
    %cst = arith.constant dense<0.000000e+00> : vector<484x128xf32>
    %3 = tpu.matmul %2, %0, %cst {dimension_numbers = #tpu.dot_dimension_numbers<[1], [0], [0], [1], [0, 0, 1, 1], [], []>} : vector<484x75xbf16>, vector<75x128xbf16>, vector<484x128xf32> -> vector<484x128xf32>
    %c0_5 = arith.constant 0 : index
    %c1 = arith.constant 1 : index
    %c0_6 = arith.constant 0 : index
    %c0_7 = arith.constant 0 : index
    %4 = vector.load %arg1[%c0_5, %c1, %c0_6, %c0_7] : memref<1x4x484x75xbf16, #tpu.memory_space<vmem>>, vector<1x1x484x75xbf16>
    %5 = vector.shape_cast %4 : vector<1x1x484x75xbf16> to vector<484x75xbf16>
    %cst_8 = arith.constant dense<0.000000e+00> : vector<484x128xf32>
    %6 = tpu.matmul %5, %0, %cst_8 {dimension_numbers = #tpu.dot_dimension_numbers<[1], [0], [0], [1], [0, 0, 1, 1], [], []>} : vector<484x75xbf16>, vector<75x128xbf16>, vector<484x128xf32> -> vector<484x128xf32>
    %7 = arith.maximumf %3, %6 : vector<484x128xf32>
    %c0_9 = arith.constant 0 : index
    %c2 = arith.constant 2 : index
    %c0_10 = arith.constant 0 : index
    %c0_11 = arith.constant 0 : index
    %8 = vector.load %arg1[%c0_9, %c2, %c0_10, %c0_11] : memref<1x4x484x75xbf16, #tpu.memory_space<vmem>>, vector<1x1x484x75xbf16>
    %9 = vector.shape_cast %8 : vector<1x1x484x75xbf16> to vector<484x75xbf16>
    %cst_12 = arith.constant dense<0.000000e+00> : vector<484x128xf32>
    %10 = tpu.matmul %9, %0, %cst_12 {dimension_numbers = #tpu.dot_dimension_numbers<[1], [0], [0], [1], [0, 0, 1, 1], [], []>} : vector<484x75xbf16>, vector<75x128xbf16>, vector<484x128xf32> -> vector<484x128xf32>
    %11 = arith.maximumf %7, %10 : vector<484x128xf32>
    %c0_13 = arith.constant 0 : index
    %c3 = arith.constant 3 : index
    %c0_14 = arith.constant 0 : index
    %c0_15 = arith.constant 0 : index
    %12 = vector.load %arg1[%c0_13, %c3, %c0_14, %c0_15] : memref<1x4x484x75xbf16, #tpu.memory_space<vmem>>, vector<1x1x484x75xbf16>
    %13 = vector.shape_cast %12 : vector<1x1x484x75xbf16> to vector<484x75xbf16>
    %cst_16 = arith.constant dense<0.000000e+00> : vector<484x128xf32>
    %14 = tpu.matmul %13, %0, %cst_16 {dimension_numbers = #tpu.dot_dimension_numbers<[1], [0], [0], [1], [0, 0, 1, 1], [], []>} : vector<484x75xbf16>, vector<75x128xbf16>, vector<484x128xf32> -> vector<484x128xf32>
    %15 = arith.maximumf %11, %14 : vector<484x128xf32>
    %c0_17 = arith.constant 0 : index
    %c0_18 = arith.constant 0 : index
    %16 = vector.load %arg3[%c0_17, %c0_18] : memref<1x128xf32, #tpu.memory_space<vmem>>, vector<1x128xf32>
    %17 = vector.broadcast %16 : vector<1x128xf32> to vector<484x128xf32>
    %18 = arith.mulf %15, %17 : vector<484x128xf32>
    %c0_19 = arith.constant 0 : index
    %c0_20 = arith.constant 0 : index
    %19 = vector.load %arg4[%c0_19, %c0_20] : memref<1x128xf32, #tpu.memory_space<vmem>>, vector<1x128xf32>
    %20 = vector.broadcast %19 : vector<1x128xf32> to vector<484x128xf32>
    %21 = arith.addf %18, %20 : vector<484x128xf32>
    %cst_21 = arith.constant 0.000000e+00 : f32
    %22 = vector.broadcast %cst_21 : f32 to vector<484x128xf32>
    %23 = arith.maximumf %21, %22 : vector<484x128xf32>
    %24 = arith.truncf %23 : vector<484x128xf32> to vector<484x128xbf16>
    %c0_22 = arith.constant 0 : index
    %c0_23 = arith.constant 0 : index
    %c0_24 = arith.constant 0 : index
    %25 = vector.load %arg5[%c0_22, %c0_23, %c0_24] : memref<1x484x128xbf16, #tpu.memory_space<vmem>>, vector<1x484x128xbf16>
    %26 = vector.shape_cast %25 : vector<1x484x128xbf16> to vector<484x128xbf16>
    %27 = vector.shape_cast %24 : vector<484x128xbf16> to vector<1x484x128xbf16>
    tpu.vector_store %arg5[%c0_22, %c0_23, %c0_24], %27 {strides = array<i32>} : memref<1x484x128xbf16, #tpu.memory_space<vmem>>, vector<1x484x128xbf16>,
    return
  }
  func.func @transform_0(%arg0: i32) -> (i32, i32, i32, i32) {
    %c0_i32 = arith.constant 0 : i32
    %c0_i32_0 = arith.constant 0 : i32
    %c0_i32_1 = arith.constant 0 : i32
    %c0_i32_2 = arith.constant 0 : i32
    return %arg0, %c0_i32, %c0_i32_0, %c0_i32_1 : i32, i32, i32, i32
  }
  func.func @transform_1(%arg0: i32) -> (i32, i32) {
    %c0_i32 = arith.constant 0 : i32
    %c0_i32_0 = arith.constant 0 : i32
    %c0_i32_1 = arith.constant 0 : i32
    return %c0_i32, %c0_i32_0 : i32, i32
  }
  func.func @transform_2(%arg0: i32) -> (i32, i32) {
    %c0_i32 = arith.constant 0 : i32
    %c0_i32_0 = arith.constant 0 : i32
    %c0_i32_1 = arith.constant 0 : i32
    return %c0_i32, %c0_i32_0 : i32, i32
  }
  func.func @transform_3(%arg0: i32) -> (i32, i32) {
    %c0_i32 = arith.constant 0 : i32
    %c0_i32_0 = arith.constant 0 : i32
    %c0_i32_1 = arith.constant 0 : i32
    return %c0_i32, %c0_i32_0 : i32, i32
  }
  func.func @transform_4(%arg0: i32) -> (i32, i32, i32) {
    %c0_i32 = arith.constant 0 : i32
    %c0_i32_0 = arith.constant 0 : i32
    %c0_i32_1 = arith.constant 0 : i32
    return %arg0, %c0_i32, %c0_i32_0 : i32, i32, i32
  }
}

module attributes {stable_mosaic.version = 11 : i64} {
  func.func @_conv_pool_bn_relu_kernel(%arg0: i32, %arg1: memref<1x4x100x288xbf16, #tpu.memory_space<vmem>>, %arg2: memref<288x128xbf16, #tpu.memory_space<vmem>>, %arg3: memref<1x128xf32, #tpu.memory_space<vmem>>, %arg4: memref<1x128xf32, #tpu.memory_space<vmem>>, %arg5: memref<1x100x128xbf16, #tpu.memory_space<vmem>>) attributes {dimension_semantics = [#tpu.dimension_semantics<parallel>], iteration_bounds = array<i64: 2>, scalar_prefetch = 0 : i64, scratch_operands = 0 : i64, tpu.core_type = #tpu.core_type<tc>, window_params = [{transform_indices = @transform_0, window_bounds = array<i64: 1, 4, 100, 288>}, {pipeline_mode = #tpu.pipeline_mode<synchronous>, transform_indices = @transform_1, window_bounds = array<i64: 288, 128>}, {pipeline_mode = #tpu.pipeline_mode<synchronous>, transform_indices = @transform_2, window_bounds = array<i64: 1, 128>}, {pipeline_mode = #tpu.pipeline_mode<synchronous>, transform_indices = @transform_3, window_bounds = array<i64: 1, 128>}, {transform_indices = @transform_4, window_bounds = array<i64: 1, 100, 128>}]} {
    %c0 = arith.constant 0 : index
    %c0_0 = arith.constant 0 : index
    %0 = vector.load %arg2[%c0, %c0_0] : memref<288x128xbf16, #tpu.memory_space<vmem>>, vector<288x128xbf16>
    %c0_1 = arith.constant 0 : index
    %c0_2 = arith.constant 0 : index
    %c0_3 = arith.constant 0 : index
    %c0_4 = arith.constant 0 : index
    %1 = vector.load %arg1[%c0_1, %c0_2, %c0_3, %c0_4] : memref<1x4x100x288xbf16, #tpu.memory_space<vmem>>, vector<1x1x100x288xbf16>
    %2 = vector.shape_cast %1 : vector<1x1x100x288xbf16> to vector<100x288xbf16>
    %cst = arith.constant dense<0.000000e+00> : vector<100x128xf32>
    %3 = tpu.matmul %2, %0, %cst {dimension_numbers = #tpu.dot_dimension_numbers<[1], [0], [0], [1], [0, 0, 1, 1], [], []>} : vector<100x288xbf16>, vector<288x128xbf16>, vector<100x128xf32> -> vector<100x128xf32>
    %c0_5 = arith.constant 0 : index
    %c1 = arith.constant 1 : index
    %c0_6 = arith.constant 0 : index
    %c0_7 = arith.constant 0 : index
    %4 = vector.load %arg1[%c0_5, %c1, %c0_6, %c0_7] : memref<1x4x100x288xbf16, #tpu.memory_space<vmem>>, vector<1x1x100x288xbf16>
    %5 = vector.shape_cast %4 : vector<1x1x100x288xbf16> to vector<100x288xbf16>
    %cst_8 = arith.constant dense<0.000000e+00> : vector<100x128xf32>
    %6 = tpu.matmul %5, %0, %cst_8 {dimension_numbers = #tpu.dot_dimension_numbers<[1], [0], [0], [1], [0, 0, 1, 1], [], []>} : vector<100x288xbf16>, vector<288x128xbf16>, vector<100x128xf32> -> vector<100x128xf32>
    %7 = arith.maximumf %3, %6 : vector<100x128xf32>
    %c0_9 = arith.constant 0 : index
    %c2 = arith.constant 2 : index
    %c0_10 = arith.constant 0 : index
    %c0_11 = arith.constant 0 : index
    %8 = vector.load %arg1[%c0_9, %c2, %c0_10, %c0_11] : memref<1x4x100x288xbf16, #tpu.memory_space<vmem>>, vector<1x1x100x288xbf16>
    %9 = vector.shape_cast %8 : vector<1x1x100x288xbf16> to vector<100x288xbf16>
    %cst_12 = arith.constant dense<0.000000e+00> : vector<100x128xf32>
    %10 = tpu.matmul %9, %0, %cst_12 {dimension_numbers = #tpu.dot_dimension_numbers<[1], [0], [0], [1], [0, 0, 1, 1], [], []>} : vector<100x288xbf16>, vector<288x128xbf16>, vector<100x128xf32> -> vector<100x128xf32>
    %11 = arith.maximumf %7, %10 : vector<100x128xf32>
    %c0_13 = arith.constant 0 : index
    %c3 = arith.constant 3 : index
    %c0_14 = arith.constant 0 : index
    %c0_15 = arith.constant 0 : index
    %12 = vector.load %arg1[%c0_13, %c3, %c0_14, %c0_15] : memref<1x4x100x288xbf16, #tpu.memory_space<vmem>>, vector<1x1x100x288xbf16>
    %13 = vector.shape_cast %12 : vector<1x1x100x288xbf16> to vector<100x288xbf16>
    %cst_16 = arith.constant dense<0.000000e+00> : vector<100x128xf32>
    %14 = tpu.matmul %13, %0, %cst_16 {dimension_numbers = #tpu.dot_dimension_numbers<[1], [0], [0], [1], [0, 0, 1, 1], [], []>} : vector<100x288xbf16>, vector<288x128xbf16>, vector<100x128xf32> -> vector<100x128xf32>
    %15 = arith.maximumf %11, %14 : vector<100x128xf32>
    %c0_17 = arith.constant 0 : index
    %c0_18 = arith.constant 0 : index
    %16 = vector.load %arg3[%c0_17, %c0_18] : memref<1x128xf32, #tpu.memory_space<vmem>>, vector<1x128xf32>
    %17 = vector.broadcast %16 : vector<1x128xf32> to vector<100x128xf32>
    %18 = arith.mulf %15, %17 : vector<100x128xf32>
    %c0_19 = arith.constant 0 : index
    %c0_20 = arith.constant 0 : index
    %19 = vector.load %arg4[%c0_19, %c0_20] : memref<1x128xf32, #tpu.memory_space<vmem>>, vector<1x128xf32>
    %20 = vector.broadcast %19 : vector<1x128xf32> to vector<100x128xf32>
    %21 = arith.addf %18, %20 : vector<100x128xf32>
    %cst_21 = arith.constant 0.000000e+00 : f32
    %22 = vector.broadcast %cst_21 : f32 to vector<100x128xf32>
    %23 = arith.maximumf %21, %22 : vector<100x128xf32>
    %24 = arith.truncf %23 : vector<100x128xf32> to vector<100x128xbf16>
    %c0_22 = arith.constant 0 : index
    %c0_23 = arith.constant 0 : index
    %c0_24 = arith.constant 0 : index
    %25 = vector.load %arg5[%c0_22, %c0_23, %c0_24] : memref<1x100x128xbf16, #tpu.memory_space<vmem>>, vector<1x100x128xbf16>
    %26 = vector.shape_cast %25 : vector<1x100x128xbf16> to vector<100x128xbf16>
    %27 = vector.shape_cast %24 : vector<100x128xbf16> to vector<1x100x128xbf16>
    tpu.vector_store %arg5[%c0_22, %c0_23, %c0_24], %27 {strides = array<i32>} : memref<1x100x128xbf16, #tpu.memory_space<vmem>>, vector<1x100x128xbf16>,
    return
  }
  func.func @transform_0(%arg0: i32) -> (i32, i32, i32, i32) {
    %c0_i32 = arith.constant 0 : i32
    %c0_i32_0 = arith.constant 0 : i32
    %c0_i32_1 = arith.constant 0 : i32
    %c0_i32_2 = arith.constant 0 : i32
    return %arg0, %c0_i32, %c0_i32_0, %c0_i32_1 : i32, i32, i32, i32
  }
  func.func @transform_1(%arg0: i32) -> (i32, i32) {
    %c0_i32 = arith.constant 0 : i32
    %c0_i32_0 = arith.constant 0 : i32
    %c0_i32_1 = arith.constant 0 : i32
    return %c0_i32, %c0_i32_0 : i32, i32
  }
  func.func @transform_2(%arg0: i32) -> (i32, i32) {
    %c0_i32 = arith.constant 0 : i32
    %c0_i32_0 = arith.constant 0 : i32
    %c0_i32_1 = arith.constant 0 : i32
    return %c0_i32, %c0_i32_0 : i32, i32
  }
  func.func @transform_3(%arg0: i32) -> (i32, i32) {
    %c0_i32 = arith.constant 0 : i32
    %c0_i32_0 = arith.constant 0 : i32
    %c0_i32_1 = arith.constant 0 : i32
    return %c0_i32, %c0_i32_0 : i32, i32
  }
  func.func @transform_4(%arg0: i32) -> (i32, i32, i32) {
    %c0_i32 = arith.constant 0 : i32
    %c0_i32_0 = arith.constant 0 : i32
    %c0_i32_1 = arith.constant 0 : i32
    return %arg0, %c0_i32, %c0_i32_0 : i32, i32, i32
  }
}

module attributes {stable_mosaic.version = 11 : i64} {
  func.func @_conv_pool_bn_relu_kernel(%arg0: i32, %arg1: memref<1x4x16x576xbf16, #tpu.memory_space<vmem>>, %arg2: memref<576x128xbf16, #tpu.memory_space<vmem>>, %arg3: memref<1x128xf32, #tpu.memory_space<vmem>>, %arg4: memref<1x128xf32, #tpu.memory_space<vmem>>, %arg5: memref<1x16x128xbf16, #tpu.memory_space<vmem>>) attributes {dimension_semantics = [#tpu.dimension_semantics<parallel>], iteration_bounds = array<i64: 2>, scalar_prefetch = 0 : i64, scratch_operands = 0 : i64, tpu.core_type = #tpu.core_type<tc>, window_params = [{transform_indices = @transform_0, window_bounds = array<i64: 1, 4, 16, 576>}, {pipeline_mode = #tpu.pipeline_mode<synchronous>, transform_indices = @transform_1, window_bounds = array<i64: 576, 128>}, {pipeline_mode = #tpu.pipeline_mode<synchronous>, transform_indices = @transform_2, window_bounds = array<i64: 1, 128>}, {pipeline_mode = #tpu.pipeline_mode<synchronous>, transform_indices = @transform_3, window_bounds = array<i64: 1, 128>}, {transform_indices = @transform_4, window_bounds = array<i64: 1, 16, 128>}]} {
    %c0 = arith.constant 0 : index
    %c0_0 = arith.constant 0 : index
    %0 = vector.load %arg2[%c0, %c0_0] : memref<576x128xbf16, #tpu.memory_space<vmem>>, vector<576x128xbf16>
    %c0_1 = arith.constant 0 : index
    %c0_2 = arith.constant 0 : index
    %c0_3 = arith.constant 0 : index
    %c0_4 = arith.constant 0 : index
    %1 = vector.load %arg1[%c0_1, %c0_2, %c0_3, %c0_4] : memref<1x4x16x576xbf16, #tpu.memory_space<vmem>>, vector<1x1x16x576xbf16>
    %2 = vector.shape_cast %1 : vector<1x1x16x576xbf16> to vector<16x576xbf16>
    %cst = arith.constant dense<0.000000e+00> : vector<16x128xf32>
    %3 = tpu.matmul %2, %0, %cst {dimension_numbers = #tpu.dot_dimension_numbers<[1], [0], [0], [1], [0, 0, 1, 1], [], []>} : vector<16x576xbf16>, vector<576x128xbf16>, vector<16x128xf32> -> vector<16x128xf32>
    %c0_5 = arith.constant 0 : index
    %c1 = arith.constant 1 : index
    %c0_6 = arith.constant 0 : index
    %c0_7 = arith.constant 0 : index
    %4 = vector.load %arg1[%c0_5, %c1, %c0_6, %c0_7] : memref<1x4x16x576xbf16, #tpu.memory_space<vmem>>, vector<1x1x16x576xbf16>
    %5 = vector.shape_cast %4 : vector<1x1x16x576xbf16> to vector<16x576xbf16>
    %cst_8 = arith.constant dense<0.000000e+00> : vector<16x128xf32>
    %6 = tpu.matmul %5, %0, %cst_8 {dimension_numbers = #tpu.dot_dimension_numbers<[1], [0], [0], [1], [0, 0, 1, 1], [], []>} : vector<16x576xbf16>, vector<576x128xbf16>, vector<16x128xf32> -> vector<16x128xf32>
    %7 = arith.maximumf %3, %6 : vector<16x128xf32>
    %c0_9 = arith.constant 0 : index
    %c2 = arith.constant 2 : index
    %c0_10 = arith.constant 0 : index
    %c0_11 = arith.constant 0 : index
    %8 = vector.load %arg1[%c0_9, %c2, %c0_10, %c0_11] : memref<1x4x16x576xbf16, #tpu.memory_space<vmem>>, vector<1x1x16x576xbf16>
    %9 = vector.shape_cast %8 : vector<1x1x16x576xbf16> to vector<16x576xbf16>
    %cst_12 = arith.constant dense<0.000000e+00> : vector<16x128xf32>
    %10 = tpu.matmul %9, %0, %cst_12 {dimension_numbers = #tpu.dot_dimension_numbers<[1], [0], [0], [1], [0, 0, 1, 1], [], []>} : vector<16x576xbf16>, vector<576x128xbf16>, vector<16x128xf32> -> vector<16x128xf32>
    %11 = arith.maximumf %7, %10 : vector<16x128xf32>
    %c0_13 = arith.constant 0 : index
    %c3 = arith.constant 3 : index
    %c0_14 = arith.constant 0 : index
    %c0_15 = arith.constant 0 : index
    %12 = vector.load %arg1[%c0_13, %c3, %c0_14, %c0_15] : memref<1x4x16x576xbf16, #tpu.memory_space<vmem>>, vector<1x1x16x576xbf16>
    %13 = vector.shape_cast %12 : vector<1x1x16x576xbf16> to vector<16x576xbf16>
    %cst_16 = arith.constant dense<0.000000e+00> : vector<16x128xf32>
    %14 = tpu.matmul %13, %0, %cst_16 {dimension_numbers = #tpu.dot_dimension_numbers<[1], [0], [0], [1], [0, 0, 1, 1], [], []>} : vector<16x576xbf16>, vector<576x128xbf16>, vector<16x128xf32> -> vector<16x128xf32>
    %15 = arith.maximumf %11, %14 : vector<16x128xf32>
    %c0_17 = arith.constant 0 : index
    %c0_18 = arith.constant 0 : index
    %16 = vector.load %arg3[%c0_17, %c0_18] : memref<1x128xf32, #tpu.memory_space<vmem>>, vector<1x128xf32>
    %17 = vector.broadcast %16 : vector<1x128xf32> to vector<16x128xf32>
    %18 = arith.mulf %15, %17 : vector<16x128xf32>
    %c0_19 = arith.constant 0 : index
    %c0_20 = arith.constant 0 : index
    %19 = vector.load %arg4[%c0_19, %c0_20] : memref<1x128xf32, #tpu.memory_space<vmem>>, vector<1x128xf32>
    %20 = vector.broadcast %19 : vector<1x128xf32> to vector<16x128xf32>
    %21 = arith.addf %18, %20 : vector<16x128xf32>
    %cst_21 = arith.constant 0.000000e+00 : f32
    %22 = vector.broadcast %cst_21 : f32 to vector<16x128xf32>
    %23 = arith.maximumf %21, %22 : vector<16x128xf32>
    %24 = arith.truncf %23 : vector<16x128xf32> to vector<16x128xbf16>
    %c0_22 = arith.constant 0 : index
    %c0_23 = arith.constant 0 : index
    %c0_24 = arith.constant 0 : index
    %25 = vector.load %arg5[%c0_22, %c0_23, %c0_24] : memref<1x16x128xbf16, #tpu.memory_space<vmem>>, vector<1x16x128xbf16>
    %26 = vector.shape_cast %25 : vector<1x16x128xbf16> to vector<16x128xbf16>
    %27 = vector.shape_cast %24 : vector<16x128xbf16> to vector<1x16x128xbf16>
    tpu.vector_store %arg5[%c0_22, %c0_23, %c0_24], %27 {strides = array<i32>} : memref<1x16x128xbf16, #tpu.memory_space<vmem>>, vector<1x16x128xbf16>,
    return
  }
  func.func @transform_0(%arg0: i32) -> (i32, i32, i32, i32) {
    %c0_i32 = arith.constant 0 : i32
    %c0_i32_0 = arith.constant 0 : i32
    %c0_i32_1 = arith.constant 0 : i32
    %c0_i32_2 = arith.constant 0 : i32
    return %arg0, %c0_i32, %c0_i32_0, %c0_i32_1 : i32, i32, i32, i32
  }
  func.func @transform_1(%arg0: i32) -> (i32, i32) {
    %c0_i32 = arith.constant 0 : i32
    %c0_i32_0 = arith.constant 0 : i32
    %c0_i32_1 = arith.constant 0 : i32
    return %c0_i32, %c0_i32_0 : i32, i32
  }
  func.func @transform_2(%arg0: i32) -> (i32, i32) {
    %c0_i32 = arith.constant 0 : i32
    %c0_i32_0 = arith.constant 0 : i32
    %c0_i32_1 = arith.constant 0 : i32
    return %c0_i32, %c0_i32_0 : i32, i32
  }
  func.func @transform_3(%arg0: i32) -> (i32, i32) {
    %c0_i32 = arith.constant 0 : i32
    %c0_i32_0 = arith.constant 0 : i32
    %c0_i32_1 = arith.constant 0 : i32
    return %c0_i32, %c0_i32_0 : i32, i32
  }
  func.func @transform_4(%arg0: i32) -> (i32, i32, i32) {
    %c0_i32 = arith.constant 0 : i32
    %c0_i32_0 = arith.constant 0 : i32
    %c0_i32_1 = arith.constant 0 : i32
    return %arg0, %c0_i32, %c0_i32_0 : i32, i32, i32
  }
}

module attributes {stable_mosaic.version = 11 : i64} {
  func.func @_linear_heads_kernel(%arg0: memref<2x2176xbf16, #tpu.memory_space<vmem>>, %arg1: memref<2176x128xbf16, #tpu.memory_space<vmem>>, %arg2: memref<1x128xf32, #tpu.memory_space<vmem>>, %arg3: memref<2x128xf32, #tpu.memory_space<vmem>>) attributes {dimension_semantics = [], scalar_prefetch = 0 : i64, scratch_operands = 0 : i64, tpu.core_type = #tpu.core_type<tc>} {
    %c0 = arith.constant 0 : index
    %c0_0 = arith.constant 0 : index
    %0 = vector.load %arg0[%c0, %c0_0] : memref<2x2176xbf16, #tpu.memory_space<vmem>>, vector<2x2176xbf16>
    %c0_1 = arith.constant 0 : index
    %c0_2 = arith.constant 0 : index
    %1 = vector.load %arg1[%c0_1, %c0_2] : memref<2176x128xbf16, #tpu.memory_space<vmem>>, vector<2176x128xbf16>
    %cst = arith.constant dense<0.000000e+00> : vector<2x128xf32>
    %2 = tpu.matmul %0, %1, %cst {dimension_numbers = #tpu.dot_dimension_numbers<[1], [0], [0], [1], [0, 0, 1, 1], [], []>} : vector<2x2176xbf16>, vector<2176x128xbf16>, vector<2x128xf32> -> vector<2x128xf32>
    %c0_3 = arith.constant 0 : index
    %c0_4 = arith.constant 0 : index
    %3 = vector.load %arg2[%c0_3, %c0_4] : memref<1x128xf32, #tpu.memory_space<vmem>>, vector<1x128xf32>
    %4 = vector.broadcast %3 : vector<1x128xf32> to vector<2x128xf32>
    %5 = arith.addf %2, %4 : vector<2x128xf32>
    %c0_5 = arith.constant 0 : index
    %c0_6 = arith.constant 0 : index
    %6 = vector.load %arg3[%c0_5, %c0_6] : memref<2x128xf32, #tpu.memory_space<vmem>>, vector<2x128xf32>
    tpu.vector_store %arg3[%c0_5, %c0_6], %5 {strides = array<i32>} : memref<2x128xf32, #tpu.memory_space<vmem>>, vector<2x128xf32>,
    return
  }
}

</mosaic_0001>

<bundles_post_ra>
// kernel: cnn_encoder_forward.4
= control target key start
LH: loop header
LB: loop body
LE: loop exit
PB: predicated region body
PF: predicated region fallthrough
CT: control target
= control target key end

     0   :  { %s4946_s15 = smov 0   ;;  %s6224_s0 = inlined_call_operand.vmem [shape: bf16[2,4,484,75], index: 0, kind: input, shape index: {}]   ;;  %s6225_s1 = inlined_call_operand.vmem [shape: bf16[75,128], index: 1, kind: input, shape index: {}]   ;;  %s6226_s2 = inlined_call_operand.vmem [shape: f32[1,128], index: 2, kind: input, shape index: {}]   ;;  %s6227_s3 = inlined_call_operand.vmem [shape: f32[1,128], index: 3, kind: input, shape index: {}]   ;;  %s6228_s4 = inlined_call_operand.vmem [shape: bf16[2,484,128], index: 4, kind: output, shape index: {}]  }
   0x1 LB: > { %s3338_s16 = sadd.s32 4294967295, %s4916_s15   ;;  %p3342_p0 = scmp.ge.s32.totalorder %s4916_s15, 1  ;;  %s4916_s15 = sphi %s4946_s15, %s14_s15  }
   0x2   : > { %p162_p1 = scmp.lt.s32.totalorder %s4916_s15, 3 }
   0x4   : > { %p163_p2 = pnand %p3342_p0, %p162_p1 }
   0x6   : > { %166 = sbr.rel (%p163_p2) target bundleno = 747 (0x2eb), region = 36 }
   0xd   : > { %v4779_v0 = vld [vmem:[%s6225_s1] sm:$0xff]   ;;  %v6229_v1 = vmov 0.0   ;;  %v4780_v2 = vld [vmem:[%s6225_s1 + $0x8] sm:$0xff]   ;;  %vm546_vm0 = vcmask 1044480   ;;  %p188_p3 = scmp.lt.s32.totalorder %s3338_s16, 1  ;;  %v4781_v3 = vld [vmem:[%s6225_s1 + $0x10] sm:$0xff]  }
   0xe   : > { %4230 = vmatprep.subr.bf16.mxu0 %v6229_v1  ;;  %4364 = vmatprep.subr.bf16.mxu1 %v6229_v1  ;;  %vm547_vm1 = vcmask 1045504   ;;  %v4919_v4 = vmov 65535   ;;  %vm4920_vm2 = vmmov 0   ;;  %v4782_v6 = vld [vmem:[%s6225_s1 + $0x18] sm:$0xff]   ;;  %v4783_v7 = vld [vmem:[%s6225_s1 + $0x20] sm:$0x3f]  }
   0xf   : > { %4231 = vmatpush3.bf16.msra.mxu0 %v4779_v0  ;;  %4365 = vmatpush3.bf16.msra.mxu1 %v4779_v0  ;;  %s6525_s16 = smov (!%p188_p3, %s3338_s16), 1  ;;  %v548_v5 = vsel %vm546_vm0, 4294967295, %v4919_v4  ;;  %vm452_vm3 = vcmask 613376  }
  0x10   : > { %4232 = vmatprep.subr.bf16.mxu0 %v6229_v1  ;;  %4366 = vmatprep.subr.bf16.mxu1 %v6229_v1  ;;  %s4766_s23 = smul.u32 976, %s6525_s16  ;;  %v549_v8 = vsel %vm547_vm1, %v548_v5, 0 }
  0x11   : > { %4240 = vmatprep.mubr.msk.bf16.mxu0 %vm4920_vm2, %v6229_v1  ;;  %4374 = vmatprep.mubr.msk.bf16.mxu1 %vm4920_vm2, %v6229_v1  ;;  %v551_v9 = vand.u32 %v4783_v7, %v549_v8  ;;  %s4767_s9 = smul.u32 244, %s6525_s16 }
  0x12   : > { %s4987_s30 = scalar_lea.vmem %s6224_s0, %s4766_s23 }
  0x13   : > { %4233 = vmatpush3.bf16.msra.mxu0 %v4780_v2  ;;  %4367 = vmatpush3.bf16.msra.mxu1 %v4780_v2  ;;  %v4784_v10 = vld [vmem:[%s4987_s30] sm:$0xff]   ;;  %v4785_v11 = vld [vmem:[%s4987_s30 + $0xf4] sm:$0xff]   ;;  %v4786_v12 = vld [vmem:[%s4987_s30 + $0x8] sm:$0xff]   ;;  %s5871_s12 = scalar_lea.vmem %s6228_s4, %s4767_s9 }
  0x14   : > { %4234 = vmatprep.subr.bf16.mxu0 %v6229_v1  ;;  %4368 = vmatprep.subr.bf16.mxu1 %v6229_v1  ;;  %v4787_v13 = vld [vmem:[%s4987_s30 + $0xfc] sm:$0xff]   ;;  %v4788_v14 = vld [vmem:[%s4987_s30 + $0x10] sm:$0xff]   ;;  %v4789_v15 = vld [vmem:[%s4987_s30 + $0x104] sm:$0xff]  }
  0x15   : > { %v4790_v16 = vld [vmem:[%s4987_s30 + $0x18] sm:$0xff]   ;;  %v4791_v17 = vld [vmem:[%s4987_s30 + $0x10c] sm:$0xff]   ;;  %v4792_v18 = vld [vmem:[%s4987_s30 + $0x20] sm:$0xff]  }
  0x16   : > { %v4793_v19 = vld [vmem:[%s4987_s30 + $0x114] sm:$0xff]   ;;  %v4794_v20 = vld [vmem:[%s4987_s30 + $0x28] sm:$0xff]   ;;  %v4795_v21 = vld [vmem:[%s4987_s30 + $0x11c] sm:$0xff]  }
  0x17   : > { %4235 = vmatpush3.bf16.msra.mxu0 %v4781_v3  ;;  %4369 = vmatpush3.bf16.msra.mxu1 %v4781_v3  ;;  %v4796_v22 = vld [vmem:[%s4987_s30 + $0x30] sm:$0xff]   ;;  %v4797_v23 = vld [vmem:[%s4987_s30 + $0x124] sm:$0xff]   ;;  %v4798_v24 = vld [vmem:[%s4987_s30 + $0x38] sm:$0xff]  }
  0x18   : > { %4236 = vmatprep.subr.bf16.mxu0 %v6229_v1  ;;  %4370 = vmatprep.subr.bf16.mxu1 %v6229_v1  ;;  %v4799_v25 = vld [vmem:[%s4987_s30 + $0x12c] sm:$0xff]   ;;  %v4800_v26 = vld [vmem:[%s4987_s30 + $0x40] sm:$0xff]   ;;  %v4801_v27 = vld [vmem:[%s4987_s30 + $0x134] sm:$0xff]  }
  0x19   : > { %v4802_v28 = vld [vmem:[%s4987_s30 + $0x48] sm:$0xff]   ;;  %v4803_v29 = vld [vmem:[%s4987_s30 + $0x13c] sm:$0xff]   ;;  %v4804_v30 = vld [vmem:[%s4987_s30 + $0x50] sm:$0xff]  }
  0x1a   : > { %v4805_v31 = vld [vmem:[%s4987_s30 + $0x144] sm:$0xff]   ;;  %v4806_v32 = vld [vmem:[%s4987_s30 + $0x58] sm:$0xff]   ;;  %v4807_v33 = vld [vmem:[%s4987_s30 + $0x14c] sm:$0xff]  }
  0x1b   : > { %4237 = vmatpush3.bf16.msra.mxu0 %v4782_v6  ;;  %4371 = vmatpush3.bf16.msra.mxu1 %v4782_v6  ;;  %v4808_v34 = vld [vmem:[%s4987_s30 + $0x60] sm:$0xff]   ;;  %v4809_v35 = vld [vmem:[%s4987_s30 + $0x154] sm:$0xff]   ;;  %v4810_v36 = vld [vmem:[%s4987_s30 + $0x68] sm:$0xff]  }
  0x1c   : > { %4238 = vmatprep.subr.bf16.mxu0 %v6229_v1  ;;  %4372 = vmatprep.subr.bf16.mxu1 %v6229_v1  ;;  %v4811_v37 = vld [vmem:[%s4987_s30 + $0x15c] sm:$0xff]   ;;  %v4812_v38 = vld [vmem:[%s4987_s30 + $0x70] sm:$0xff]   ;;  %v4813_v39 = vld [vmem:[%s4987_s30 + $0x164] sm:$0xff]  }
  0x1d   : > { %v4814_v40 = vld [vmem:[%s4987_s30 + $0x78] sm:$0xff]   ;;  %v4815_v41 = vld [vmem:[%s4987_s30 + $0x16c] sm:$0xff]   ;;  %v4816_v42 = vld [vmem:[%s4987_s30 + $0x80] sm:$0xff]  }
  0x1e   : > { %v4817_v43 = vld [vmem:[%s4987_s30 + $0x174] sm:$0xff]   ;;  %v4818_v44 = vld [vmem:[%s4987_s30 + $0x88] sm:$0xff]   ;;  %v4819_v45 = vld [vmem:[%s4987_s30 + $0x17c] sm:$0xff]  }
  0x1f   : > { %4239 = vmatpush3.bf16.msra.mxu0 %v551_v9  ;;  %4373 = vmatpush3.bf16.msra.mxu1 %v551_v9  ;;  %v4820_v46 = vld [vmem:[%s4987_s30 + $0x90] sm:$0xff]   ;;  %v4821_v47 = vld [vmem:[%s4987_s30 + $0x184] sm:$0xff]   ;;  %v4822_v48 = vld [vmem:[%s4987_s30 + $0x98] sm:$0xff]  }
  0x20   : > { %4498 = vmatprep.subr.bf16.mxu0 %v6229_v1  ;;  %4632 = vmatprep.subr.bf16.mxu1 %v6229_v1  ;;  %v4823_v49 = vld [vmem:[%s4987_s30 + $0x18c] sm:$0xff]   ;;  %v4824_v50 = vld [vmem:[%s4987_s30 + $0xa0] sm:$0xff]   ;;  %v4825_v51 = vld [vmem:[%s4987_s30 + $0x194] sm:$0xff]  }
  0x21   : > { %v4826_v52 = vld [vmem:[%s4987_s30 + $0xa8] sm:$0xff]   ;;  %v4827_v53 = vld [vmem:[%s4987_s30 + $0x19c] sm:$0xff]   ;;  %v4828_v54 = vld [vmem:[%s4987_s30 + $0xb0] sm:$0xff]  }
  0x22   : > { %4241 = vmatmul.mubr.msk.bf16.vlgmr.msra.gmra.mrb[0].mxu0 %vm452_vm3, %v4784_v10  ;;  %4375 = vmatmul.mubr.msk.bf16.vlgmr.msra.gmra.mrb[0].mxu1 %vm452_vm3, %v4785_v11  ;;  %v4829_v55 = vld [vmem:[%s4987_s30 + $0x1a4] sm:$0xff]   ;;  %v4830_v56 = vld [vmem:[%s4987_s30 + $0xb8] sm:$0xff]   ;;  %v4831_v57 = vld [vmem:[%s4987_s30 + $0x1ac] sm:$0xff]  }
  0x23   : > { %4499 = vmatpush3.bf16.msra.mxu0 %v4779_v0  ;;  %4633 = vmatpush3.bf16.msra.mxu1 %v4779_v0  ;;  %v4832_v58 = vld [vmem:[%s4987_s30 + $0xc0] sm:$0xff]   ;;  %v4833_v59 = vld [vmem:[%s4987_s30 + $0x1b4] sm:$0xff]   ;;  %v4834_v60 = vld [vmem:[%s4987_s30 + $0xc8] sm:$0xff]  }
  0x24   : > { %4244 = vmatprep.mubr.msk.bf16.mxu0 %vm4920_vm2, %v6229_v1  ;;  %4378 = vmatprep.mubr.msk.bf16.mxu1 %vm4920_vm2, %v6229_v1  ;;  %v4835_v61 = vld [vmem:[%s4987_s30 + $0x1bc] sm:$0xff]   ;;  %v4836_v62 = vld [vmem:[%s4987_s30 + $0xd0] sm:$0xff]   ;;  %v4837_v63 = vld [vmem:[%s4987_s30 + $0x1c4] sm:$0xff]  }
  0x25   : > { %4500 = vmatprep.subr.bf16.mxu0 %v6229_v1  ;;  %4634 = vmatprep.subr.bf16.mxu1 %v6229_v1  ;;  %v4839_v7 = vld [vmem:[%s4987_s30 + $0x1cc] sm:$0xff]  }
  0x27   : > { %4501 = vmatpush3.bf16.msra.mxu0 %v4780_v2  ;;  %4635 = vmatpush3.bf16.msra.mxu1 %v4780_v2 }
  0x28   : > { %4502 = vmatprep.subr.bf16.mxu0 %v6229_v1  ;;  %4636 = vmatprep.subr.bf16.mxu1 %v6229_v1 }
  0x2a   : > { %4245 = vmatmul.mubr.msk.bf16.gmra.mrb[4].mxu0 %vm452_vm3, %v4786_v12  ;;  %4379 = vmatmul.mubr.msk.bf16.gmra.mrb[4].mxu1 %vm452_vm3, %v4787_v13 }
  0x2b   : > { %4248 = vmatprep.mubr.msk.bf16.mxu0 %vm4920_vm2, %v6229_v1  ;;  %4382 = vmatprep.mubr.msk.bf16.mxu1 %vm4920_vm2, %v6229_v1 }
  0x2c   : > { %4503 = vmatpush3.bf16.msra.mxu0 %v4781_v3  ;;  %4637 = vmatpush3.bf16.msra.mxu1 %v4781_v3 }
  0x2d   : > { %4504 = vmatprep.subr.bf16.mxu0 %v6229_v1  ;;  %4638 = vmatprep.subr.bf16.mxu1 %v6229_v1 }
  0x30   : > { %4505 = vmatpush3.bf16.msra.mxu0 %v4782_v6  ;;  %4639 = vmatpush3.bf16.msra.mxu1 %v4782_v6  ;;  %v4838_v6 = vld [vmem:[%s4987_s30 + $0xd8] sm:$0xff]  }
  0x31   : > { %4506 = vmatprep.subr.bf16.mxu0 %v6229_v1  ;;  %4640 = vmatprep.subr.bf16.mxu1 %v6229_v1 }
  0x32   : > { %4249 = vmatmul.mubr.msk.bf16.gmra.mrb[8].mxu0 %vm452_vm3, %v4788_v14  ;;  %4383 = vmatmul.mubr.msk.bf16.gmra.mrb[8].mxu1 %vm452_vm3, %v4789_v15 }
  0x33   : > { %4252 = vmatprep.mubr.msk.bf16.mxu0 %vm4920_vm2, %v6229_v1  ;;  %4386 = vmatprep.mubr.msk.bf16.mxu1 %vm4920_vm2, %v6229_v1 }
  0x34   : > { %4507 = vmatpush3.bf16.msra.mxu0 %v551_v9  ;;  %4641 = vmatpush3.bf16.msra.mxu1 %v551_v9 }
  0x3a   : > { %4253 = vmatmul.mubr.msk.bf16.gmra.mrb[12].mxu0 %vm452_vm3, %v4790_v16  ;;  %4387 = vmatmul.mubr.msk.bf16.gmra.mrb[12].mxu1 %vm452_vm3, %v4791_v17 }
  0x3b   : > { %4256 = vmatprep.mubr.msk.bf16.mxu0 %vm4920_vm2, %v6229_v1  ;;  %4390 = vmatprep.mubr.msk.bf16.mxu1 %vm4920_vm2, %v6229_v1 }
  0x42   : > { %4257 = vmatmul.mubr.msk.bf16.gmra.mrb[16].mxu0 %vm452_vm3, %v4792_v18  ;;  %4391 = vmatmul.mubr.msk.bf16.gmra.mrb[16].mxu1 %vm452_vm3, %v4793_v19  ;;  %v4840_v18 = vld [vmem:[%s4987_s30 + $0xe0] sm:$0xff]   ;;  %v4841_v19 = vld [vmem:[%s4987_s30 + $0x1d4] sm:$0xff]  }
  0x43   : > { %4260 = vmatprep.mubr.msk.bf16.mxu0 %vm4920_vm2, %v6229_v1  ;;  %4394 = vmatprep.mubr.msk.bf16.mxu1 %vm4920_vm2, %v6229_v1 }
  0x4a   : > { %4261 = vmatmul.mubr.msk.bf16.gmra.mrb[20].mxu0 %vm452_vm3, %v4794_v20  ;;  %4395 = vmatmul.mubr.msk.bf16.gmra.mrb[20].mxu1 %vm452_vm3, %v4795_v21 }
  0x4b   : > { %4264 = vmatprep.mubr.msk.bf16.mxu0 %vm4920_vm2, %v6229_v1  ;;  %4398 = vmatprep.mubr.msk.bf16.mxu1 %vm4920_vm2, %v6229_v1 }
  0x52   : > { %4265 = vmatmul.mubr.msk.bf16.gmra.mrb[24].mxu0 %vm452_vm3, %v4796_v22  ;;  %4399 = vmatmul.mubr.msk.bf16.gmra.mrb[24].mxu1 %vm452_vm3, %v4797_v23 }
  0x53   : > { %4268 = vmatprep.mubr.msk.bf16.mxu0 %vm4920_vm2, %v6229_v1  ;;  %4402 = vmatprep.mubr.msk.bf16.mxu1 %vm4920_vm2, %v6229_v1 }
  0x5a   : > { %4269 = vmatmul.mubr.msk.bf16.gmra.mrb[28].mxu0 %vm452_vm3, %v4798_v24  ;;  %4403 = vmatmul.mubr.msk.bf16.gmra.mrb[28].mxu1 %vm452_vm3, %v4799_v25 }
  0x5b   : > { %4272 = vmatprep.mubr.msk.bf16.mxu0 %vm4920_vm2, %v6229_v1  ;;  %4406 = vmatprep.mubr.msk.bf16.mxu1 %vm4920_vm2, %v6229_v1 }
  0x62   : > { %4273 = vmatmul.mubr.msk.bf16.gmra.mrb[32].mxu0 %vm452_vm3, %v4800_v26  ;;  %4407 = vmatmul.mubr.msk.bf16.gmra.mrb[32].mxu1 %vm452_vm3, %v4801_v27 }
  0x63   : > { %4276 = vmatprep.mubr.msk.bf16.mxu0 %vm4920_vm2, %v6229_v1  ;;  %4410 = vmatprep.mubr.msk.bf16.mxu1 %vm4920_vm2, %v6229_v1 }
  0x6a   : > { %4277 = vmatmul.mubr.msk.bf16.gmra.mrb[36].mxu0 %vm452_vm3, %v4802_v28  ;;  %4411 = vmatmul.mubr.msk.bf16.gmra.mrb[36].mxu1 %vm452_vm3, %v4803_v29 }
  0x6b   : > { %4280 = vmatprep.mubr.msk.bf16.mxu0 %vm4920_vm2, %v6229_v1  ;;  %4414 = vmatprep.mubr.msk.bf16.mxu1 %vm4920_vm2, %v6229_v1 }
  0x72   : > { %4281 = vmatmul.mubr.msk.bf16.gmra.mrb[40].mxu0 %vm452_vm3, %v4804_v30  ;;  %4415 = vmatmul.mubr.msk.bf16.gmra.mrb[40].mxu1 %vm452_vm3, %v4805_v31  ;;  %v4842_v30 = vld [vmem:[%s4987_s30 + $0xe8] sm:$0xff]   ;;  %v4843_v31 = vld [vmem:[%s4987_s30 + $0x1dc] sm:$0xff]  }
  0x73   : > { %4284 = vmatprep.mubr.msk.bf16.mxu0 %vm4920_vm2, %v6229_v1  ;;  %4418 = vmatprep.mubr.msk.bf16.mxu1 %vm4920_vm2, %v6229_v1 }
  0x7a   : > { %4285 = vmatmul.mubr.msk.bf16.gmra.mrb[44].mxu0 %vm452_vm3, %v4806_v32  ;;  %4419 = vmatmul.mubr.msk.bf16.gmra.mrb[44].mxu1 %vm452_vm3, %v4807_v33 }
  0x7b   : > { %4288 = vmatprep.mubr.msk.bf16.mxu0 %vm4920_vm2, %v6229_v1  ;;  %4422 = vmatprep.mubr.msk.bf16.mxu1 %vm4920_vm2, %v6229_v1 }
  0x82   : > { %4289 = vmatmul.mubr.msk.bf16.gmra.mrb[48].mxu0 %vm452_vm3, %v4808_v34  ;;  %4423 = vmatmul.mubr.msk.bf16.gmra.mrb[48].mxu1 %vm452_vm3, %v4809_v35 }
  0x83   : > { %4292 = vmatprep.mubr.msk.bf16.mxu0 %vm4920_vm2, %v6229_v1  ;;  %4426 = vmatprep.mubr.msk.bf16.mxu1 %vm4920_vm2, %v6229_v1 }
  0x8a   : > { %4293 = vmatmul.mubr.msk.bf16.gmra.mrb[52].mxu0 %vm452_vm3, %v4810_v36  ;;  %4427 = vmatmul.mubr.msk.bf16.gmra.mrb[52].mxu1 %vm452_vm3, %v4811_v37 }
  0x8b   : > { %4296 = vmatprep.mubr.msk.bf16.mxu0 %vm4920_vm2, %v6229_v1  ;;  %4430 = vmatprep.mubr.msk.bf16.mxu1 %vm4920_vm2, %v6229_v1 }
  0x92   : > { %4297 = vmatmul.mubr.msk.bf16.gmra.mrb[56].mxu0 %vm452_vm3, %v4812_v38  ;;  %4431 = vmatmul.mubr.msk.bf16.gmra.mrb[56].mxu1 %vm452_vm3, %v4813_v39  ;;  %v4844_v39 = vld [vmem:[%s4987_s30 + $0xf0] ss:$0 sps:$4 sm:$0x33]  }
  0x93   : > { %4300 = vmatprep.mubr.msk.bf16.mxu0 %vm4920_vm2, %v6229_v1  ;;  %4434 = vmatprep.mubr.msk.bf16.mxu1 %vm4920_vm2, %v6229_v1 }
  0x9a   : > { %4301 = vmatmul.mubr.msk.bf16.gmra.mrb[60].mxu0 %vm452_vm3, %v4814_v40  ;;  %4435 = vmatmul.mubr.msk.bf16.gmra.mrb[60].mxu1 %vm452_vm3, %v4815_v41 }
  0x9b   : > { %4304 = vmatprep.mubr.msk.bf16.mxu0 %vm4920_vm2, %v6229_v1  ;;  %4438 = vmatprep.mubr.msk.bf16.mxu1 %vm4920_vm2, %v6229_v1 }
  0xa2   : > { %4305 = vmatmul.mubr.msk.bf16.gmra.mrb[64].mxu0 %vm452_vm3, %v4816_v42  ;;  %4439 = vmatmul.mubr.msk.bf16.gmra.mrb[64].mxu1 %vm452_vm3, %v4817_v43  ;;  %v4845_v43 = vld [vmem:[%s4987_s30 + $0x1e4] ss:$0 sps:$4 sm:$0x33]  }
  0xa3   : > { %4308 = vmatprep.mubr.msk.bf16.mxu0 %vm4920_vm2, %v6229_v1  ;;  %4442 = vmatprep.mubr.msk.bf16.mxu1 %vm4920_vm2, %v6229_v1 }
  0xaa   : > { %4309 = vmatmul.mubr.msk.bf16.gmra.mrb[68].mxu0 %vm452_vm3, %v4818_v44  ;;  %4443 = vmatmul.mubr.msk.bf16.gmra.mrb[68].mxu1 %vm452_vm3, %v4819_v45 }
  0xab   : > { %4312 = vmatprep.mubr.msk.bf16.mxu0 %vm4920_vm2, %v6229_v1  ;;  %4446 = vmatprep.mubr.msk.bf16.mxu1 %vm4920_vm2, %v6229_v1 }
  0xb2   : > { %4313 = vmatmul.mubr.msk.bf16.gmra.mrb[72].mxu0 %vm452_vm3, %v4820_v46  ;;  %4447 = vmatmul.mubr.msk.bf16.gmra.mrb[72].mxu1 %vm452_vm3, %v4821_v47 }
  0xb3   : > { %4316 = vmatprep.mubr.msk.bf16.mxu0 %vm4920_vm2, %v6229_v1  ;;  %4450 = vmatprep.mubr.msk.bf16.mxu1 %vm4920_vm2, %v6229_v1 }
  0xba   : > { %4317 = vmatmul.mubr.msk.bf16.gmra.mrb[76].mxu0 %vm452_vm3, %v4822_v48  ;;  %4451 = vmatmul.mubr.msk.bf16.gmra.mrb[76].mxu1 %vm452_vm3, %v4823_v49 }
  0xbb   : > { %4320 = vmatprep.mubr.msk.bf16.mxu0 %vm4920_vm2, %v6229_v1  ;;  %4454 = vmatprep.mubr.msk.bf16.mxu1 %vm4920_vm2, %v6229_v1 }
  0xc2   : > { %4321 = vmatmul.mubr.msk.bf16.gmra.mrb[80].mxu0 %vm452_vm3, %v4824_v50  ;;  %4455 = vmatmul.mubr.msk.bf16.gmra.mrb[80].mxu1 %vm452_vm3, %v4825_v51 }
  0xc3   : > { %4324 = vmatprep.mubr.msk.bf16.mxu0 %vm4920_vm2, %v6229_v1  ;;  %4458 = vmatprep.mubr.msk.bf16.mxu1 %vm4920_vm2, %v6229_v1 }
  0xca   : > { %4325 = vmatmul.mubr.msk.bf16.gmra.mrb[84].mxu0 %vm452_vm3, %v4826_v52  ;;  %4459 = vmatmul.mubr.msk.bf16.gmra.mrb[84].mxu1 %vm452_vm3, %v4827_v53 }
  0xcb   : > { %4328 = vmatprep.mubr.msk.bf16.mxu0 %vm4920_vm2, %v6229_v1  ;;  %4462 = vmatprep.mubr.msk.bf16.mxu1 %vm4920_vm2, %v6229_v1 }
  0xd2   : > { %4329 = vmatmul.mubr.msk.bf16.gmra.mrb[88].mxu0 %vm452_vm3, %v4828_v54  ;;  %4463 = vmatmul.mubr.msk.bf16.gmra.mrb[88].mxu1 %vm452_vm3, %v4829_v55  ;;  %v4846_v54 = vld [vmem:[%s4987_s30 + $0x1e8] sm:$0xff]   ;;  %v4847_v55 = vld [vmem:[%s4987_s30 + $0x2dc] sm:$0xff]  }
  0xd3   : > { %4332 = vmatprep.mubr.msk.bf16.mxu0 %vm4920_vm2, %v6229_v1  ;;  %4466 = vmatprep.mubr.msk.bf16.mxu1 %vm4920_vm2, %v6229_v1 }
  0xda   : > { %4333 = vmatmul.mubr.msk.bf16.gmra.mrb[92].mxu0 %vm452_vm3, %v4830_v56  ;;  %4467 = vmatmul.mubr.msk.bf16.gmra.mrb[92].mxu1 %vm452_vm3, %v4831_v57 }
  0xdb   : > { %4336 = vmatprep.mubr.msk.bf16.mxu0 %vm4920_vm2, %v6229_v1  ;;  %4470 = vmatprep.mubr.msk.bf16.mxu1 %vm4920_vm2, %v6229_v1 }
  0xe2   : > { %4337 = vmatmul.mubr.msk.bf16.gmra.mrb[96].mxu0 %vm452_vm3, %v4832_v58  ;;  %4471 = vmatmul.mubr.msk.bf16.gmra.mrb[96].mxu1 %vm452_vm3, %v4833_v59 }
  0xe3   : > { %4340 = vmatprep.mubr.msk.bf16.mxu0 %vm4920_vm2, %v6229_v1  ;;  %4474 = vmatprep.mubr.msk.bf16.mxu1 %vm4920_vm2, %v6229_v1 }
  0xea   : > { %4341 = vmatmul.mubr.msk.bf16.gmra.mrb[100].mxu0 %vm452_vm3, %v4834_v60  ;;  %4475 = vmatmul.mubr.msk.bf16.gmra.mrb[100].mxu1 %vm452_vm3, %v4835_v61 }
  0xeb   : > { %4344 = vmatprep.mubr.msk.bf16.mxu0 %vm4920_vm2, %v6229_v1  ;;  %4478 = vmatprep.mubr.msk.bf16.mxu1 %vm4920_vm2, %v6229_v1 }
  0xf2   : > { %4345 = vmatmul.mubr.msk.bf16.gmra.mrb[104].mxu0 %vm452_vm3, %v4836_v62  ;;  %4479 = vmatmul.mubr.msk.bf16.gmra.mrb[104].mxu1 %vm452_vm3, %v4837_v63 }
  0xf3   : > { %4348 = vmatprep.mubr.msk.bf16.mxu0 %vm4920_vm2, %v6229_v1  ;;  %4482 = vmatprep.mubr.msk.bf16.mxu1 %vm4920_vm2, %v6229_v1 }
  0xf5   : > { %v5217_v0 = vpop.f32.mrb[0].mxu0  ;;  %v5219_v2 = vpop.f32.mrb[0].mxu1 }
  0xf6   : > { %v4242_v4 = vpop.f32.mrb[1].mxu0  ;;  %v4376_v5 = vpop.f32.mrb[1].mxu1 }
  0xf7   : > { %v5225_v8 = vpop.f32.mrb[2].mxu0  ;;  %v5227_v9 = vpop.f32.mrb[2].mxu1 }
  0xf8   : > { %v4243_v11 = vpop.f32.mrb[3].mxu0  ;;  %v4377_v12 = vpop.f32.mrb[3].mxu1 }
  0xfa   : > { %4349 = vmatmul.mubr.msk.bf16.gmra.mrb[108].mxu0 %vm452_vm3, %v4838_v6  ;;  %4483 = vmatmul.mubr.msk.bf16.gmra.mrb[108].mxu1 %vm452_vm3, %v4839_v7  ;;  %v4848_v6 = vld [vmem:[%s4987_s30 + $0x1f0] sm:$0xff]   ;;  %v4849_v7 = vld [vmem:[%s4987_s30 + $0x2e4] sm:$0xff]  }
  0xfb   : > { %4352 = vmatprep.mubr.msk.bf16.mxu0 %vm4920_vm2, %v6229_v1  ;;  %4486 = vmatprep.mubr.msk.bf16.mxu1 %vm4920_vm2, %v6229_v1 }
  0xfd   : > { %v5237_v13 = vpop.f32.mrb[4].mxu0  ;;  %v5239_v14 = vpop.f32.mrb[4].mxu1 }
  0xfe   : > { %v4246_v16 = vpop.f32.mrb[5].mxu0  ;;  %v4380_v17 = vpop.f32.mrb[5].mxu1 }
  0xff   : > { %v5245_v20 = vpop.f32.mrb[6].mxu0  ;;  %v5247_v21 = vpop.f32.mrb[6].mxu1 }
 0x100   : > { %v4247_v23 = vpop.f32.mrb[7].mxu0  ;;  %v4381_v24 = vpop.f32.mrb[7].mxu1 }
 0x102   : > { %4353 = vmatmul.mubr.msk.bf16.gmra.mrb[112].mxu0 %vm452_vm3, %v4840_v18  ;;  %4487 = vmatmul.mubr.msk.bf16.gmra.mrb[112].mxu1 %vm452_vm3, %v4841_v19 }
 0x103   : > { %4356 = vmatprep.mubr.msk.bf16.mxu0 %vm4920_vm2, %v6229_v1  ;;  %4490 = vmatprep.mubr.msk.bf16.mxu1 %vm4920_vm2, %v6229_v1 }
 0x105   : > { %v5257_v25 = vpop.f32.mrb[8].mxu0  ;;  %v5259_v26 = vpop.f32.mrb[8].mxu1 }
 0x106   : > { %v4250_v28 = vpop.f32.mrb[9].mxu0  ;;  %v4384_v29 = vpop.f32.mrb[9].mxu1 }
 0x107   : > { %v5265_v32 = vpop.f32.mrb[10].mxu0  ;;  %v5267_v33 = vpop.f32.mrb[10].mxu1 }
 0x108   : > { %v4251_v35 = vpop.f32.mrb[11].mxu0  ;;  %v4385_v36 = vpop.f32.mrb[11].mxu1 }
 0x10a   : > { %4357 = vmatmul.mubr.msk.bf16.gmra.mrb[116].mxu0 %vm452_vm3, %v4842_v30  ;;  %4491 = vmatmul.mubr.msk.bf16.gmra.mrb[116].mxu1 %vm452_vm3, %v4843_v31  ;;  %v4850_v30 = vld [vmem:[%s4987_s30 + $0x1f8] sm:$0xff]   ;;  %v4851_v31 = vld [vmem:[%s4987_s30 + $0x2ec] sm:$0xff]  }
 0x10b   : > { %4360 = vmatprep.mubr.msk.bf16.mxu0 %vm4920_vm2, %v6229_v1  ;;  %4494 = vmatprep.mubr.msk.bf16.mxu1 %vm4920_vm2, %v6229_v1 }
 0x10d   : > { %v5277_v37 = vpop.f32.mrb[12].mxu0  ;;  %v5279_v38 = vpop.f32.mrb[12].mxu1 }
 0x10e   : > { %v4254_v41 = vpop.f32.mrb[13].mxu0  ;;  %v4388_v42 = vpop.f32.mrb[13].mxu1 }
 0x10f   : > { %v5285_v44 = vpop.f32.mrb[14].mxu0  ;;  %v5287_v45 = vpop.f32.mrb[14].mxu1 }
 0x110   : > { %v4255_v47 = vpop.f32.mrb[15].mxu0  ;;  %v4389_v48 = vpop.f32.mrb[15].mxu1 }
 0x112   : > { %4361 = vmatmul.mubr.msk.bf16.gmra.mrb[120].mxu0 %vm452_vm3, %v4844_v39  ;;  %4495 = vmatmul.mubr.msk.bf16.gmra.mrb[120].mxu1 %vm452_vm3, %v4845_v43 }
 0x113   : > { %4508 = vmatprep.mubr.msk.bf16.mxu0 %vm4920_vm2, %v6229_v1  ;;  %4642 = vmatprep.mubr.msk.bf16.mxu1 %vm4920_vm2, %v6229_v1 }
 0x115   : > { %v5297_v49 = vpop.f32.mrb[16].mxu0  ;;  %v5299_v50 = vpop.f32.mrb[16].mxu1 }
 0x116   : > { %v4258_v52 = vpop.f32.mrb[17].mxu0  ;;  %v4392_v53 = vpop.f32.mrb[17].mxu1 }
 0x117   : > { %v5305_v56 = vpop.f32.mrb[18].mxu0  ;;  %v5307_v57 = vpop.f32.mrb[18].mxu1 }
 0x118   : > { %v4259_v59 = vpop.f32.mrb[19].mxu0  ;;  %v4393_v60 = vpop.f32.mrb[19].mxu1 }
 0x11a   : > { %4509 = vmatmul.mubr.msk.bf16.vlgmr.msra.gmra.mrb[124].mxu0 %vm452_vm3, %v4846_v54  ;;  %4643 = vmatmul.mubr.msk.bf16.vlgmr.msra.gmra.mrb[124].mxu1 %vm452_vm3, %v4847_v55  ;;  %v4852_v54 = vld [vmem:[%s4987_s30 + $0x200] sm:$0xff]   ;;  %v4853_v55 = vld [vmem:[%s4987_s30 + $0x2f4] sm:$0xff]  }
 0x11b   : > { %4512 = vmatprep.mubr.msk.bf16.mxu0 %vm4920_vm2, %v6229_v1  ;;  %4646 = vmatprep.mubr.msk.bf16.mxu1 %vm4920_vm2, %v6229_v1 }
 0x11d   : > { %v5317_v61 = vpop.f32.mrb[20].mxu0  ;;  %v5319_v62 = vpop.f32.mrb[20].mxu1 }
 0x11e   : > { %v4262_v4 = vpop.f32.mrb[21].mxu0  ;;  %v4396_v5 = vpop.f32.mrb[21].mxu1 }
 0x11f   : > { %v5325_v11 = vpop.f32.mrb[22].mxu0  ;;  %v5327_v12 = vpop.f32.mrb[22].mxu1 }
 0x120   : > { %v4263_v17 = vpop.f32.mrb[23].mxu0  ;;  %v4397_v18 = vpop.f32.mrb[23].mxu1 }
 0x122   : > { %4513 = vmatmul.mubr.msk.bf16.gmra.mrb[128].mxu0 %vm452_vm3, %v4848_v6  ;;  %4647 = vmatmul.mubr.msk.bf16.gmra.mrb[128].mxu1 %vm452_vm3, %v4849_v7 }
 0x123   : > { %4516 = vmatprep.mubr.msk.bf16.mxu0 %vm4920_vm2, %v6229_v1  ;;  %4650 = vmatprep.mubr.msk.bf16.mxu1 %vm4920_vm2, %v6229_v1 }
 0x125   : > { %v5337_v19 = vpop.f32.mrb[24].mxu0  ;;  %v5339_v23 = vpop.f32.mrb[24].mxu1 }
 0x126   : > { %v4266_v28 = vpop.f32.mrb[25].mxu0  ;;  %v4400_v29 = vpop.f32.mrb[25].mxu1 }
 0x127   : > { %v5345_v35 = vpop.f32.mrb[26].mxu0  ;;  %v5347_v36 = vpop.f32.mrb[26].mxu1 }
 0x128   : > { %v4267_v41 = vpop.f32.mrb[27].mxu0  ;;  %v4401_v42 = vpop.f32.mrb[27].mxu1 }
 0x12a   : > { %4517 = vmatmul.mubr.msk.bf16.gmra.mrb[132].mxu0 %vm452_vm3, %v4850_v30  ;;  %4651 = vmatmul.mubr.msk.bf16.gmra.mrb[132].mxu1 %vm452_vm3, %v4851_v31  ;;  %v4854_v30 = vld [vmem:[%s4987_s30 + $0x208] sm:$0xff]   ;;  %v4855_v31 = vld [vmem:[%s4987_s30 + $0x2fc] sm:$0xff]  }
 0x12b   : > { %4520 = vmatprep.mubr.msk.bf16.mxu0 %vm4920_vm2, %v6229_v1  ;;  %4654 = vmatprep.mubr.msk.bf16.mxu1 %vm4920_vm2, %v6229_v1 }
 0x12d   : > { %v5357_v43 = vpop.f32.mrb[28].mxu0  ;;  %v5359_v47 = vpop.f32.mrb[28].mxu1 }
 0x12e   : > { %v4270_v52 = vpop.f32.mrb[29].mxu0  ;;  %v4404_v53 = vpop.f32.mrb[29].mxu1 }
 0x12f   : > { %v5365_v59 = vpop.f32.mrb[30].mxu0  ;;  %v5367_v60 = vpop.f32.mrb[30].mxu1 }
 0x130   : > { %v4271_v5 = vpop.f32.mrb[31].mxu0  ;;  %v4405_v6 = vpop.f32.mrb[31].mxu1 }
 0x131   : > { %v6319_v6 = vmov 0.0  }
 0x132   : > { %4521 = vmatmul.mubr.msk.bf16.gmra.mrb[136].mxu0 %vm452_vm3, %v4852_v54  ;;  %4655 = vmatmul.mubr.msk.bf16.gmra.mrb[136].mxu1 %vm452_vm3, %v4853_v55 }
 0x133   : > { %4524 = vmatprep.mubr.msk.bf16.mxu0 %vm4920_vm2, %v6229_v1  ;;  %4658 = vmatprep.mubr.msk.bf16.mxu1 %vm4920_vm2, %v6229_v1 }
 0x135   : > { %v5377_v7 = vpop.f32.mrb[32].mxu0  ;;  %v5379_v17 = vpop.f32.mrb[32].mxu1 }
 0x136   : > { %v4274_v28 = vpop.f32.mrb[33].mxu0  ;;  %v4408_v29 = vpop.f32.mrb[33].mxu1 }
 0x137   : > { %v5385_v41 = vpop.f32.mrb[34].mxu0  ;;  %v5387_v42 = vpop.f32.mrb[34].mxu1 }
 0x138   : > { %v4275_v53 = vpop.f32.mrb[35].mxu0  ;;  %v4409_v54 = vpop.f32.mrb[35].mxu1 }
 0x139   : > { %v4856_v53 = vld [vmem:[%s4987_s30 + $0x210] sm:$0xff]  }
 0x13a   : > { %4525 = vmatmul.mubr.msk.bf16.gmra.mrb[140].mxu0 %vm452_vm3, %v4854_v30  ;;  %4659 = vmatmul.mubr.msk.bf16.gmra.mrb[140].mxu1 %vm452_vm3, %v4855_v31  ;;  %v4857_v30 = vld [vmem:[%s4987_s30 + $0x304] sm:$0xff]  }
 0x13b   : > { %4528 = vmatprep.mubr.msk.bf16.mxu0 %vm4920_vm2, %v6229_v1  ;;  %4662 = vmatprep.mubr.msk.bf16.mxu1 %vm4920_vm2, %v6229_v1 }
 0x13d   : > { %v5397_v55 = vpop.f32.mrb[36].mxu0  ;;  %v5399_v5 = vpop.f32.mrb[36].mxu1 }
 0x13e   : > { %v4278_v28 = vpop.f32.mrb[37].mxu0  ;;  %v4412_v29 = vpop.f32.mrb[37].mxu1 }
 0x13f   : > { %v5405_v31 = vpop.f32.mrb[38].mxu0  ;;  %v5407_v54 = vpop.f32.mrb[38].mxu1 }
 0x140   : > { %v4279_v18 = vpop.f32.mrb[39].mxu0  ;;  %v4413_v4 = vpop.f32.mrb[39].mxu1 }
 0x141   : > { %v4858_v4 = vld [vmem:[%s4987_s30 + $0x218] sm:$0xff]  }
 0x142   : > { %4529 = vmatmul.mubr.msk.bf16.gmra.mrb[144].mxu0 %vm452_vm3, %v4856_v53  ;;  %4663 = vmatmul.mubr.msk.bf16.gmra.mrb[144].mxu1 %vm452_vm3, %v4857_v30  ;;  %v4859_v53 = vld [vmem:[%s4987_s30 + $0x30c] sm:$0xff]  }
 0x143   : > { %4532 = vmatprep.mubr.msk.bf16.mxu0 %vm4920_vm2, %v6229_v1  ;;  %4666 = vmatprep.mubr.msk.bf16.mxu1 %vm4920_vm2, %v6229_v1 }
 0x145   : > { %v5417_v28 = vpop.f32.mrb[40].mxu0  ;;  %v5419_v29 = vpop.f32.mrb[40].mxu1 }
 0x146   : > { %v4282_v52 = vpop.f32.mrb[41].mxu0  ;;  %v4416_v18 = vpop.f32.mrb[41].mxu1 }
 0x147   : > { %v5425_v30 = vpop.f32.mrb[42].mxu0  ;;  %v5427_v48 = vpop.f32.mrb[42].mxu1 }
 0x148   : > { %v4283_v24 = vpop.f32.mrb[43].mxu0  ;;  %v4417_v16 = vpop.f32.mrb[43].mxu1 }
 0x149   : > { %v4860_v16 = vld [vmem:[%s4987_s30 + $0x220] sm:$0xff]  }
 0x14a   : > { %4533 = vmatmul.mubr.msk.bf16.gmra.mrb[148].mxu0 %vm452_vm3, %v4858_v4  ;;  %4667 = vmatmul.mubr.msk.bf16.gmra.mrb[148].mxu1 %vm452_vm3, %v4859_v53  ;;  %v4861_v4 = vld [vmem:[%s4987_s30 + $0x314] sm:$0xff]  }
 0x14b   : > { %4536 = vmatprep.mubr.msk.bf16.mxu0 %vm4920_vm2, %v6229_v1  ;;  %4670 = vmatprep.mubr.msk.bf16.mxu1 %vm4920_vm2, %v6229_v1 }
 0x14d   : > { %v5437_v52 = vpop.f32.mrb[44].mxu0  ;;  %v5439_v18 = vpop.f32.mrb[44].mxu1 }
 0x14e   : > { %6308 = vst [vmem:[#allocation2_spill] sm:$0xff] %v5439_v18  ;;  %v4286_v39 = vpop.f32.mrb[45].mxu0  ;;  %v4420_v24 = vpop.f32.mrb[45].mxu1 }
 0x14f   : > { %v5445_v53 = vpop.f32.mrb[46].mxu0  ;;  %v5447_v63 = vpop.f32.mrb[46].mxu1 }
 0x150   : > { %6309 = vst [vmem:[#allocation3_spill] sm:$0xff] %v5445_v53  ;;  %6310 = vst [vmem:[#allocation4_spill] sm:$0xff] %v5447_v63  ;;  %v4287_v51 = vpop.f32.mrb[47].mxu0  ;;  %v4421_v46 = vpop.f32.mrb[47].mxu1 }
 0x151   : > { %v4862_v46 = vld [vmem:[%s4987_s30 + $0x228] sm:$0xff]  }
 0x152   : > { %4537 = vmatmul.mubr.msk.bf16.gmra.mrb[152].mxu0 %vm452_vm3, %v4860_v16  ;;  %4671 = vmatmul.mubr.msk.bf16.gmra.mrb[152].mxu1 %vm452_vm3, %v4861_v4  ;;  %v4863_v16 = vld [vmem:[%s4987_s30 + $0x31c] sm:$0xff]  }
 0x153   : > { %4540 = vmatprep.mubr.msk.bf16.mxu0 %vm4920_vm2, %v6229_v1  ;;  %4674 = vmatprep.mubr.msk.bf16.mxu1 %vm4920_vm2, %v6229_v1 }
 0x155   : > { %v5457_v39 = vpop.f32.mrb[48].mxu0  ;;  %v5459_v24 = vpop.f32.mrb[48].mxu1 }
 0x156   : > { %6311 = vst [vmem:[#allocation5_spill] sm:$0xff] %v5457_v39  ;;  %6312 = vst [vmem:[#allocation6_spill] sm:$0xff] %v5459_v24  ;;  %v4290_v58 = vpop.f32.mrb[49].mxu0  ;;  %v4424_v51 = vpop.f32.mrb[49].mxu1 }
 0x157   : > { %v5465_v4 = vpop.f32.mrb[50].mxu0  ;;  %v5467_v40 = vpop.f32.mrb[50].mxu1 }
 0x158   : > { %6313 = vst [vmem:[#allocation7_spill] sm:$0xff] %v5465_v4  ;;  %6314 = vst [vmem:[#allocation8_spill] sm:$0xff] %v5467_v40  ;;  %v4291_v27 = vpop.f32.mrb[51].mxu0  ;;  %v4425_v22 = vpop.f32.mrb[51].mxu1  ;;  %v6387_v4 = vmax.f32 %v5225_v8, %v5227_v9 }
 0x159   : > { %v4864_v22 = vld [vmem:[%s4987_s30 + $0x230] sm:$0xff]  }
 0x15a   : > { %4541 = vmatmul.mubr.msk.bf16.gmra.mrb[156].mxu0 %vm452_vm3, %v4862_v46  ;;  %4675 = vmatmul.mubr.msk.bf16.gmra.mrb[156].mxu1 %vm452_vm3, %v4863_v16  ;;  %v4865_v46 = vld [vmem:[%s4987_s30 + $0x324] sm:$0xff]  }
 0x15b   : > { %4544 = vmatprep.mubr.msk.bf16.mxu0 %vm4920_vm2, %v6229_v1  ;;  %4678 = vmatprep.mubr.msk.bf16.mxu1 %vm4920_vm2, %v6229_v1 }
 0x15d   : > { %v5477_v58 = vpop.f32.mrb[52].mxu0  ;;  %v5479_v51 = vpop.f32.mrb[52].mxu1 }
 0x15e   : > { %6315 = vst [vmem:[#allocation9_spill] sm:$0xff] %v5477_v58  ;;  %6316 = vst [vmem:[#allocation10_spill] sm:$0xff] %v5479_v51  ;;  %v4294_v34 = vpop.f32.mrb[53].mxu0  ;;  %v4428_v27 = vpop.f32.mrb[53].mxu1  ;;  %v6386_v51 = vmax.f32 %v5217_v0, %v5219_v2  ;;  %v5847_v2 = vld [vmem:[%s6227_s3] ss:$0 sm:$0xff] }
 0x15f   : > { %v5485_v16 = vpop.f32.mrb[54].mxu0  ;;  %v5487_v15 = vpop.f32.mrb[54].mxu1 }
 0x160   : > { %6317 = vst [vmem:[#allocation11_spill] sm:$0xff] %v5485_v16  ;;  %6318 = vst [vmem:[#allocation12_spill] sm:$0xff] %v5487_v15  ;;  %v4295_v3 = vpop.f32.mrb[55].mxu0  ;;  %v4429_v1 = vpop.f32.mrb[55].mxu1 }
 0x161   : > { %v4866_v1 = vld [vmem:[%s4987_s30 + $0x238] sm:$0xff]  }
 0x162   : > { %4545 = vmatmul.mubr.msk.bf16.gmra.mrb[160].mxu0 %vm452_vm3, %v4864_v22  ;;  %4679 = vmatmul.mubr.msk.bf16.gmra.mrb[160].mxu1 %vm452_vm3, %v4865_v46  ;;  %v4867_v22 = vld [vmem:[%s4987_s30 + $0x32c] sm:$0xff]  }
 0x163   : > { %4548 = vmatprep.mubr.msk.bf16.mxu0 %vm4920_vm2, %v6319_v6  ;;  %4682 = vmatprep.mubr.msk.bf16.mxu1 %vm4920_vm2, %v6319_v6 }
 0x165   : > { %v5497_v34 = vpop.f32.mrb[56].mxu0  ;;  %v5499_v27 = vpop.f32.mrb[56].mxu1 }
 0x166   : > { %6320 = vst [vmem:[#allocation13_spill] sm:$0xff] %v5497_v34  ;;  %6321 = vst [vmem:[#allocation14_spill] sm:$0xff] %v5499_v27  ;;  %v4298_v10 = vpop.f32.mrb[57].mxu0  ;;  %v4432_v3 = vpop.f32.mrb[57].mxu1 }
 0x167   : > { %v5505_v46 = vpop.f32.mrb[58].mxu0  ;;  %v5507_v15 = vpop.f32.mrb[58].mxu1 }
 0x168   : > { %6322 = vst [vmem:[#allocation15_spill] sm:$0xff] %v5505_v46  ;;  %6323 = vst [vmem:[#allocation16_spill] sm:$0xff] %v5507_v15  ;;  %v4299_v58 = vpop.f32.mrb[59].mxu0  ;;  %v4433_v40 = vpop.f32.mrb[59].mxu1 }
 0x169   : > { %v4868_v40 = vld [vmem:[%s4987_s30 + $0x240] sm:$0xff]  }
 0x16a   : > { %4549 = vmatmul.mubr.msk.bf16.gmra.mrb[164].mxu0 %vm452_vm3, %v4866_v1  ;;  %4683 = vmatmul.mubr.msk.bf16.gmra.mrb[164].mxu1 %vm452_vm3, %v4867_v22  ;;  %v4869_v1 = vld [vmem:[%s4987_s30 + $0x334] sm:$0xff]  }
 0x16b   : > { %4552 = vmatprep.mubr.msk.bf16.mxu0 %vm4920_vm2, %v6319_v6  ;;  %4686 = vmatprep.mubr.msk.bf16.mxu1 %vm4920_vm2, %v6319_v6 }
 0x16d   : > { %v5517_v10 = vpop.f32.mrb[60].mxu0  ;;  %v5519_v3 = vpop.f32.mrb[60].mxu1 }
 0x16e   : > { %6324 = vst [vmem:[#allocation17_spill] sm:$0xff] %v5517_v10  ;;  %6325 = vst [vmem:[#allocation18_spill] sm:$0xff] %v5519_v3  ;;  %v4302_v16 = vpop.f32.mrb[61].mxu0  ;;  %v4436_v58 = vpop.f32.mrb[61].mxu1 }
 0x16f   : > { %v5525_v22 = vpop.f32.mrb[62].mxu0  ;;  %v5527_v15 = vpop.f32.mrb[62].mxu1 }
 0x170   : > { %6326 = vst [vmem:[#allocation19_spill] sm:$0xff] %v5525_v22  ;;  %6327 = vst [vmem:[#allocation20_spill] sm:$0xff] %v5527_v15  ;;  %v4303_v27 = vpop.f32.mrb[63].mxu0  ;;  %v4437_v34 = vpop.f32.mrb[63].mxu1 }
 0x171   : > { %v4870_v34 = vld [vmem:[%s4987_s30 + $0x248] sm:$0xff]  }
 0x172   : > { %4553 = vmatmul.mubr.msk.bf16.gmra.mrb[168].mxu0 %vm452_vm3, %v4868_v40  ;;  %4687 = vmatmul.mubr.msk.bf16.gmra.mrb[168].mxu1 %vm452_vm3, %v4869_v1  ;;  %v4871_v40 = vld [vmem:[%s4987_s30 + $0x33c] sm:$0xff]  }
 0x173   : > { %4556 = vmatprep.mubr.msk.bf16.mxu0 %vm4920_vm2, %v6319_v6  ;;  %4690 = vmatprep.mubr.msk.bf16.mxu1 %vm4920_vm2, %v6319_v6 }
 0x175   : > { %v5537_v16 = vpop.f32.mrb[64].mxu0  ;;  %v5539_v58 = vpop.f32.mrb[64].mxu1 }
 0x176   : > { %6328 = vst [vmem:[#allocation21_spill] sm:$0xff] %v5537_v16  ;;  %6329 = vst [vmem:[#allocation22_spill] sm:$0xff] %v5539_v58  ;;  %v4306_v46 = vpop.f32.mrb[65].mxu0  ;;  %v4440_v27 = vpop.f32.mrb[65].mxu1 }
 0x177   : > { %v5545_v1 = vpop.f32.mrb[66].mxu0  ;;  %v5547_v15 = vpop.f32.mrb[66].mxu1 }
 0x178   : > { %6330 = vst [vmem:[#allocation23_spill] sm:$0xff] %v5545_v1  ;;  %6331 = vst [vmem:[#allocation24_spill] sm:$0xff] %v5547_v15  ;;  %v4307_v3 = vpop.f32.mrb[67].mxu0  ;;  %v4441_v10 = vpop.f32.mrb[67].mxu1 }
 0x179   : > { %v4872_v10 = vld [vmem:[%s4987_s30 + $0x250] sm:$0xff]  }
 0x17a   : > { %4557 = vmatmul.mubr.msk.bf16.gmra.mrb[172].mxu0 %vm452_vm3, %v4870_v34  ;;  %4691 = vmatmul.mubr.msk.bf16.gmra.mrb[172].mxu1 %vm452_vm3, %v4871_v40  ;;  %v4873_v34 = vld [vmem:[%s4987_s30 + $0x344] sm:$0xff]  }
 0x17b   : > { %4560 = vmatprep.mubr.msk.bf16.mxu0 %vm4920_vm2, %v6319_v6  ;;  %4694 = vmatprep.mubr.msk.bf16.mxu1 %vm4920_vm2, %v6319_v6 }
 0x17d   : > { %v5557_v46 = vpop.f32.mrb[68].mxu0  ;;  %v5559_v27 = vpop.f32.mrb[68].mxu1 }
 0x17e   : > { %6332 = vst [vmem:[#allocation25_spill] sm:$0xff] %v5557_v46  ;;  %6333 = vst [vmem:[#allocation26_spill] sm:$0xff] %v5559_v27  ;;  %v4310_v22 = vpop.f32.mrb[69].mxu0  ;;  %v4444_v3 = vpop.f32.mrb[69].mxu1 }
 0x17f   : > { %v5565_v40 = vpop.f32.mrb[70].mxu0  ;;  %v5567_v15 = vpop.f32.mrb[70].mxu1 }
 0x180   : > { %6334 = vst [vmem:[#allocation27_spill] sm:$0xff] %v5565_v40  ;;  %6335 = vst [vmem:[#allocation28_spill] sm:$0xff] %v5567_v15  ;;  %v4311_v58 = vpop.f32.mrb[71].mxu0  ;;  %v4445_v16 = vpop.f32.mrb[71].mxu1 }
 0x181   : > { %v4874_v16 = vld [vmem:[%s4987_s30 + $0x258] sm:$0xff]  }
 0x182   : > { %4561 = vmatmul.mubr.msk.bf16.gmra.mrb[176].mxu0 %vm452_vm3, %v4872_v10  ;;  %4695 = vmatmul.mubr.msk.bf16.gmra.mrb[176].mxu1 %vm452_vm3, %v4873_v34  ;;  %v4875_v10 = vld [vmem:[%s4987_s30 + $0x34c] sm:$0xff]  }
 0x183   : > { %4564 = vmatprep.mubr.msk.bf16.mxu0 %vm4920_vm2, %v6319_v6  ;;  %4698 = vmatprep.mubr.msk.bf16.mxu1 %vm4920_vm2, %v6319_v6 }
 0x185   : > { %v5577_v22 = vpop.f32.mrb[72].mxu0  ;;  %v5579_v3 = vpop.f32.mrb[72].mxu1 }
 0x186   : > { %6336 = vst [vmem:[#allocation29_spill] sm:$0xff] %v5577_v22  ;;  %6337 = vst [vmem:[#allocation30_spill] sm:$0xff] %v5579_v3  ;;  %v4314_v1 = vpop.f32.mrb[73].mxu0  ;;  %v4448_v58 = vpop.f32.mrb[73].mxu1 }
 0x187   : > { %v5585_v34 = vpop.f32.mrb[74].mxu0  ;;  %v5587_v15 = vpop.f32.mrb[74].mxu1 }
 0x188   : > { %6338 = vst [vmem:[#allocation31_spill] sm:$0xff] %v5585_v34  ;;  %6339 = vst [vmem:[#allocation32_spill] sm:$0xff] %v5587_v15  ;;  %v4315_v27 = vpop.f32.mrb[75].mxu0  ;;  %v4449_v46 = vpop.f32.mrb[75].mxu1 }
 0x189   : > { %v4876_v46 = vld [vmem:[%s4987_s30 + $0x260] sm:$0xff]  }
 0x18a   : > { %4565 = vmatmul.mubr.msk.bf16.gmra.mrb[180].mxu0 %vm452_vm3, %v4874_v16  ;;  %4699 = vmatmul.mubr.msk.bf16.gmra.mrb[180].mxu1 %vm452_vm3, %v4875_v10  ;;  %v4877_v16 = vld [vmem:[%s4987_s30 + $0x354] sm:$0xff]  }
 0x18b   : > { %4568 = vmatprep.mubr.msk.bf16.mxu0 %vm4920_vm2, %v6319_v6  ;;  %4702 = vmatprep.mubr.msk.bf16.mxu1 %vm4920_vm2, %v6319_v6 }
 0x18d   : > { %v5597_v1 = vpop.f32.mrb[76].mxu0  ;;  %v5599_v58 = vpop.f32.mrb[76].mxu1 }
 0x18e   : > { %6340 = vst [vmem:[#allocation33_spill] sm:$0xff] %v5597_v1  ;;  %6341 = vst [vmem:[#allocation34_spill] sm:$0xff] %v5599_v58  ;;  %v4318_v40 = vpop.f32.mrb[77].mxu0  ;;  %v4452_v27 = vpop.f32.mrb[77].mxu1 }
 0x18f   : > { %v5605_v10 = vpop.f32.mrb[78].mxu0  ;;  %v5607_v15 = vpop.f32.mrb[78].mxu1 }
 0x190   : > { %6342 = vst [vmem:[#allocation35_spill] sm:$0xff] %v5605_v10  ;;  %6343 = vst [vmem:[#allocation36_spill] sm:$0xff] %v5607_v15  ;;  %v4319_v3 = vpop.f32.mrb[79].mxu0  ;;  %v4453_v22 = vpop.f32.mrb[79].mxu1 }
 0x191   : > { %v4878_v22 = vld [vmem:[%s4987_s30 + $0x268] sm:$0xff]  }
 0x192   : > { %4569 = vmatmul.mubr.msk.bf16.gmra.mrb[184].mxu0 %vm452_vm3, %v4876_v46  ;;  %4703 = vmatmul.mubr.msk.bf16.gmra.mrb[184].mxu1 %vm452_vm3, %v4877_v16  ;;  %v4879_v46 = vld [vmem:[%s4987_s30 + $0x35c] sm:$0xff]  }
 0x193   : > { %4572 = vmatprep.mubr.msk.bf16.mxu0 %vm4920_vm2, %v6319_v6  ;;  %4706 = vmatprep.mubr.msk.bf16.mxu1 %vm4920_vm2, %v6319_v6 }
 0x195   : > { %v5617_v40 = vpop.f32.mrb[80].mxu0  ;;  %v5619_v27 = vpop.f32.mrb[80].mxu1 }
 0x196   : > { %6344 = vst [vmem:[#allocation37_spill] sm:$0xff] %v5617_v40  ;;  %6345 = vst [vmem:[#allocation38_spill] sm:$0xff] %v5619_v27  ;;  %v4322_v34 = vpop.f32.mrb[81].mxu0  ;;  %v4456_v3 = vpop.f32.mrb[81].mxu1 }
 0x197   : > { %v5625_v16 = vpop.f32.mrb[82].mxu0  ;;  %v5627_v15 = vpop.f32.mrb[82].mxu1 }
 0x198   : > { %6346 = vst [vmem:[#allocation39_spill] sm:$0xff] %v5625_v16  ;;  %6347 = vst [vmem:[#allocation40_spill] sm:$0xff] %v5627_v15  ;;  %v4323_v58 = vpop.f32.mrb[83].mxu0  ;;  %v4457_v1 = vpop.f32.mrb[83].mxu1 }
 0x199   : > { %v4880_v1 = vld [vmem:[%s4987_s30 + $0x270] sm:$0xff]  }
 0x19a   : > { %4573 = vmatmul.mubr.msk.bf16.gmra.mrb[188].mxu0 %vm452_vm3, %v4878_v22  ;;  %4707 = vmatmul.mubr.msk.bf16.gmra.mrb[188].mxu1 %vm452_vm3, %v4879_v46  ;;  %v4881_v22 = vld [vmem:[%s4987_s30 + $0x364] sm:$0xff]  }
 0x19b   : > { %4576 = vmatprep.mubr.msk.bf16.mxu0 %vm4920_vm2, %v6319_v6  ;;  %4710 = vmatprep.mubr.msk.bf16.mxu1 %vm4920_vm2, %v6319_v6 }
 0x19d   : > { %v5637_v34 = vpop.f32.mrb[84].mxu0  ;;  %v5639_v3 = vpop.f32.mrb[84].mxu1 }
 0x19e   : > { %6348 = vst [vmem:[#allocation41_spill] sm:$0xff] %v5637_v34  ;;  %6349 = vst [vmem:[#allocation42_spill] sm:$0xff] %v5639_v3  ;;  %v4326_v10 = vpop.f32.mrb[85].mxu0  ;;  %v4460_v58 = vpop.f32.mrb[85].mxu1 }
 0x19f   : > { %v5645_v46 = vpop.f32.mrb[86].mxu0  ;;  %v5647_v15 = vpop.f32.mrb[86].mxu1 }
 0x1a0   : > { %6350 = vst [vmem:[#allocation43_spill] sm:$0xff] %v5645_v46  ;;  %6351 = vst [vmem:[#allocation44_spill] sm:$0xff] %v5647_v15  ;;  %v4327_v27 = vpop.f32.mrb[87].mxu0  ;;  %v4461_v40 = vpop.f32.mrb[87].mxu1 }
 0x1a1   : > { %v4882_v40 = vld [vmem:[%s4987_s30 + $0x278] sm:$0xff]  }
 0x1a2   : > { %4577 = vmatmul.mubr.msk.bf16.gmra.mrb[192].mxu0 %vm452_vm3, %v4880_v1  ;;  %4711 = vmatmul.mubr.msk.bf16.gmra.mrb[192].mxu1 %vm452_vm3, %v4881_v22  ;;  %v4883_v1 = vld [vmem:[%s4987_s30 + $0x36c] sm:$0xff]  }
 0x1a3   : > { %4580 = vmatprep.mubr.msk.bf16.mxu0 %vm4920_vm2, %v6319_v6  ;;  %4714 = vmatprep.mubr.msk.bf16.mxu1 %vm4920_vm2, %v6319_v6 }
 0x1a5   : > { %v5657_v10 = vpop.f32.mrb[88].mxu0  ;;  %v5659_v58 = vpop.f32.mrb[88].mxu1 }
 0x1a6   : > { %6352 = vst [vmem:[#allocation45_spill] sm:$0xff] %v5657_v10  ;;  %6353 = vst [vmem:[#allocation46_spill] sm:$0xff] %v5659_v58  ;;  %v4330_v16 = vpop.f32.mrb[89].mxu0  ;;  %v4464_v27 = vpop.f32.mrb[89].mxu1 }
 0x1a7   : > { %v5665_v22 = vpop.f32.mrb[90].mxu0  ;;  %v5667_v15 = vpop.f32.mrb[90].mxu1 }
 0x1a8   : > { %6354 = vst [vmem:[#allocation47_spill] sm:$0xff] %v5665_v22  ;;  %6355 = vst [vmem:[#allocation48_spill] sm:$0xff] %v5667_v15  ;;  %v4331_v3 = vpop.f32.mrb[91].mxu0  ;;  %v4465_v34 = vpop.f32.mrb[91].mxu1 }
 0x1a9   : > { %v4884_v34 = vld [vmem:[%s4987_s30 + $0x280] sm:$0xff]  }
 0x1aa   : > { %4581 = vmatmul.mubr.msk.bf16.gmra.mrb[196].mxu0 %vm452_vm3, %v4882_v40  ;;  %4715 = vmatmul.mubr.msk.bf16.gmra.mrb[196].mxu1 %vm452_vm3, %v4883_v1  ;;  %v4885_v40 = vld [vmem:[%s4987_s30 + $0x374] sm:$0xff]  }
 0x1ab   : > { %4584 = vmatprep.mubr.msk.bf16.mxu0 %vm4920_vm2, %v6319_v6  ;;  %4718 = vmatprep.mubr.msk.bf16.mxu1 %vm4920_vm2, %v6319_v6 }
 0x1ad   : > { %v5677_v16 = vpop.f32.mrb[92].mxu0  ;;  %v5679_v27 = vpop.f32.mrb[92].mxu1 }
 0x1ae   : > { %6356 = vst [vmem:[#allocation49_spill] sm:$0xff] %v5677_v16  ;;  %6357 = vst [vmem:[#allocation50_spill] sm:$0xff] %v5679_v27  ;;  %v4334_v46 = vpop.f32.mrb[93].mxu0  ;;  %v4468_v3 = vpop.f32.mrb[93].mxu1 }
 0x1af   : > { %v5685_v1 = vpop.f32.mrb[94].mxu0  ;;  %v5687_v15 = vpop.f32.mrb[94].mxu1 }
 0x1b0   : > { %6358 = vst [vmem:[#allocation51_spill] sm:$0xff] %v5685_v1  ;;  %6359 = vst [vmem:[#allocation52_spill] sm:$0xff] %v5687_v15  ;;  %v4335_v58 = vpop.f32.mrb[95].mxu0  ;;  %v4469_v10 = vpop.f32.mrb[95].mxu1 }
 0x1b1   : > { %v4886_v10 = vld [vmem:[%s4987_s30 + $0x288] sm:$0xff]  }
 0x1b2   : > { %4585 = vmatmul.mubr.msk.bf16.gmra.mrb[200].mxu0 %vm452_vm3, %v4884_v34  ;;  %4719 = vmatmul.mubr.msk.bf16.gmra.mrb[200].mxu1 %vm452_vm3, %v4885_v40  ;;  %v4887_v34 = vld [vmem:[%s4987_s30 + $0x37c] sm:$0xff]  }
 0x1b3   : > { %4588 = vmatprep.mubr.msk.bf16.mxu0 %vm4920_vm2, %v6319_v6  ;;  %4722 = vmatprep.mubr.msk.bf16.mxu1 %vm4920_vm2, %v6319_v6 }
 0x1b5   : > { %v5697_v46 = vpop.f32.mrb[96].mxu0  ;;  %v5699_v3 = vpop.f32.mrb[96].mxu1 }
 0x1b6   : > { %6360 = vst [vmem:[#allocation53_spill] sm:$0xff] %v5697_v46  ;;  %6361 = vst [vmem:[#allocation54_spill] sm:$0xff] %v5699_v3  ;;  %v4338_v22 = vpop.f32.mrb[97].mxu0  ;;  %v4472_v58 = vpop.f32.mrb[97].mxu1 }
 0x1b7   : > { %v5705_v40 = vpop.f32.mrb[98].mxu0  ;;  %v5707_v15 = vpop.f32.mrb[98].mxu1 }
 0x1b8   : > { %6362 = vst [vmem:[#allocation55_spill] sm:$0xff] %v5705_v40  ;;  %6363 = vst [vmem:[#allocation56_spill] sm:$0xff] %v5707_v15  ;;  %v4339_v27 = vpop.f32.mrb[99].mxu0  ;;  %v4473_v16 = vpop.f32.mrb[99].mxu1 }
 0x1b9   : > { %v4888_v16 = vld [vmem:[%s4987_s30 + $0x290] sm:$0xff]  }
 0x1ba   : > { %4589 = vmatmul.mubr.msk.bf16.gmra.mrb[204].mxu0 %vm452_vm3, %v4886_v10  ;;  %4723 = vmatmul.mubr.msk.bf16.gmra.mrb[204].mxu1 %vm452_vm3, %v4887_v34  ;;  %v4889_v10 = vld [vmem:[%s4987_s30 + $0x384] sm:$0xff]  }
 0x1bb   : > { %4592 = vmatprep.mubr.msk.bf16.mxu0 %vm4920_vm2, %v6319_v6  ;;  %4726 = vmatprep.mubr.msk.bf16.mxu1 %vm4920_vm2, %v6319_v6 }
 0x1bd   : > { %v5717_v22 = vpop.f32.mrb[100].mxu0  ;;  %v5719_v58 = vpop.f32.mrb[100].mxu1 }
 0x1be   : > { %6364 = vst [vmem:[#allocation57_spill] sm:$0xff] %v5717_v22  ;;  %6365 = vst [vmem:[#allocation58_spill] sm:$0xff] %v5719_v58  ;;  %v4342_v1 = vpop.f32.mrb[101].mxu0  ;;  %v4476_v27 = vpop.f32.mrb[101].mxu1 }
 0x1bf   : > { %v5725_v34 = vpop.f32.mrb[102].mxu0  ;;  %v5727_v15 = vpop.f32.mrb[102].mxu1 }
 0x1c0   : > { %6366 = vst [vmem:[#allocation59_spill] sm:$0xff] %v5725_v34  ;;  %6367 = vst [vmem:[#allocation60_spill] sm:$0xff] %v5727_v15  ;;  %v4343_v3 = vpop.f32.mrb[103].mxu0  ;;  %v4477_v46 = vpop.f32.mrb[103].mxu1 }
 0x1c1   : > { %v4890_v46 = vld [vmem:[%s4987_s30 + $0x298] sm:$0xff]  }
 0x1c2   : > { %4593 = vmatmul.mubr.msk.bf16.gmra.mrb[208].mxu0 %vm452_vm3, %v4888_v16  ;;  %4727 = vmatmul.mubr.msk.bf16.gmra.mrb[208].mxu1 %vm452_vm3, %v4889_v10  ;;  %v4891_v16 = vld [vmem:[%s4987_s30 + $0x38c] sm:$0xff]  }
 0x1c3   : > { %4596 = vmatprep.mubr.msk.bf16.mxu0 %vm4920_vm2, %v6319_v6  ;;  %4730 = vmatprep.mubr.msk.bf16.mxu1 %vm4920_vm2, %v6319_v6 }
 0x1c5   : > { %v5737_v1 = vpop.f32.mrb[104].mxu0  ;;  %v5739_v27 = vpop.f32.mrb[104].mxu1 }
 0x1c6   : > { %6368 = vst [vmem:[#allocation61_spill] sm:$0xff] %v5737_v1  ;;  %6369 = vst [vmem:[#allocation62_spill] sm:$0xff] %v5739_v27  ;;  %v4346_v40 = vpop.f32.mrb[105].mxu0  ;;  %v4480_v3 = vpop.f32.mrb[105].mxu1 }
 0x1c7   : > { %v5745_v10 = vpop.f32.mrb[106].mxu0  ;;  %v5747_v15 = vpop.f32.mrb[106].mxu1 }
 0x1c8   : > { %6370 = vst [vmem:[#allocation63_spill] sm:$0xff] %v5745_v10  ;;  %6371 = vst [vmem:[#allocation64_spill] sm:$0xff] %v5747_v15  ;;  %v4347_v58 = vpop.f32.mrb[107].mxu0  ;;  %v4481_v22 = vpop.f32.mrb[107].mxu1 }
 0x1c9   : > { %v4892_v22 = vld [vmem:[%s4987_s30 + $0x2a0] sm:$0xff]  }
 0x1ca   : > { %4597 = vmatmul.mubr.msk.bf16.gmra.mrb[212].mxu0 %vm452_vm3, %v4890_v46  ;;  %4731 = vmatmul.mubr.msk.bf16.gmra.mrb[212].mxu1 %vm452_vm3, %v4891_v16  ;;  %v4893_v46 = vld [vmem:[%s4987_s30 + $0x394] sm:$0xff]  }
 0x1cb   : > { %4600 = vmatprep.mubr.msk.bf16.mxu0 %vm4920_vm2, %v6319_v6  ;;  %4734 = vmatprep.mubr.msk.bf16.mxu1 %vm4920_vm2, %v6319_v6 }
 0x1cd   : > { %v5757_v40 = vpop.f32.mrb[108].mxu0  ;;  %v5759_v3 = vpop.f32.mrb[108].mxu1 }
 0x1ce   : > { %6372 = vst [vmem:[#allocation65_spill] sm:$0xff] %v5757_v40  ;;  %6373 = vst [vmem:[#allocation66_spill] sm:$0xff] %v5759_v3  ;;  %v4350_v34 = vpop.f32.mrb[109].mxu0  ;;  %v4484_v58 = vpop.f32.mrb[109].mxu1 }
 0x1cf   : > { %v5765_v16 = vpop.f32.mrb[110].mxu0  ;;  %v5767_v15 = vpop.f32.mrb[110].mxu1 }
 0x1d0   : > { %6374 = vst [vmem:[#allocation67_spill] sm:$0xff] %v5765_v16  ;;  %6375 = vst [vmem:[#allocation68_spill] sm:$0xff] %v5767_v15  ;;  %v4351_v27 = vpop.f32.mrb[111].mxu0  ;;  %v4485_v1 = vpop.f32.mrb[111].mxu1 }
 0x1d1   : > { %v4894_v1 = vld [vmem:[%s4987_s30 + $0x2a8] sm:$0xff]  }
 0x1d2   : > { %4601 = vmatmul.mubr.msk.bf16.gmra.mrb[216].mxu0 %vm452_vm3, %v4892_v22  ;;  %4735 = vmatmul.mubr.msk.bf16.gmra.mrb[216].mxu1 %vm452_vm3, %v4893_v46  ;;  %v4895_v22 = vld [vmem:[%s4987_s30 + $0x39c] sm:$0xff]  }
 0x1d3   : > { %4604 = vmatprep.mubr.msk.bf16.mxu0 %vm4920_vm2, %v6319_v6  ;;  %4738 = vmatprep.mubr.msk.bf16.mxu1 %vm4920_vm2, %v6319_v6 }
 0x1d5   : > { %v5777_v34 = vpop.f32.mrb[112].mxu0  ;;  %v5779_v58 = vpop.f32.mrb[112].mxu1 }
 0x1d6   : > { %6376 = vst [vmem:[#allocation69_spill] sm:$0xff] %v5777_v34  ;;  %6377 = vst [vmem:[#allocation70_spill] sm:$0xff] %v5779_v58  ;;  %v4354_v10 = vpop.f32.mrb[113].mxu0  ;;  %v4488_v27 = vpop.f32.mrb[113].mxu1 }
 0x1d7   : > { %v5785_v46 = vpop.f32.mrb[114].mxu0  ;;  %v5787_v15 = vpop.f32.mrb[114].mxu1 }
 0x1d8   : > { %6378 = vst [vmem:[#allocation71_spill] sm:$0xff] %v5785_v46  ;;  %6379 = vst [vmem:[#allocation72_spill] sm:$0xff] %v5787_v15  ;;  %v4355_v3 = vpop.f32.mrb[115].mxu0  ;;  %v4489_v40 = vpop.f32.mrb[115].mxu1 }
 0x1d9   : > { %v4896_v40 = vld [vmem:[%s4987_s30 + $0x2b0] sm:$0xff]  }
 0x1da   : > { %4605 = vmatmul.mubr.msk.bf16.gmra.mrb[220].mxu0 %vm452_vm3, %v4894_v1  ;;  %4739 = vmatmul.mubr.msk.bf16.gmra.mrb[220].mxu1 %vm452_vm3, %v4895_v22  ;;  %v4897_v1 = vld [vmem:[%s4987_s30 + $0x3a4] sm:$0xff]  }
 0x1db   : > { %4608 = vmatprep.mubr.msk.bf16.mxu0 %vm4920_vm2, %v6319_v6  ;;  %4742 = vmatprep.mubr.msk.bf16.mxu1 %vm4920_vm2, %v6319_v6 }
 0x1dd   : > { %v5797_v10 = vpop.f32.mrb[116].mxu0  ;;  %v5799_v27 = vpop.f32.mrb[116].mxu1 }
 0x1de   : > { %6380 = vst [vmem:[#allocation73_spill] sm:$0xff] %v5797_v10  ;;  %6381 = vst [vmem:[#allocation74_spill] sm:$0xff] %v5799_v27  ;;  %v4358_v16 = vpop.f32.mrb[117].mxu0  ;;  %v4492_v3 = vpop.f32.mrb[117].mxu1 }
 0x1df   : > { %v5805_v22 = vpop.f32.mrb[118].mxu0  ;;  %v5807_v15 = vpop.f32.mrb[118].mxu1 }
 0x1e0   : > { %6382 = vst [vmem:[#allocation75_spill] sm:$0xff] %v5805_v22  ;;  %6383 = vst [vmem:[#allocation76_spill] sm:$0xff] %v5807_v15  ;;  %v4359_v58 = vpop.f32.mrb[119].mxu0  ;;  %v4493_v34 = vpop.f32.mrb[119].mxu1 }
 0x1e1   : > { %v4898_v34 = vld [vmem:[%s4987_s30 + $0x2b8] sm:$0xff]  }
 0x1e2   : > { %4609 = vmatmul.mubr.msk.bf16.gmra.mrb[224].mxu0 %vm452_vm3, %v4896_v40  ;;  %4743 = vmatmul.mubr.msk.bf16.gmra.mrb[224].mxu1 %vm452_vm3, %v4897_v1  ;;  %v4899_v40 = vld [vmem:[%s4987_s30 + $0x3ac] sm:$0xff]  }
 0x1e3   : > { %4612 = vmatprep.mubr.msk.bf16.mxu0 %vm4920_vm2, %v6319_v6  ;;  %4746 = vmatprep.mubr.msk.bf16.mxu1 %vm4920_vm2, %v6319_v6 }
 0x1e5   : > { %v5817_v16 = vpop.f32.mrb[120].mxu0  ;;  %v5819_v3 = vpop.f32.mrb[120].mxu1 }
 0x1e6   : > { %6384 = vst [vmem:[#allocation77_spill] sm:$0xff] %v5817_v16  ;;  %6385 = vst [vmem:[#allocation78_spill] sm:$0xff] %v5819_v3  ;;  %v4362_v46 = vpop.f32.mrb[121].mxu0  ;;  %v4496_v58 = vpop.f32.mrb[121].mxu1 }
 0x1e7   : > { %v830_v1 = vpop.f32.mrb[122].mxu0  ;;  %v1418_v15 = vpop.f32.mrb[122].mxu1 }
 0x1e8   : > { %v4363_v22 = vpop.f32.mrb[123].mxu0  ;;  %v4497_v27 = vpop.f32.mrb[123].mxu1 }
 0x1e9   : > { %v4900_v22 = vld [vmem:[%s4987_s30 + $0x2c0] sm:$0xff]   ;;  %v4901_v27 = vld [vmem:[%s4987_s30 + $0x3b4] sm:$0xff]  }
 0x1ea   : > { %4613 = vmatmul.mubr.msk.bf16.gmra.mrb[228].mxu0 %vm452_vm3, %v4898_v34  ;;  %4747 = vmatmul.mubr.msk.bf16.gmra.mrb[228].mxu1 %vm452_vm3, %v4899_v40  ;;  %v5839_v34 = vld [vmem:[%s6226_s2] ss:$0 sm:$0xff] }
 0x1eb   : > { %4616 = vmatprep.mubr.msk.bf16.mxu0 %vm4920_vm2, %v6319_v6  ;;  %4750 = vmatprep.mubr.msk.bf16.mxu1 %vm4920_vm2, %v6319_v6 }
 0x1ed   : > { %v1824_v46 = vpop.f32.mrb[124].mxu0  ;;  %v2473_v58 = vpop.f32.mrb[124].mxu1 }
 0x1ee   : > { %v2070_v3 = vmax.f32 %v6386_v51, %v1824_v46  ;;  %v4510_v1 = vpop.f32.mrb[125].mxu0  ;;  %v4644_v15 = vpop.f32.mrb[125].mxu1 }
 0x1ef   : > { %v1827_v40 = vpop.f32.mrb[126].mxu0  ;;  %v2476_v16 = vpop.f32.mrb[126].mxu1  ;;  %v4902_v1 = vld [vmem:[%s4987_s30 + $0x2c8] sm:$0xff]   ;;  %v4903_v15 = vld [vmem:[%s4987_s30 + $0x3bc] sm:$0xff]  }
 0x1f0   : > { %v2719_v10 = vmax.f32 %v2070_v3, %v2473_v58  ;;  %v2071_v24 = vmax.f32 %v6387_v4, %v1827_v40  ;;  %v4511_v39 = vpop.f32.mrb[127].mxu0  ;;  %v4645_v0 = vpop.f32.mrb[127].mxu1 }
 0x1f2   : > { %v2787_v51 = vmul.f32 %v5839_v34, %v2719_v10  ;;  %v2720_v46 = vmax.f32 %v2071_v24, %v2476_v16  ;;  %4617 = vmatmul.mubr.msk.bf16.gmra.mrb[232].mxu0 %vm452_vm3, %v4900_v22  ;;  %4751 = vmatmul.mubr.msk.bf16.gmra.mrb[232].mxu1 %vm452_vm3, %v4901_v27  ;;  %v6388_v24 = vmax.f32 %v5237_v13, %v5239_v14 }
 0x1f3   : > { %4620 = vmatprep.mubr.msk.bf16.mxu0 %vm4920_vm2, %v6319_v6  ;;  %4754 = vmatprep.mubr.msk.bf16.mxu1 %vm4920_vm2, %v6319_v6 }
 0x1f4   : > { %v2855_v8 = vadd.f32 %v5847_v2, %v2787_v51  ;;  %v2788_v9 = vmul.f32 %v5839_v34, %v2720_v46  ;;  %v6389_v46 = vmax.f32 %v5245_v20, %v5247_v21 }
 0x1f5   : > { %v1832_v39 = vpop.f32.mrb[128].mxu0  ;;  %v2481_v4 = vpop.f32.mrb[128].mxu1 }
 0x1f6   : > { %v2856_v10 = vadd.f32 %v5847_v2, %v2788_v9  ;;  %v2072_v16 = vmax.f32 %v6388_v24, %v1832_v39  ;;  %v4514_v3 = vpop.f32.mrb[129].mxu0  ;;  %v4648_v58 = vpop.f32.mrb[129].mxu1  ;;  %v2916_v40 = vmax.f32 %v2855_v8, 0.0  ;;  %v4904_v24 = vld [vmem:[%s4987_s30 + $0x2d0] sm:$0xff]  }
 0x1f7   : > { %v1835_v22 = vpop.f32.mrb[130].mxu0  ;;  %v2484_v27 = vpop.f32.mrb[130].mxu1 }
 0x1f8   : > { %v2917_v0 = vmax.f32 %v2856_v10, 0.0  ;;  %v2721_v51 = vmax.f32 %v2072_v16, %v2481_v4  ;;  %v2073_v63 = vmax.f32 %v6389_v46, %v1835_v22  ;;  %v4515_v53 = vpop.f32.mrb[131].mxu0  ;;  %v4649_v18 = vpop.f32.mrb[131].mxu1  ;;  %v4905_v16 = vld [vmem:[%s4987_s30 + $0x3c4] sm:$0xff]  }
 0x1fa   : > { %v3910_v13 = vpack.c.bf16 %v2917_v0, %v2916_v40  ;;  %v2789_v14 = vmul.f32 %v5839_v34, %v2721_v51  ;;  %v2722_v8 = vmax.f32 %v2073_v63, %v2484_v27  ;;  %4621 = vmatmul.mubr.msk.bf16.gmra.mrb[236].mxu0 %vm452_vm3, %v4902_v1  ;;  %4755 = vmatmul.mubr.msk.bf16.gmra.mrb[236].mxu1 %vm452_vm3, %v4903_v15 }
 0x1fb   : > { %4624 = vmatprep.mubr.msk.bf16.mxu0 %vm4920_vm2, %v6319_v6  ;;  %4758 = vmatprep.mubr.msk.bf16.mxu1 %vm4920_vm2, %v6319_v6  ;;  %v6390_v63 = vmax.f32 %v5257_v25, %v5259_v26  ;;  %v6391_v27 = vmax.f32 %v5265_v32, %v5267_v33 }
 0x1fc   : > { %3911 = vst [vmem:[%s5871_s12] sm:$0xff] %v3910_v13   ;;  %v2857_v20 = vadd.f32 %v5847_v2, %v2789_v14  ;;  %v2790_v21 = vmul.f32 %v5839_v34, %v2722_v8  ;;  %v4906_v8 = vld [vmem:[%s4987_s30 + $0x2d8] ss:$0 sps:$4 sm:$0x33]  }
 0x1fd   : > { %v1840_v18 = vpop.f32.mrb[132].mxu0  ;;  %v2489_v53 = vpop.f32.mrb[132].mxu1 }
 0x1fe   : > { %v2858_v9 = vadd.f32 %v5847_v2, %v2790_v21  ;;  %v2074_v39 = vmax.f32 %v6390_v63, %v1840_v18  ;;  %v4518_v4 = vpop.f32.mrb[133].mxu0  ;;  %v4652_v10 = vpop.f32.mrb[133].mxu1  ;;  %v2918_v1 = vmax.f32 %v2857_v20, 0.0  ;;  %v6392_v21 = vmax.f32 %v5277_v37, %v5279_v38  ;;  %v4907_v63 = vld [vmem:[%s4987_s30 + $0x3cc] ss:$0 sps:$4 sm:$0x33]  }
 0x1ff   : > { %v1843_v3 = vpop.f32.mrb[134].mxu0  ;;  %v2492_v58 = vpop.f32.mrb[134].mxu1 }
 0x200   : > { %v2919_v15 = vmax.f32 %v2858_v9, 0.0  ;;  %v2723_v22 = vmax.f32 %v2074_v39, %v2489_v53  ;;  %v2075_v40 = vmax.f32 %v6391_v27, %v1843_v3  ;;  %v4519_v0 = vpop.f32.mrb[135].mxu0  ;;  %v4653_v51 = vpop.f32.mrb[135].mxu1 }
 0x202   : > { %v3915_v46 = vpack.c.bf16 %v2919_v15, %v2918_v1  ;;  %v2791_v25 = vmul.f32 %v5839_v34, %v2723_v22  ;;  %v2724_v26 = vmax.f32 %v2075_v40, %v2492_v58  ;;  %4625 = vmatmul.mubr.msk.bf16.gmra.mrb[240].mxu0 %vm452_vm3, %v4904_v24  ;;  %4759 = vmatmul.mubr.msk.bf16.gmra.mrb[240].mxu1 %vm452_vm3, %v4905_v16 }
 0x203   : > { %4628 = vmatprep.mubr.msk.bf16.mxu0 %vm4920_vm2, %v6319_v6  ;;  %4762 = vmatprep.mubr.msk.bf16.mxu1 %vm4920_vm2, %v6319_v6  ;;  %v6393_v16 = vmax.f32 %v5285_v44, %v5287_v45  ;;  %v6394_v45 = vmax.f32 %v5297_v49, %v5299_v50 }
 0x204   : > { %4057 = vst [vmem:[%s5871_s12 + $0x8] sm:$0xff] %v3915_v46   ;;  %v2859_v32 = vadd.f32 %v5847_v2, %v2791_v25  ;;  %v2792_v33 = vmul.f32 %v5839_v34, %v2724_v26 }
 0x205   : > { %v1848_v13 = vpop.f32.mrb[136].mxu0  ;;  %v2497_v14 = vpop.f32.mrb[136].mxu1 }
 0x206   : > { %v2860_v20 = vadd.f32 %v5847_v2, %v2792_v33  ;;  %v2076_v18 = vmax.f32 %v6392_v21, %v1848_v13  ;;  %v4522_v53 = vpop.f32.mrb[137].mxu0  ;;  %v4656_v9 = vpop.f32.mrb[137].mxu1  ;;  %v2920_v4 = vmax.f32 %v2859_v32, 0.0 }
 0x207   : > { %v1851_v39 = vpop.f32.mrb[138].mxu0  ;;  %v2500_v6 = vpop.f32.mrb[138].mxu1 }
 0x208   : > { %v2921_v10 = vmax.f32 %v2860_v20, 0.0  ;;  %v2725_v24 = vmax.f32 %v2076_v18, %v2497_v14  ;;  %v2077_v3 = vmax.f32 %v6393_v16, %v1851_v39  ;;  %v4523_v58 = vpop.f32.mrb[139].mxu0  ;;  %v4657_v1 = vpop.f32.mrb[139].mxu1 }
 0x20a   : > { %v3920_v15 = vpack.c.bf16 %v2921_v10, %v2920_v4  ;;  %v2793_v22 = vmul.f32 %v5839_v34, %v2725_v24  ;;  %v2726_v37 = vmax.f32 %v2077_v3, %v2500_v6  ;;  %4629 = vmatmul.mubr.msk.bf16.gmra.mrb[244].mxu0 %vm452_vm3, %v4906_v8  ;;  %4763 = vmatmul.mubr.msk.bf16.gmra.mrb[244].mxu1 %vm452_vm3, %v4907_v63 }
 0x20b   : > { %v6395_v8 = vmax.f32 %v5305_v56, %v5307_v57  ;;  %v6396_v56 = vmax.f32 %v5317_v61, %v5319_v62 }
 0x20c   : > { %4058 = vst [vmem:[%s5871_s12 + $0x10] sm:$0xff] %v3920_v15   ;;  %v2861_v38 = vadd.f32 %v5847_v2, %v2793_v22  ;;  %v2794_v27 = vmul.f32 %v5839_v34, %v2726_v37  ;;  %v6397_v22 = vmax.f32 %v5325_v11, %v5327_v12  ;;  %v6398_v11 = vmax.f32 %v5337_v19, %v5339_v23 }
 0x20d   : > { %v1856_v40 = vpop.f32.mrb[140].mxu0  ;;  %v2505_v0 = vpop.f32.mrb[140].mxu1 }
 0x20e   : > { %v2862_v44 = vadd.f32 %v5847_v2, %v2794_v27  ;;  %v2078_v51 = vmax.f32 %v6394_v45, %v1856_v40  ;;  %v4526_v46 = vpop.f32.mrb[141].mxu0  ;;  %v4660_v25 = vpop.f32.mrb[141].mxu1  ;;  %v2922_v33 = vmax.f32 %v2861_v38, 0.0 }
 0x20f   : > { %v1859_v26 = vpop.f32.mrb[142].mxu0  ;;  %v2508_v32 = vpop.f32.mrb[142].mxu1 }
 0x210   : > { %v2923_v13 = vmax.f32 %v2862_v44, 0.0  ;;  %v2727_v14 = vmax.f32 %v2078_v51, %v2505_v0  ;;  %v2079_v20 = vmax.f32 %v6395_v8, %v1859_v26  ;;  %v4527_v21 = vpop.f32.mrb[143].mxu0  ;;  %v4661_v18 = vpop.f32.mrb[143].mxu1 }
 0x212   : > { %v3925_v53 = vpack.c.bf16 %v2923_v13, %v2922_v33  ;;  %v2795_v9 = vmul.f32 %v5839_v34, %v2727_v14  ;;  %v2728_v63 = vmax.f32 %v2079_v20, %v2508_v32  ;;  %v6399_v20 = vmax.f32 %v5345_v35, %v5347_v36 }
 0x213   : > { %v6400_v35 = vmax.f32 %v5357_v43, %v5359_v47 }
 0x214   : > { %4059 = vst [vmem:[%s5871_s12 + $0x18] sm:$0xff] %v3925_v53   ;;  %v2863_v49 = vadd.f32 %v5847_v2, %v2795_v9  ;;  %v2796_v50 = vmul.f32 %v5839_v34, %v2728_v63 }
 0x215   : > { %v1864_v39 = vpop.f32.mrb[144].mxu0  ;;  %v2513_v6 = vpop.f32.mrb[144].mxu1 }
 0x216   : > { %v2864_v4 = vadd.f32 %v5847_v2, %v2796_v50  ;;  %v2080_v57 = vmax.f32 %v6396_v56, %v1864_v39  ;;  %v4530_v10 = vpop.f32.mrb[145].mxu0  ;;  %v4664_v24 = vpop.f32.mrb[145].mxu1  ;;  %v2924_v58 = vmax.f32 %v2863_v49, 0.0 }
 0x217   : > { %v1867_v16 = vpop.f32.mrb[146].mxu0  ;;  %v2516_v3 = vpop.f32.mrb[146].mxu1 }
 0x218   : > { %v2925_v1 = vmax.f32 %v2864_v4, 0.0  ;;  %v2729_v15 = vmax.f32 %v2080_v57, %v2513_v6  ;;  %v2081_v37 = vmax.f32 %v6397_v22, %v1867_v16  ;;  %v4531_v38 = vpop.f32.mrb[147].mxu0  ;;  %v4665_v27 = vpop.f32.mrb[147].mxu1 }
 0x21a   : > { %v3930_v40 = vpack.c.bf16 %v2925_v1, %v2924_v58  ;;  %v2797_v0 = vmul.f32 %v5839_v34, %v2729_v15  ;;  %v2730_v44 = vmax.f32 %v2081_v37, %v2516_v3  ;;  %v6401_v58 = vmax.f32 %v5365_v59, %v5367_v60 }
 0x21b   : > { %v6402_v59 = vmax.f32 %v5377_v7, %v5379_v17 }
 0x21c   : > { %4060 = vst [vmem:[%s5871_s12 + $0x20] sm:$0xff] %v3930_v40   ;;  %v2865_v61 = vadd.f32 %v5847_v2, %v2797_v0  ;;  %v2798_v62 = vmul.f32 %v5839_v34, %v2730_v44 }
 0x21d   : > { %v1872_v45 = vpop.f32.mrb[148].mxu0  ;;  %v2521_v51 = vpop.f32.mrb[148].mxu1 }
 0x21e   : > { %v2866_v46 = vadd.f32 %v5847_v2, %v2798_v62  ;;  %v2082_v12 = vmax.f32 %v6398_v11, %v1872_v45  ;;  %v4534_v25 = vpop.f32.mrb[149].mxu0  ;;  %v4668_v26 = vpop.f32.mrb[149].mxu1  ;;  %v2926_v13 = vmax.f32 %v2865_v61, 0.0 }
 0x21f   : > { %v1875_v32 = vpop.f32.mrb[150].mxu0  ;;  %v2524_v33 = vpop.f32.mrb[150].mxu1  ;;  %v6403_v25 = vmax.f32 %v5385_v41, %v5387_v42  ;;  %v6404_v41 = vmax.f32 %v5397_v55, %v5399_v5 }
 0x220   : > { %v2927_v14 = vmax.f32 %v2866_v46, 0.0  ;;  %v2731_v8 = vmax.f32 %v2082_v12, %v2521_v51  ;;  %v2083_v21 = vmax.f32 %v6399_v20, %v1875_v32  ;;  %v4535_v18 = vpop.f32.mrb[151].mxu0  ;;  %v4669_v53 = vpop.f32.mrb[151].mxu1 }
 0x222   : > { %v3935_v9 = vpack.c.bf16 %v2927_v14, %v2926_v13  ;;  %v2799_v63 = vmul.f32 %v5839_v34, %v2731_v8  ;;  %v2732_v49 = vmax.f32 %v2083_v21, %v2524_v33 }
 0x224   : > { %4061 = vst [vmem:[%s5871_s12 + $0x28] sm:$0xff] %v3935_v9   ;;  %v2867_v19 = vadd.f32 %v5847_v2, %v2799_v63  ;;  %v2800_v23 = vmul.f32 %v5839_v34, %v2732_v49 }
 0x225   : > { %v1880_v50 = vpop.f32.mrb[152].mxu0  ;;  %v2529_v39 = vpop.f32.mrb[152].mxu1 }
 0x226   : > { %v2868_v6 = vadd.f32 %v5847_v2, %v2800_v23  ;;  %v2084_v36 = vmax.f32 %v6400_v35, %v1880_v50  ;;  %v4538_v4 = vpop.f32.mrb[153].mxu0  ;;  %v4672_v56 = vpop.f32.mrb[153].mxu1  ;;  %v2928_v24 = vmax.f32 %v2867_v19, 0.0 }
 0x227   : > { %v1883_v57 = vpop.f32.mrb[154].mxu0  ;;  %v2532_v10 = vpop.f32.mrb[154].mxu1 }
 0x228   : > { %v2929_v16 = vmax.f32 %v2868_v6, 0.0  ;;  %v2733_v3 = vmax.f32 %v2084_v36, %v2529_v39  ;;  %v2085_v1 = vmax.f32 %v6401_v58, %v1883_v57  ;;  %v4539_v15 = vpop.f32.mrb[155].mxu0  ;;  %v4673_v22 = vpop.f32.mrb[155].mxu1  ;;  %v6405_v39 = vmax.f32 %v5405_v31, %v5407_v54 }
 0x229   : > { %v6406_v31 = vmax.f32 %v5417_v28, %v5419_v29 }
 0x22a   : > { %v3940_v37 = vpack.c.bf16 %v2929_v16, %v2928_v24  ;;  %v2801_v38 = vmul.f32 %v5839_v34, %v2733_v3  ;;  %v2734_v27 = vmax.f32 %v2085_v1, %v2532_v10 }
 0x22c   : > { %4062 = vst [vmem:[%s5871_s12 + $0x30] sm:$0xff] %v3940_v37   ;;  %v2869_v43 = vadd.f32 %v5847_v2, %v2801_v38  ;;  %v2802_v47 = vmul.f32 %v5839_v34, %v2734_v27  ;;  %v6407_v27 = vmax.f32 %v5425_v30, %v5427_v48 }
 0x22d   : > { %v1888_v40 = vpop.f32.mrb[156].mxu0  ;;  %v2537_v0 = vpop.f32.mrb[156].mxu1 }
 0x22e   : > { %v2870_v44 = vadd.f32 %v5847_v2, %v2802_v47  ;;  %v2086_v60 = vmax.f32 %v6402_v59, %v1888_v40  ;;  %v4542_v61 = vpop.f32.mrb[157].mxu0  ;;  %v4676_v62 = vpop.f32.mrb[157].mxu1  ;;  %v2930_v46 = vmax.f32 %v2869_v43, 0.0 }
 0x22f   : > { %v1891_v45 = vpop.f32.mrb[158].mxu0  ;;  %v2540_v51 = vpop.f32.mrb[158].mxu1 }
 0x230   : > { %v2931_v11 = vmax.f32 %v2870_v44, 0.0  ;;  %v2735_v12 = vmax.f32 %v2086_v60, %v2537_v0  ;;  %v2087_v26 = vmax.f32 %v6403_v25, %v1891_v45  ;;  %v4543_v32 = vpop.f32.mrb[159].mxu0  ;;  %v4677_v33 = vpop.f32.mrb[159].mxu1  ;;  %v6408_v45 = vld [vmem:[#allocation2_spill] sm:$0xff] }
 0x231   : > { %v6409_v48 = vmax.f32 %v5437_v52, %v6408_v45  ;;  %v6410_v33 = vld [vmem:[#allocation3_spill] sm:$0xff] }
 0x232   : > { %v3945_v13 = vpack.c.bf16 %v2931_v11, %v2930_v46  ;;  %v2803_v14 = vmul.f32 %v5839_v34, %v2735_v12  ;;  %v2736_v8 = vmax.f32 %v2087_v26, %v2540_v51 }
 0x234   : > { %4063 = vst [vmem:[%s5871_s12 + $0x38] sm:$0xff] %v3945_v13   ;;  %v2871_v7 = vadd.f32 %v5847_v2, %v2803_v14  ;;  %v2804_v17 = vmul.f32 %v5839_v34, %v2736_v8  ;;  %v6411_v13 = vld [vmem:[#allocation4_spill] sm:$0xff] }
 0x235   : > { %v1896_v20 = vpop.f32.mrb[160].mxu0  ;;  %v2545_v21 = vpop.f32.mrb[160].mxu1  ;;  %v6412_v14 = vmax.f32 %v6410_v33, %v6411_v13 }
 0x236   : > { %v2872_v18 = vadd.f32 %v5847_v2, %v2804_v17  ;;  %v2088_v42 = vmax.f32 %v6404_v41, %v1896_v20  ;;  %v4546_v53 = vpop.f32.mrb[161].mxu0  ;;  %v4680_v9 = vpop.f32.mrb[161].mxu1  ;;  %v2932_v19 = vmax.f32 %v2871_v7, 0.0 }
 0x237   : > { %v1899_v63 = vpop.f32.mrb[162].mxu0  ;;  %v2548_v49 = vpop.f32.mrb[162].mxu1 }
 0x238   : > { %v2933_v23 = vmax.f32 %v2872_v18, 0.0  ;;  %v2737_v50 = vmax.f32 %v2088_v42, %v2545_v21  ;;  %v2089_v6 = vmax.f32 %v6405_v39, %v1899_v63  ;;  %v4547_v35 = vpop.f32.mrb[163].mxu0  ;;  %v4681_v36 = vpop.f32.mrb[163].mxu1  ;;  %v6413_v63 = vld [vmem:[#allocation5_spill] sm:$0xff] }
 0x23a   : > { %v3950_v4 = vpack.c.bf16 %v2933_v23, %v2932_v19  ;;  %v2805_v56 = vmul.f32 %v5839_v34, %v2737_v50  ;;  %v2738_v57 = vmax.f32 %v2089_v6, %v2548_v49  ;;  %v6414_v49 = vld [vmem:[#allocation6_spill] sm:$0xff] }
 0x23b   : > { %v6415_v19 = vmax.f32 %v6413_v63, %v6414_v49  ;;  %v6429_v63 = vld [vmem:[#allocation16_spill] sm:$0xff] }
 0x23c   : > { %4064 = vst [vmem:[%s5871_s12 + $0x40] sm:$0xff] %v3950_v4   ;;  %v2873_v55 = vadd.f32 %v5847_v2, %v2805_v56  ;;  %v2806_v5 = vmul.f32 %v5839_v34, %v2738_v57  ;;  %v6416_v57 = vld [vmem:[#allocation7_spill] sm:$0xff] }
 0x23d   : > { %v1904_v10 = vpop.f32.mrb[164].mxu0  ;;  %v2553_v24 = vpop.f32.mrb[164].mxu1 }
 0x23e   : > { %v2874_v16 = vadd.f32 %v5847_v2, %v2806_v5  ;;  %v2090_v54 = vmax.f32 %v6406_v31, %v1904_v10  ;;  %v4550_v3 = vpop.f32.mrb[165].mxu0  ;;  %v4684_v58 = vpop.f32.mrb[165].mxu1  ;;  %v2934_v22 = vmax.f32 %v2873_v55, 0.0  ;;  %v6417_v55 = vld [vmem:[#allocation8_spill] sm:$0xff] }
 0x23f   : > { %v1907_v1 = vpop.f32.mrb[166].mxu0  ;;  %v2556_v15 = vpop.f32.mrb[166].mxu1  ;;  %v6418_v5 = vmax.f32 %v6416_v57, %v6417_v55 }
 0x240   : > { %v2935_v37 = vmax.f32 %v2874_v16, 0.0  ;;  %v2739_v38 = vmax.f32 %v2090_v54, %v2553_v24  ;;  %v2091_v43 = vmax.f32 %v6407_v27, %v1907_v1  ;;  %v4551_v47 = vpop.f32.mrb[167].mxu0  ;;  %v4685_v40 = vpop.f32.mrb[167].mxu1  ;;  %v6420_v27 = vld [vmem:[#allocation10_spill] sm:$0xff] }
 0x242   : > { %v3955_v0 = vpack.c.bf16 %v2935_v37, %v2934_v22  ;;  %v2807_v44 = vmul.f32 %v5839_v34, %v2739_v38  ;;  %v2740_v59 = vmax.f32 %v2091_v43, %v2556_v15  ;;  %v6419_v38 = vld [vmem:[#allocation9_spill] sm:$0xff] }
 0x243   : > { %v6421_v43 = vmax.f32 %v6419_v38, %v6420_v27  ;;  %v6435_v38 = vld [vmem:[#allocation20_spill] sm:$0xff] }
 0x244   : > { %4065 = vst [vmem:[%s5871_s12 + $0x48] sm:$0xff] %v3955_v0   ;;  %v2875_v28 = vadd.f32 %v5847_v2, %v2807_v44  ;;  %v2808_v29 = vmul.f32 %v5839_v34, %v2740_v59 }
 0x245   : > { %v1912_v60 = vpop.f32.mrb[168].mxu0  ;;  %v2561_v61 = vpop.f32.mrb[168].mxu1 }
 0x246   : > { %v2876_v62 = vadd.f32 %v5847_v2, %v2808_v29  ;;  %v2092_v30 = vmax.f32 %v6409_v48, %v1912_v60  ;;  %v4554_v51 = vpop.f32.mrb[169].mxu0  ;;  %v4688_v46 = vpop.f32.mrb[169].mxu1  ;;  %v2936_v25 = vmax.f32 %v2875_v28, 0.0 }
 0x247   : > { %v1915_v11 = vpop.f32.mrb[170].mxu0  ;;  %v2564_v12 = vpop.f32.mrb[170].mxu1 }
 0x248   : > { %v2937_v26 = vmax.f32 %v2876_v62, 0.0  ;;  %v2741_v32 = vmax.f32 %v2092_v30, %v2561_v61  ;;  %v2093_v8 = vmax.f32 %v6412_v14, %v1915_v11  ;;  %v4555_v7 = vpop.f32.mrb[171].mxu0  ;;  %v4689_v17 = vpop.f32.mrb[171].mxu1  ;;  %v6422_v61 = vld [vmem:[#allocation11_spill] sm:$0xff]  ;;  %v6423_v62 = vld [vmem:[#allocation12_spill] sm:$0xff]  ;;  %v6425_v14 = vld [vmem:[#allocation13_spill] sm:$0xff] }
 0x249   : > { %v6424_v45 = vmax.f32 %v6422_v61, %v6423_v62 }
 0x24a   : > { %v3960_v20 = vpack.c.bf16 %v2937_v26, %v2936_v25  ;;  %v2809_v21 = vmul.f32 %v5839_v34, %v2741_v32  ;;  %v2742_v18 = vmax.f32 %v2093_v8, %v2564_v12  ;;  %v6426_v8 = vld [vmem:[#allocation14_spill] sm:$0xff] }
 0x24b   : > { %v6427_v7 = vmax.f32 %v6425_v14, %v6426_v8  ;;  %v6441_v14 = vld [vmem:[#allocation24_spill] sm:$0xff] }
 0x24c   : > { %4066 = vst [vmem:[%s5871_s12 + $0x50] sm:$0xff] %v3960_v20   ;;  %v2877_v52 = vadd.f32 %v5847_v2, %v2809_v21  ;;  %v2810_v41 = vmul.f32 %v5839_v34, %v2742_v18 }
 0x24d   : > { %v1920_v42 = vpop.f32.mrb[172].mxu0  ;;  %v2569_v53 = vpop.f32.mrb[172].mxu1 }
 0x24e   : > { %v2878_v9 = vadd.f32 %v5847_v2, %v2810_v41  ;;  %v2094_v23 = vmax.f32 %v6415_v19, %v1920_v42  ;;  %v4558_v50 = vpop.f32.mrb[173].mxu0  ;;  %v4692_v39 = vpop.f32.mrb[173].mxu1  ;;  %v2938_v36 = vmax.f32 %v2877_v52, 0.0 }
 0x24f   : > { %v1923_v6 = vpop.f32.mrb[174].mxu0  ;;  %v2572_v35 = vpop.f32.mrb[174].mxu1 }
 0x250   : > { %v2939_v4 = vmax.f32 %v2878_v9, 0.0  ;;  %v2743_v56 = vmax.f32 %v2094_v23, %v2569_v53  ;;  %v2095_v10 = vmax.f32 %v6418_v5, %v1923_v6  ;;  %v4559_v24 = vpop.f32.mrb[175].mxu0  ;;  %v4693_v16 = vpop.f32.mrb[175].mxu1  ;;  %v6428_v9 = vld [vmem:[#allocation15_spill] sm:$0xff]  ;;  %v6431_v5 = vld [vmem:[#allocation17_spill] sm:$0xff] }
 0x251   : > { %v6430_v49 = vmax.f32 %v6428_v9, %v6429_v63 }
 0x252   : > { %v3965_v31 = vpack.c.bf16 %v2939_v4, %v2938_v36  ;;  %v2811_v54 = vmul.f32 %v5839_v34, %v2743_v56  ;;  %v2744_v3 = vmax.f32 %v2095_v10, %v2572_v35  ;;  %v6432_v10 = vld [vmem:[#allocation18_spill] sm:$0xff] }
 0x253   : > { %v6433_v24 = vmax.f32 %v6431_v5, %v6432_v10  ;;  %v6447_v5 = vld [vmem:[#allocation28_spill] sm:$0xff] }
 0x254   : > { %4067 = vst [vmem:[%s5871_s12 + $0x58] sm:$0xff] %v3965_v31   ;;  %v2879_v58 = vadd.f32 %v5847_v2, %v2811_v54  ;;  %v2812_v1 = vmul.f32 %v5839_v34, %v2744_v3 }
 0x255   : > { %v1928_v15 = vpop.f32.mrb[176].mxu0  ;;  %v2577_v22 = vpop.f32.mrb[176].mxu1 }
 0x256   : > { %v2880_v37 = vadd.f32 %v5847_v2, %v2812_v1  ;;  %v2096_v47 = vmax.f32 %v6421_v43, %v1928_v15  ;;  %v4562_v40 = vpop.f32.mrb[177].mxu0  ;;  %v4696_v0 = vpop.f32.mrb[177].mxu1  ;;  %v2940_v28 = vmax.f32 %v2879_v58, 0.0 }
 0x257   : > { %v1931_v44 = vpop.f32.mrb[178].mxu0  ;;  %v2580_v59 = vpop.f32.mrb[178].mxu1 }
 0x258   : > { %v2941_v29 = vmax.f32 %v2880_v37, 0.0  ;;  %v2745_v60 = vmax.f32 %v2096_v47, %v2577_v22  ;;  %v2097_v48 = vmax.f32 %v6424_v45, %v1931_v44  ;;  %v4563_v30 = vpop.f32.mrb[179].mxu0  ;;  %v4697_v51 = vpop.f32.mrb[179].mxu1  ;;  %v6434_v37 = vld [vmem:[#allocation19_spill] sm:$0xff]  ;;  %v6437_v45 = vld [vmem:[#allocation21_spill] sm:$0xff] }
 0x259   : > { %v6436_v27 = vmax.f32 %v6434_v37, %v6435_v38 }
 0x25a   : > { %v3970_v46 = vpack.c.bf16 %v2941_v29, %v2940_v28  ;;  %v2813_v11 = vmul.f32 %v5839_v34, %v2745_v60  ;;  %v2746_v12 = vmax.f32 %v2097_v48, %v2580_v59  ;;  %v6438_v48 = vld [vmem:[#allocation22_spill] sm:$0xff] }
 0x25b   : > { %v6439_v30 = vmax.f32 %v6437_v45, %v6438_v48  ;;  %v6453_v45 = vld [vmem:[#allocation32_spill] sm:$0xff] }
 0x25c   : > { %4068 = vst [vmem:[%s5871_s12 + $0x60] sm:$0xff] %v3970_v46   ;;  %v2881_v25 = vadd.f32 %v5847_v2, %v2813_v11  ;;  %v2814_v26 = vmul.f32 %v5839_v34, %v2746_v12 }
 0x25d   : > { %v1936_v32 = vpop.f32.mrb[180].mxu0  ;;  %v2585_v33 = vpop.f32.mrb[180].mxu1 }
 0x25e   : > { %v2882_v13 = vadd.f32 %v5847_v2, %v2814_v26  ;;  %v2098_v17 = vmax.f32 %v6427_v7, %v1936_v32  ;;  %v4566_v20 = vpop.f32.mrb[181].mxu0  ;;  %v4700_v21 = vpop.f32.mrb[181].mxu1  ;;  %v2942_v41 = vmax.f32 %v2881_v25, 0.0 }
 0x25f   : > { %v1939_v18 = vpop.f32.mrb[182].mxu0  ;;  %v2588_v52 = vpop.f32.mrb[182].mxu1 }
 0x260   : > { %v2943_v42 = vmax.f32 %v2882_v13, 0.0  ;;  %v2747_v53 = vmax.f32 %v2098_v17, %v2585_v33  ;;  %v2099_v19 = vmax.f32 %v6430_v49, %v1939_v18  ;;  %v4567_v23 = vpop.f32.mrb[183].mxu0  ;;  %v4701_v50 = vpop.f32.mrb[183].mxu1  ;;  %v6440_v13 = vld [vmem:[#allocation23_spill] sm:$0xff]  ;;  %v6443_v49 = vld [vmem:[#allocation25_spill] sm:$0xff] }
 0x261   : > { %v6442_v8 = vmax.f32 %v6440_v13, %v6441_v14 }
 0x262   : > { %v3975_v39 = vpack.c.bf16 %v2943_v42, %v2942_v41  ;;  %v2815_v6 = vmul.f32 %v5839_v34, %v2747_v53  ;;  %v2748_v35 = vmax.f32 %v2099_v19, %v2588_v52  ;;  %v6444_v19 = vld [vmem:[#allocation26_spill] sm:$0xff] }
 0x263   : > { %v6445_v23 = vmax.f32 %v6443_v49, %v6444_v19  ;;  %v6459_v49 = vld [vmem:[#allocation36_spill] sm:$0xff] }
 0x264   : > { %4069 = vst [vmem:[%s5871_s12 + $0x68] sm:$0xff] %v3975_v39   ;;  %v2883_v36 = vadd.f32 %v5847_v2, %v2815_v6  ;;  %v2816_v4 = vmul.f32 %v5839_v34, %v2748_v35 }
 0x265   : > { %v1944_v56 = vpop.f32.mrb[184].mxu0  ;;  %v2593_v57 = vpop.f32.mrb[184].mxu1 }
 0x266   : > { %v2884_v55 = vadd.f32 %v5847_v2, %v2816_v4  ;;  %v2100_v16 = vmax.f32 %v6433_v24, %v1944_v56  ;;  %v4570_v31 = vpop.f32.mrb[185].mxu0  ;;  %v4704_v54 = vpop.f32.mrb[185].mxu1  ;;  %v2944_v1 = vmax.f32 %v2883_v36, 0.0 }
 0x267   : > { %v1947_v3 = vpop.f32.mrb[186].mxu0  ;;  %v2596_v58 = vpop.f32.mrb[186].mxu1 }
 0x268   : > { %v2945_v15 = vmax.f32 %v2884_v55, 0.0  ;;  %v2749_v22 = vmax.f32 %v2100_v16, %v2593_v57  ;;  %v2101_v43 = vmax.f32 %v6436_v27, %v1947_v3  ;;  %v4571_v47 = vpop.f32.mrb[187].mxu0  ;;  %v4705_v40 = vpop.f32.mrb[187].mxu1  ;;  %v6446_v55 = vld [vmem:[#allocation27_spill] sm:$0xff]  ;;  %v6449_v27 = vld [vmem:[#allocation29_spill] sm:$0xff] }
 0x269   : > { %v6448_v10 = vmax.f32 %v6446_v55, %v6447_v5 }
 0x26a   : > { %v3980_v0 = vpack.c.bf16 %v2945_v15, %v2944_v1  ;;  %v2817_v44 = vmul.f32 %v5839_v34, %v2749_v22  ;;  %v2750_v59 = vmax.f32 %v2101_v43, %v2596_v58  ;;  %v6450_v43 = vld [vmem:[#allocation30_spill] sm:$0xff] }
 0x26b   : > { %v6451_v47 = vmax.f32 %v6449_v27, %v6450_v43  ;;  %v6465_v27 = vld [vmem:[#allocation40_spill] sm:$0xff] }
 0x26c   : > { %4070 = vst [vmem:[%s5871_s12 + $0x70] sm:$0xff] %v3980_v0   ;;  %v2885_v28 = vadd.f32 %v5847_v2, %v2817_v44  ;;  %v2818_v29 = vmul.f32 %v5839_v34, %v2750_v59 }
 0x26d   : > { %v1952_v60 = vpop.f32.mrb[188].mxu0  ;;  %v2601_v61 = vpop.f32.mrb[188].mxu1 }
 0x26e   : > { %v2886_v62 = vadd.f32 %v5847_v2, %v2818_v29  ;;  %v2102_v51 = vmax.f32 %v6439_v30, %v1952_v60  ;;  %v4574_v46 = vpop.f32.mrb[189].mxu0  ;;  %v4708_v11 = vpop.f32.mrb[189].mxu1  ;;  %v2946_v26 = vmax.f32 %v2885_v28, 0.0 }
 0x26f   : > { %v1955_v12 = vpop.f32.mrb[190].mxu0  ;;  %v2604_v25 = vpop.f32.mrb[190].mxu1 }
 0x270   : > { %v2947_v32 = vmax.f32 %v2886_v62, 0.0  ;;  %v2751_v33 = vmax.f32 %v2102_v51, %v2601_v61  ;;  %v2103_v7 = vmax.f32 %v6442_v8, %v1955_v12  ;;  %v4575_v17 = vpop.f32.mrb[191].mxu0  ;;  %v4709_v20 = vpop.f32.mrb[191].mxu1  ;;  %v6452_v62 = vld [vmem:[#allocation31_spill] sm:$0xff]  ;;  %v6455_v8 = vld [vmem:[#allocation33_spill] sm:$0xff] }
 0x271   : > { %v6454_v48 = vmax.f32 %v6452_v62, %v6453_v45 }
 0x272   : > { %v3985_v21 = vpack.c.bf16 %v2947_v32, %v2946_v26  ;;  %v2819_v18 = vmul.f32 %v5839_v34, %v2751_v33  ;;  %v2752_v52 = vmax.f32 %v2103_v7, %v2604_v25  ;;  %v6456_v7 = vld [vmem:[#allocation34_spill] sm:$0xff] }
 0x273   : > { %v6457_v17 = vmax.f32 %v6455_v8, %v6456_v7  ;;  %v6471_v8 = vld [vmem:[#allocation44_spill] sm:$0xff] }
 0x274   : > { %4071 = vst [vmem:[%s5871_s12 + $0x78] sm:$0xff] %v3985_v21   ;;  %v2887_v41 = vadd.f32 %v5847_v2, %v2819_v18  ;;  %v2820_v42 = vmul.f32 %v5839_v34, %v2752_v52 }
 0x275   : > { %v1960_v53 = vpop.f32.mrb[192].mxu0  ;;  %v2609_v9 = vpop.f32.mrb[192].mxu1 }
 0x276   : > { %v2888_v63 = vadd.f32 %v5847_v2, %v2820_v42  ;;  %v2104_v50 = vmax.f32 %v6445_v23, %v1960_v53  ;;  %v4578_v39 = vpop.f32.mrb[193].mxu0  ;;  %v4712_v6 = vpop.f32.mrb[193].mxu1  ;;  %v2948_v4 = vmax.f32 %v2887_v41, 0.0 }
 0x277   : > { %v1963_v35 = vpop.f32.mrb[194].mxu0  ;;  %v2612_v36 = vpop.f32.mrb[194].mxu1 }
 0x278   : > { %v2949_v56 = vmax.f32 %v2888_v63, 0.0  ;;  %v2753_v57 = vmax.f32 %v2104_v50, %v2609_v9  ;;  %v2105_v24 = vmax.f32 %v6448_v10, %v1963_v35  ;;  %v4579_v16 = vpop.f32.mrb[195].mxu0  ;;  %v4713_v31 = vpop.f32.mrb[195].mxu1  ;;  %v6458_v63 = vld [vmem:[#allocation35_spill] sm:$0xff]  ;;  %v6461_v10 = vld [vmem:[#allocation37_spill] sm:$0xff] }
 0x279   : > { %v6460_v19 = vmax.f32 %v6458_v63, %v6459_v49 }
 0x27a   : > { %v3990_v54 = vpack.c.bf16 %v2949_v56, %v2948_v4  ;;  %v2821_v3 = vmul.f32 %v5839_v34, %v2753_v57  ;;  %v2754_v58 = vmax.f32 %v2105_v24, %v2612_v36  ;;  %v6462_v24 = vld [vmem:[#allocation38_spill] sm:$0xff] }
 0x27b   : > { %v6463_v16 = vmax.f32 %v6461_v10, %v6462_v24  ;;  %v6477_v10 = vld [vmem:[#allocation48_spill] sm:$0xff] }
 0x27c   : > { %4072 = vst [vmem:[%s5871_s12 + $0x80] sm:$0xff] %v3990_v54   ;;  %v2889_v1 = vadd.f32 %v5847_v2, %v2821_v3  ;;  %v2822_v15 = vmul.f32 %v5839_v34, %v2754_v58 }
 0x27d   : > { %v1968_v22 = vpop.f32.mrb[196].mxu0  ;;  %v2617_v37 = vpop.f32.mrb[196].mxu1 }
 0x27e   : > { %v2890_v38 = vadd.f32 %v5847_v2, %v2822_v15  ;;  %v2106_v40 = vmax.f32 %v6451_v47, %v1968_v22  ;;  %v4582_v0 = vpop.f32.mrb[197].mxu0  ;;  %v4716_v44 = vpop.f32.mrb[197].mxu1  ;;  %v2950_v29 = vmax.f32 %v2889_v1, 0.0 }
 0x27f   : > { %v1971_v59 = vpop.f32.mrb[198].mxu0  ;;  %v2620_v28 = vpop.f32.mrb[198].mxu1 }
 0x280   : > { %v2951_v60 = vmax.f32 %v2890_v38, 0.0  ;;  %v2755_v61 = vmax.f32 %v2106_v40, %v2617_v37  ;;  %v2107_v30 = vmax.f32 %v6454_v48, %v1971_v59  ;;  %v4583_v51 = vpop.f32.mrb[199].mxu0  ;;  %v4717_v46 = vpop.f32.mrb[199].mxu1  ;;  %v6464_v38 = vld [vmem:[#allocation39_spill] sm:$0xff]  ;;  %v6467_v48 = vld [vmem:[#allocation41_spill] sm:$0xff] }
 0x281   : > { %v6466_v43 = vmax.f32 %v6464_v38, %v6465_v27 }
 0x282   : > { %v3995_v11 = vpack.c.bf16 %v2951_v60, %v2950_v29  ;;  %v2823_v12 = vmul.f32 %v5839_v34, %v2755_v61  ;;  %v2756_v25 = vmax.f32 %v2107_v30, %v2620_v28  ;;  %v6468_v30 = vld [vmem:[#allocation42_spill] sm:$0xff] }
 0x283   : > { %v6469_v51 = vmax.f32 %v6467_v48, %v6468_v30  ;;  %v6483_v48 = vld [vmem:[#allocation52_spill] sm:$0xff] }
 0x284   : > { %4073 = vst [vmem:[%s5871_s12 + $0x88] sm:$0xff] %v3995_v11   ;;  %v2891_v26 = vadd.f32 %v5847_v2, %v2823_v12  ;;  %v2824_v32 = vmul.f32 %v5839_v34, %v2756_v25 }
 0x285   : > { %v1976_v33 = vpop.f32.mrb[200].mxu0  ;;  %v2625_v13 = vpop.f32.mrb[200].mxu1 }
 0x286   : > { %v2892_v14 = vadd.f32 %v5847_v2, %v2824_v32  ;;  %v2108_v20 = vmax.f32 %v6457_v17, %v1976_v33  ;;  %v4586_v21 = vpop.f32.mrb[201].mxu0  ;;  %v4720_v18 = vpop.f32.mrb[201].mxu1  ;;  %v2952_v42 = vmax.f32 %v2891_v26, 0.0 }
 0x287   : > { %v1979_v52 = vpop.f32.mrb[202].mxu0  ;;  %v2628_v41 = vpop.f32.mrb[202].mxu1 }
 0x288   : > { %v2953_v53 = vmax.f32 %v2892_v14, 0.0  ;;  %v2757_v9 = vmax.f32 %v2108_v20, %v2625_v13  ;;  %v2109_v23 = vmax.f32 %v6460_v19, %v1979_v52  ;;  %v4587_v50 = vpop.f32.mrb[203].mxu0  ;;  %v4721_v39 = vpop.f32.mrb[203].mxu1  ;;  %v6470_v14 = vld [vmem:[#allocation43_spill] sm:$0xff]  ;;  %v6473_v19 = vld [vmem:[#allocation45_spill] sm:$0xff] }
 0x289   : > { %v6472_v7 = vmax.f32 %v6470_v14, %v6471_v8 }
 0x28a   : > { %v4000_v6 = vpack.c.bf16 %v2953_v53, %v2952_v42  ;;  %v2825_v35 = vmul.f32 %v5839_v34, %v2757_v9  ;;  %v2758_v36 = vmax.f32 %v2109_v23, %v2628_v41  ;;  %v6474_v23 = vld [vmem:[#allocation46_spill] sm:$0xff] }
 0x28b   : > { %v6475_v50 = vmax.f32 %v6473_v19, %v6474_v23  ;;  %v6489_v19 = vld [vmem:[#allocation56_spill] sm:$0xff] }
 0x28c   : > { %4074 = vst [vmem:[%s5871_s12 + $0x90] sm:$0xff] %v4000_v6   ;;  %v2893_v4 = vadd.f32 %v5847_v2, %v2825_v35  ;;  %v2826_v56 = vmul.f32 %v5839_v34, %v2758_v36 }
 0x28d   : > { %v1984_v57 = vpop.f32.mrb[204].mxu0  ;;  %v2633_v55 = vpop.f32.mrb[204].mxu1 }
 0x28e   : > { %v2894_v5 = vadd.f32 %v5847_v2, %v2826_v56  ;;  %v2110_v31 = vmax.f32 %v6463_v16, %v1984_v57  ;;  %v4590_v54 = vpop.f32.mrb[205].mxu0  ;;  %v4724_v3 = vpop.f32.mrb[205].mxu1  ;;  %v2954_v15 = vmax.f32 %v2893_v4, 0.0 }
 0x28f   : > { %v1987_v58 = vpop.f32.mrb[206].mxu0  ;;  %v2636_v1 = vpop.f32.mrb[206].mxu1 }
 0x290   : > { %v2955_v22 = vmax.f32 %v2894_v5, 0.0  ;;  %v2759_v37 = vmax.f32 %v2110_v31, %v2633_v55  ;;  %v2111_v47 = vmax.f32 %v6466_v43, %v1987_v58  ;;  %v4591_v40 = vpop.f32.mrb[207].mxu0  ;;  %v4725_v0 = vpop.f32.mrb[207].mxu1  ;;  %v6476_v5 = vld [vmem:[#allocation47_spill] sm:$0xff]  ;;  %v6479_v43 = vld [vmem:[#allocation49_spill] sm:$0xff] }
 0x291   : > { %v6478_v24 = vmax.f32 %v6476_v5, %v6477_v10 }
 0x292   : > { %v4005_v44 = vpack.c.bf16 %v2955_v22, %v2954_v15  ;;  %v2827_v59 = vmul.f32 %v5839_v34, %v2759_v37  ;;  %v2760_v28 = vmax.f32 %v2111_v47, %v2636_v1  ;;  %v6480_v47 = vld [vmem:[#allocation50_spill] sm:$0xff] }
 0x293   : > { %v6481_v40 = vmax.f32 %v6479_v43, %v6480_v47  ;;  %v6495_v43 = vld [vmem:[#allocation60_spill] sm:$0xff] }
 0x294   : > { %4075 = vst [vmem:[%s5871_s12 + $0x98] sm:$0xff] %v4005_v44   ;;  %v2895_v29 = vadd.f32 %v5847_v2, %v2827_v59  ;;  %v2828_v60 = vmul.f32 %v5839_v34, %v2760_v28 }
 0x295   : > { %v1992_v61 = vpop.f32.mrb[208].mxu0  ;;  %v2641_v62 = vpop.f32.mrb[208].mxu1 }
 0x296   : > { %v2896_v45 = vadd.f32 %v5847_v2, %v2828_v60  ;;  %v2112_v46 = vmax.f32 %v6469_v51, %v1992_v61  ;;  %v4594_v11 = vpop.f32.mrb[209].mxu0  ;;  %v4728_v12 = vpop.f32.mrb[209].mxu1  ;;  %v2956_v32 = vmax.f32 %v2895_v29, 0.0 }
 0x297   : > { %v1995_v25 = vpop.f32.mrb[210].mxu0  ;;  %v2644_v26 = vpop.f32.mrb[210].mxu1 }
 0x298   : > { %v2957_v33 = vmax.f32 %v2896_v45, 0.0  ;;  %v2761_v13 = vmax.f32 %v2112_v46, %v2641_v62  ;;  %v2113_v17 = vmax.f32 %v6472_v7, %v1995_v25  ;;  %v4595_v20 = vpop.f32.mrb[211].mxu0  ;;  %v4729_v21 = vpop.f32.mrb[211].mxu1  ;;  %v6482_v45 = vld [vmem:[#allocation51_spill] sm:$0xff]  ;;  %v6485_v7 = vld [vmem:[#allocation53_spill] sm:$0xff] }
 0x299   : > { %v6484_v30 = vmax.f32 %v6482_v45, %v6483_v48 }
 0x29a   : > { %v4010_v18 = vpack.c.bf16 %v2957_v33, %v2956_v32  ;;  %v2829_v52 = vmul.f32 %v5839_v34, %v2761_v13  ;;  %v2762_v41 = vmax.f32 %v2113_v17, %v2644_v26  ;;  %v6486_v17 = vld [vmem:[#allocation54_spill] sm:$0xff] }
 0x29b   : > { %v6487_v20 = vmax.f32 %v6485_v7, %v6486_v17  ;;  %v6501_v7 = vld [vmem:[#allocation64_spill] sm:$0xff] }
 0x29c   : > { %4076 = vst [vmem:[%s5871_s12 + $0xa0] sm:$0xff] %v4010_v18   ;;  %v2897_v42 = vadd.f32 %v5847_v2, %v2829_v52  ;;  %v2830_v53 = vmul.f32 %v5839_v34, %v2762_v41 }
 0x29d   : > { %v2000_v9 = vpop.f32.mrb[212].mxu0  ;;  %v2649_v63 = vpop.f32.mrb[212].mxu1 }
 0x29e   : > { %v2898_v49 = vadd.f32 %v5847_v2, %v2830_v53  ;;  %v2114_v39 = vmax.f32 %v6475_v50, %v2000_v9  ;;  %v4598_v6 = vpop.f32.mrb[213].mxu0  ;;  %v4732_v35 = vpop.f32.mrb[213].mxu1  ;;  %v2958_v56 = vmax.f32 %v2897_v42, 0.0 }
 0x29f   : > { %v2003_v36 = vpop.f32.mrb[214].mxu0  ;;  %v2652_v4 = vpop.f32.mrb[214].mxu1 }
 0x2a0   : > { %v2959_v57 = vmax.f32 %v2898_v49, 0.0  ;;  %v2763_v55 = vmax.f32 %v2114_v39, %v2649_v63  ;;  %v2115_v16 = vmax.f32 %v6478_v24, %v2003_v36  ;;  %v4599_v31 = vpop.f32.mrb[215].mxu0  ;;  %v4733_v54 = vpop.f32.mrb[215].mxu1  ;;  %v6488_v49 = vld [vmem:[#allocation55_spill] sm:$0xff] }
 0x2a1   : > { %v6490_v23 = vmax.f32 %v6488_v49, %v6489_v19  ;;  %v6492_v31 = vld [vmem:[#allocation58_spill] sm:$0xff] }
 0x2a2   : > { %v4015_v3 = vpack.c.bf16 %v2959_v57, %v2958_v56  ;;  %v2831_v58 = vmul.f32 %v5839_v34, %v2763_v55  ;;  %v2764_v1 = vmax.f32 %v2115_v16, %v2652_v4  ;;  %v6150_v57 = vld [vmem:[%s6226_s2] ss:$0 sm:$0xff]  ;;  %v6491_v16 = vld [vmem:[#allocation57_spill] sm:$0xff] }
 0x2a3   : > { %v6493_v54 = vmax.f32 %v6491_v16, %v6492_v31  ;;  %v6507_v16 = vld [vmem:[#allocation68_spill] sm:$0xff] }
 0x2a4   : > { %4077 = vst [vmem:[%s5871_s12 + $0xa8] sm:$0xff] %v4015_v3   ;;  %v2899_v15 = vadd.f32 %v5847_v2, %v2831_v58  ;;  %v2832_v22 = vmul.f32 %v5839_v34, %v2764_v1 }
 0x2a5   : > { %v2008_v37 = vpop.f32.mrb[216].mxu0  ;;  %v2657_v38 = vpop.f32.mrb[216].mxu1 }
 0x2a6   : > { %v2900_v27 = vadd.f32 %v5847_v2, %v2832_v22  ;;  %v2116_v0 = vmax.f32 %v6481_v40, %v2008_v37  ;;  %v4602_v44 = vpop.f32.mrb[217].mxu0  ;;  %v4736_v59 = vpop.f32.mrb[217].mxu1  ;;  %v2960_v60 = vmax.f32 %v2899_v15, 0.0 }
 0x2a7   : > { %v2011_v28 = vpop.f32.mrb[218].mxu0  ;;  %v2660_v29 = vpop.f32.mrb[218].mxu1 }
 0x2a8   : > { %v2961_v61 = vmax.f32 %v2900_v27, 0.0  ;;  %v2765_v62 = vmax.f32 %v2116_v0, %v2657_v38  ;;  %v2117_v51 = vmax.f32 %v6484_v30, %v2011_v28  ;;  %v4603_v46 = vpop.f32.mrb[219].mxu0  ;;  %v4737_v11 = vpop.f32.mrb[219].mxu1  ;;  %v6494_v27 = vld [vmem:[#allocation59_spill] sm:$0xff]  ;;  %v6497_v30 = vld [vmem:[#allocation61_spill] sm:$0xff] }
 0x2a9   : > { %v6496_v47 = vmax.f32 %v6494_v27, %v6495_v43 }
 0x2aa   : > { %v4020_v12 = vpack.c.bf16 %v2961_v61, %v2960_v60  ;;  %v2833_v25 = vmul.f32 %v5839_v34, %v2765_v62  ;;  %v2766_v26 = vmax.f32 %v2117_v51, %v2660_v29  ;;  %v6165_v29 = vld [vmem:[%s6227_s3] ss:$0 sm:$0xff] }
 0x2ab   : > { %v6498_v51 = vld [vmem:[#allocation62_spill] sm:$0xff] }
 0x2ac   : > { %4078 = vst [vmem:[%s5871_s12 + $0xb0] sm:$0xff] %v4020_v12   ;;  %v2901_v32 = vadd.f32 %v5847_v2, %v2833_v25  ;;  %v2834_v33 = vmul.f32 %v5839_v34, %v2766_v26  ;;  %v6499_v46 = vmax.f32 %v6497_v30, %v6498_v51  ;;  %v6513_v30 = vld [vmem:[#allocation72_spill] sm:$0xff] }
 0x2ad   : > { %v2016_v13 = vpop.f32.mrb[220].mxu0  ;;  %v2665_v14 = vpop.f32.mrb[220].mxu1 }
 0x2ae   : > { %v2902_v8 = vadd.f32 %v5847_v2, %v2834_v33  ;;  %v2118_v21 = vmax.f32 %v6487_v20, %v2016_v13  ;;  %v4606_v18 = vpop.f32.mrb[221].mxu0  ;;  %v4740_v52 = vpop.f32.mrb[221].mxu1  ;;  %v2962_v53 = vmax.f32 %v2901_v32, 0.0 }
 0x2af   : > { %v2019_v41 = vpop.f32.mrb[222].mxu0  ;;  %v2668_v42 = vpop.f32.mrb[222].mxu1 }
 0x2b0   : > { %v2963_v9 = vmax.f32 %v2902_v8, 0.0  ;;  %v2767_v63 = vmax.f32 %v2118_v21, %v2665_v14  ;;  %v2119_v50 = vmax.f32 %v6490_v23, %v2019_v41  ;;  %v4607_v39 = vpop.f32.mrb[223].mxu0  ;;  %v4741_v6 = vpop.f32.mrb[223].mxu1  ;;  %v6500_v8 = vld [vmem:[#allocation63_spill] sm:$0xff]  ;;  %v6503_v23 = vld [vmem:[#allocation65_spill] sm:$0xff] }
 0x2b1   : > { %v6502_v17 = vmax.f32 %v6500_v8, %v6501_v7 }
 0x2b2   : > { %v4025_v35 = vpack.c.bf16 %v2963_v9, %v2962_v53  ;;  %v2835_v36 = vmul.f32 %v5839_v34, %v2767_v63  ;;  %v2768_v4 = vmax.f32 %v2119_v50, %v2668_v42  ;;  %v6504_v50 = vld [vmem:[#allocation66_spill] sm:$0xff] }
 0x2b3   : > { %v6505_v39 = vmax.f32 %v6503_v23, %v6504_v50  ;;  %v6519_v23 = vld [vmem:[#allocation76_spill] sm:$0xff] }
 0x2b4   : > { %4079 = vst [vmem:[%s5871_s12 + $0xb8] sm:$0xff] %v4025_v35   ;;  %v2903_v56 = vadd.f32 %v5847_v2, %v2835_v36  ;;  %v2836_v55 = vmul.f32 %v6150_v57, %v2768_v4 }
 0x2b5   : > { %v2024_v5 = vpop.f32.mrb[224].mxu0  ;;  %v2673_v10 = vpop.f32.mrb[224].mxu1 }
 0x2b6   : > { %v2904_v24 = vadd.f32 %v5847_v2, %v2836_v55  ;;  %v2120_v34 = vmax.f32 %v6493_v54, %v2024_v5  ;;  %v4610_v3 = vpop.f32.mrb[225].mxu0  ;;  %v4744_v58 = vpop.f32.mrb[225].mxu1  ;;  %v2964_v22 = vmax.f32 %v2903_v56, 0.0 }
 0x2b7   : > { %v2027_v1 = vpop.f32.mrb[226].mxu0  ;;  %v2676_v15 = vpop.f32.mrb[226].mxu1 }
 0x2b8   : > { %v2965_v37 = vmax.f32 %v2904_v24, 0.0  ;;  %v2769_v38 = vmax.f32 %v2120_v34, %v2673_v10  ;;  %v2121_v40 = vmax.f32 %v6496_v47, %v2027_v1  ;;  %v4611_v0 = vpop.f32.mrb[227].mxu0  ;;  %v4745_v44 = vpop.f32.mrb[227].mxu1  ;;  %v6506_v24 = vld [vmem:[#allocation67_spill] sm:$0xff]  ;;  %v6509_v47 = vld [vmem:[#allocation69_spill] sm:$0xff] }
 0x2b9   : > { %v6508_v31 = vmax.f32 %v6506_v24, %v6507_v16 }
 0x2ba   : > { %v4030_v59 = vpack.c.bf16 %v2965_v37, %v2964_v22  ;;  %v2837_v2 = vmul.f32 %v6150_v57, %v2769_v38  ;;  %v2770_v28 = vmax.f32 %v2121_v40, %v2676_v15  ;;  %v6510_v40 = vld [vmem:[#allocation70_spill] sm:$0xff] }
 0x2bb   : > { %v6511_v0 = vmax.f32 %v6509_v47, %v6510_v40 }
 0x2bc   : > { %4080 = vst [vmem:[%s5871_s12 + $0xc0] sm:$0xff] %v4030_v59   ;;  %v2905_v60 = vadd.f32 %v6165_v29, %v2837_v2  ;;  %v2838_v61 = vmul.f32 %v6150_v57, %v2770_v28 }
 0x2bd   : > { %v2032_v62 = vpop.f32.mrb[228].mxu0  ;;  %v2681_v45 = vpop.f32.mrb[228].mxu1 }
 0x2be   : > { %v2906_v48 = vadd.f32 %v6165_v29, %v2838_v61  ;;  %v2122_v11 = vmax.f32 %v6499_v46, %v2032_v62  ;;  %v4614_v12 = vpop.f32.mrb[229].mxu0  ;;  %v4748_v25 = vpop.f32.mrb[229].mxu1  ;;  %v2966_v33 = vmax.f32 %v2905_v60, 0.0 }
 0x2bf   : > { %v2035_v26 = vpop.f32.mrb[230].mxu0  ;;  %v2684_v32 = vpop.f32.mrb[230].mxu1 }
 0x2c0   : > { %v2967_v13 = vmax.f32 %v2906_v48, 0.0  ;;  %v2771_v14 = vmax.f32 %v2122_v11, %v2681_v45  ;;  %v2123_v20 = vmax.f32 %v6502_v17, %v2035_v26  ;;  %v4615_v21 = vpop.f32.mrb[231].mxu0  ;;  %v4749_v18 = vpop.f32.mrb[231].mxu1  ;;  %v6512_v48 = vld [vmem:[#allocation71_spill] sm:$0xff]  ;;  %v6515_v17 = vld [vmem:[#allocation73_spill] sm:$0xff] }
 0x2c1   : > { %v6514_v51 = vmax.f32 %v6512_v48, %v6513_v30 }
 0x2c2   : > { %v4035_v52 = vpack.c.bf16 %v2967_v13, %v2966_v33  ;;  %v2839_v41 = vmul.f32 %v6150_v57, %v2771_v14  ;;  %v2772_v42 = vmax.f32 %v2123_v20, %v2684_v32  ;;  %v6516_v20 = vld [vmem:[#allocation74_spill] sm:$0xff] }
 0x2c3   : > { %v6517_v21 = vmax.f32 %v6515_v17, %v6516_v20 }
 0x2c4   : > { %4081 = vst [vmem:[%s5871_s12 + $0xc8] sm:$0xff] %v4035_v52   ;;  %v2907_v53 = vadd.f32 %v6165_v29, %v2839_v41  ;;  %v2840_v9 = vmul.f32 %v6150_v57, %v2772_v42 }
 0x2c5   : > { %v2040_v63 = vpop.f32.mrb[232].mxu0  ;;  %v2689_v49 = vpop.f32.mrb[232].mxu1 }
 0x2c6   : > { %v2908_v19 = vadd.f32 %v6165_v29, %v2840_v9  ;;  %v2124_v6 = vmax.f32 %v6505_v39, %v2040_v63  ;;  %v4618_v35 = vpop.f32.mrb[233].mxu0  ;;  %v4752_v36 = vpop.f32.mrb[233].mxu1  ;;  %v2968_v55 = vmax.f32 %v2907_v53, 0.0 }
 0x2c7   : > { %v2043_v4 = vpop.f32.mrb[234].mxu0  ;;  %v2692_v56 = vpop.f32.mrb[234].mxu1 }
 0x2c8   : > { %v2969_v5 = vmax.f32 %v2908_v19, 0.0  ;;  %v2773_v10 = vmax.f32 %v2124_v6, %v2689_v49  ;;  %v2125_v54 = vmax.f32 %v6508_v31, %v2043_v4  ;;  %v4619_v34 = vpop.f32.mrb[235].mxu0  ;;  %v4753_v3 = vpop.f32.mrb[235].mxu1  ;;  %v6518_v19 = vld [vmem:[#allocation75_spill] sm:$0xff]  ;;  %v6521_v31 = vld [vmem:[#allocation77_spill] sm:$0xff] }
 0x2c9   : > { %v6520_v50 = vmax.f32 %v6518_v19, %v6519_v23 }
 0x2ca   : > { %v4040_v58 = vpack.c.bf16 %v2969_v5, %v2968_v55  ;;  %v2841_v1 = vmul.f32 %v6150_v57, %v2773_v10  ;;  %v2774_v15 = vmax.f32 %v2125_v54, %v2692_v56  ;;  %v6522_v54 = vld [vmem:[#allocation78_spill] sm:$0xff] }
 0x2cb   : > { %v6523_v34 = vmax.f32 %v6521_v31, %v6522_v54 }
 0x2cc   : > { %4082 = vst [vmem:[%s5871_s12 + $0xd0] sm:$0xff] %v4040_v58   ;;  %v2909_v22 = vadd.f32 %v6165_v29, %v2841_v1  ;;  %v2842_v37 = vmul.f32 %v6150_v57, %v2774_v15 }
 0x2cd   : > { %v2048_v38 = vpop.f32.mrb[236].mxu0  ;;  %v2697_v27 = vpop.f32.mrb[236].mxu1 }
 0x2ce   : > { %v2910_v43 = vadd.f32 %v6165_v29, %v2842_v37  ;;  %v2126_v44 = vmax.f32 %v6511_v0, %v2048_v38  ;;  %v4622_v59 = vpop.f32.mrb[237].mxu0  ;;  %v4756_v2 = vpop.f32.mrb[237].mxu1  ;;  %v2970_v61 = vmax.f32 %v2909_v22, 0.0 }
 0x2cf   : > { %v2051_v28 = vpop.f32.mrb[238].mxu0  ;;  %v2700_v60 = vpop.f32.mrb[238].mxu1 }
 0x2d0   : > { %v2971_v62 = vmax.f32 %v2910_v43, 0.0  ;;  %v2775_v45 = vmax.f32 %v2126_v44, %v2697_v27  ;;  %v2127_v46 = vmax.f32 %v6514_v51, %v2051_v28  ;;  %v4623_v11 = vpop.f32.mrb[239].mxu0  ;;  %v4757_v12 = vpop.f32.mrb[239].mxu1 }
 0x2d2   : > { %v4045_v25 = vpack.c.bf16 %v2971_v62, %v2970_v61  ;;  %v2843_v26 = vmul.f32 %v6150_v57, %v2775_v45  ;;  %v2776_v32 = vmax.f32 %v2127_v46, %v2700_v60 }
 0x2d4   : > { %4083 = vst [vmem:[%s5871_s12 + $0xd8] sm:$0xff] %v4045_v25   ;;  %v2911_v33 = vadd.f32 %v6165_v29, %v2843_v26  ;;  %v2844_v13 = vmul.f32 %v6150_v57, %v2776_v32 }
 0x2d5   : > { %v2056_v14 = vpop.f32.mrb[240].mxu0  ;;  %v2705_v8 = vpop.f32.mrb[240].mxu1 }
 0x2d6   : > { %v2912_v7 = vadd.f32 %v6165_v29, %v2844_v13  ;;  %v2128_v18 = vmax.f32 %v6517_v21, %v2056_v14  ;;  %v4626_v52 = vpop.f32.mrb[241].mxu0  ;;  %v4760_v41 = vpop.f32.mrb[241].mxu1  ;;  %v2972_v9 = vmax.f32 %v2911_v33, 0.0 }
 0x2d7   : > { %v2059_v42 = vpop.f32.mrb[242].mxu0  ;;  %v2708_v53 = vpop.f32.mrb[242].mxu1 }
 0x2d8   : > { %v2973_v63 = vmax.f32 %v2912_v7, 0.0  ;;  %v2777_v49 = vmax.f32 %v2128_v18, %v2705_v8  ;;  %v2129_v39 = vmax.f32 %v6520_v50, %v2059_v42  ;;  %v4627_v6 = vpop.f32.mrb[243].mxu0  ;;  %v4761_v35 = vpop.f32.mrb[243].mxu1 }
 0x2da   : > { %v4050_v36 = vpack.c.bf16 %v2973_v63, %v2972_v9  ;;  %v2845_v4 = vmul.f32 %v6150_v57, %v2777_v49  ;;  %v2778_v56 = vmax.f32 %v2129_v39, %v2708_v53 }
 0x2dc   : > { %4084 = vst [vmem:[%s5871_s12 + $0xe0] sm:$0xff] %v4050_v36   ;;  %v2913_v55 = vadd.f32 %v6165_v29, %v2845_v4  ;;  %v2846_v5 = vmul.f32 %v6150_v57, %v2778_v56 }
 0x2dd   : > { %v2064_v10 = vpop.f32.mrb[244].mxu0  ;;  %v2713_v24 = vpop.f32.mrb[244].mxu1 }
 0x2de   : > { %v2914_v16 = vadd.f32 %v6165_v29, %v2846_v5  ;;  %v2130_v3 = vmax.f32 %v6523_v34, %v2064_v10  ;;  %v4630_v58 = vpop.f32.mrb[245].mxu0  ;;  %v4764_v1 = vpop.f32.mrb[245].mxu1  ;;  %v2974_v37 = vmax.f32 %v2913_v55, 0.0 }
 0x2df   : > { %v2067_v15 = vpop.f32.mrb[246].mxu0  ;;  %v2716_v22 = vpop.f32.mrb[246].mxu1 }
 0x2e0   : > { %v2975_v38 = vmax.f32 %v2914_v16, 0.0  ;;  %v2779_v27 = vmax.f32 %v2130_v3, %v2713_v24  ;;  %v4631_v43 = vpop.f32.mrb[247].mxu0  ;;  %v4765_v47 = vpop.f32.mrb[247].mxu1 }
 0x2e2   : > { %v4055_v40 = vpack.c.bf16 %v2975_v38, %v2974_v37  ;;  %v2847_v0 = vmul.f32 %v6150_v57, %v2779_v27 }
 0x2e4   : > { %4085 = vst [vmem:[%s5871_s12 + $0xe8] sm:$0xff] %v4055_v40   ;;  %v2915_v44 = vadd.f32 %v6165_v29, %v2847_v0 }
 0x2e6   : > { %v2976_v59 = vmax.f32 %v2915_v44, 0.0 }
 0x2e8   : > { %v3906_v2 = vpack.c.bf16 %v2976_v59, %v2976_v59 }
 0x2ea   : > { %3282 = vst [vmem:[%s5871_s12 + $0xf0] sm:$0x3] %v3906_v2 }
 0x2eb PF: > { %s14_s15 = sadd.s32 1, %s4916_s15  }
 0x2ec   : > { %p11_p4 = scmp.ge.s32.totalorder %s14_s15, 4  }
 0x2ee   :  { %13 = sbr.rel (!%p11_p4) target bundleno = 1 (0x1), region = 69 }

// kernel: cnn_encoder_forward.5
= control target key start
LH: loop header
LB: loop body
LE: loop exit
PB: predicated region body
PF: predicated region fallthrough
CT: control target
= control target key end

     0   :  { %s2705_s15 = smov 0   ;;  %s3279_s0 = inlined_call_operand.vmem [shape: bf16[2,4,100,288], index: 0, kind: input, shape index: {}]   ;;  %s3280_s1 = inlined_call_operand.vmem [shape: bf16[288,128], index: 1, kind: input, shape index: {}]   ;;  %s3281_s2 = inlined_call_operand.vmem [shape: f32[1,128], index: 2, kind: input, shape index: {}]   ;;  %s3282_s3 = inlined_call_operand.vmem [shape: f32[1,128], index: 3, kind: input, shape index: {}]   ;;  %s3283_s4 = inlined_call_operand.vmem [shape: bf16[2,100,128], index: 4, kind: output, shape index: {}]  }
   0x1 LB: > { %s1852_s16 = sadd.s32 4294967295, %s2676_s15   ;;  %p1856_p0 = scmp.ge.s32.totalorder %s2676_s15, 1  ;;  %s2676_s15 = sphi %s2705_s15, %s14_s15  }
   0x2   : > { %p162_p1 = scmp.lt.s32.totalorder %s2676_s15, 3 }
   0x4   : > { %p163_p2 = pnand %p1856_p0, %p162_p1 }
   0x5   : > { %v2716_v0 = vld [vmem:[%s3280_s1 + $0x40] sm:$0xff] (!%p163_p2)   ;;  %v2678_v1 = vmov (!%p163_p2), 0.0   ;;  %vm2679_vm0 = vmmov (!%p163_p2), 0   ;;  %p188_p3 = scmp.lt.s32.totalorder (!%p163_p2), %s1852_s16, 1  ;;  %v2736_v4 = vld [vmem:[%s3280_s1 + $0x48] sm:$0xff] (!%p163_p2)   ;;  %v2757_v7 = vld [vmem:[%s3280_s1 + $0x50] sm:$0xff] (!%p163_p2)  }
   0x6   : > { %166 = sbr.rel (%p163_p2) target bundleno = 474 (0x1da), region = 36  ;;  %2400 = vmatprep.subr.bf16.mxu1 (!%p163_p2), %v2678_v1  ;;  %v2722_v2 = vld [vmem:[%s3280_s1 + $0x80] sm:$0xff] (!%p163_p2)   ;;  %2132 = vmatprep.subr.bf16.mxu0 (!%p163_p2), %v2716_v0  ;;  %v2743_v5 = vld [vmem:[%s3280_s1 + $0x88] sm:$0xff] (!%p163_p2)   ;;  %v2763_v8 = vld [vmem:[%s3280_s1 + $0x10] sm:$0xff] (!%p163_p2)   ;;  %vm469_vm1 = vcmask (!%p163_p2), 261120  }
   0x7   : > { %v2728_v3 = vld [vmem:[%s3280_s1] sm:$0xff] (!%p163_p2)   ;;  %2404 = vmatprep.mubr.msk.bf16.mxu1 (!%p163_p2), %vm2679_vm0, %v2678_v1  ;;  %2401 = vmatpush3.bf16.msra.mxu1 (!%p163_p2), %v2722_v2  ;;  %v2751_v6 = vld [vmem:[%s3280_s1 + $0x8] sm:$0xff] (!%p163_p2)   ;;  %v2774_v9 = vld [vmem:[%s3280_s1 + $0x58] sm:$0xff] (!%p163_p2)  }
   0x8   : > { %2133 = vmatpush3.bf16.msra.mxu0 (!%p163_p2), %v2728_v3  ;;  %2402 = vmatprep.subr.bf16.mxu1 (!%p163_p2), %v2678_v1  ;;  %v2784_v11 = vld [vmem:[%s3280_s1 + $0x18] sm:$0xff] (!%p163_p2)   ;;  %v2792_v12 = vld [vmem:[%s3280_s1 + $0x60] sm:$0xff] (!%p163_p2)   ;;  %v2807_v15 = vld [vmem:[%s3280_s1 + $0x68] sm:$0xff] (!%p163_p2)  }
   0x9   : > { %2134 = vmatprep.subr.bf16.mxu0 (!%p163_p2), %v2736_v4  ;;  %v2801_v14 = vld [vmem:[%s3280_s1 + $0x20] sm:$0xff] (!%p163_p2)   ;;  %v2816_v16 = vld [vmem:[%s3280_s1 + $0x28] sm:$0xff] (!%p163_p2)   ;;  %v2824_v17 = vld [vmem:[%s3280_s1 + $0x70] sm:$0xff] (!%p163_p2)  }
   0xa   : > { %v2834_v20 = vld [vmem:[%s3280_s1 + $0x30] sm:$0xff] (!%p163_p2)   ;;  %v2840_v21 = vld [vmem:[%s3280_s1 + $0x78] sm:$0xff] (!%p163_p2)  }
   0xb   : > { %2403 = vmatpush3.bf16.msra.mxu1 (!%p163_p2), %v2743_v5  ;;  %v2849_v22 = vld [vmem:[%s3280_s1 + $0x38] sm:$0xff] (!%p163_p2)  }
   0xc   : > { %2135 = vmatpush3.bf16.msra.mxu0 (!%p163_p2), %v2751_v6  ;;  %2199 = vmatprep.subr.bf16.mxu1 (!%p163_p2), %v2716_v0 }
   0xd   : > { %s3285_s16 = smov (!%p188_p3, %s1852_s16), 1  ;;  %2136 = vmatprep.subr.bf16.mxu0 %v2757_v7 }
   0xe   : > { %s2532_s29 = smul.u32 624, %s3285_s16 }
   0xf   : > { %s2533_s11 = smul.u32 52, %s3285_s16 }
  0x10   : > { %s2769_s10 = scalar_lea.vmem %s3279_s0, %s2532_s29  ;;  %2137 = vmatpush3.bf16.msra.mxu0 %v2763_v8 }
  0x11   : > { %v2550_v10 = vld [vmem:[%s2769_s10 + $0x8] ss:$12 sps:$4 sm:$0xff]   ;;  %2138 = vmatprep.subr.bf16.mxu0 %v2774_v9  ;;  %v2555_v13 = vld [vmem:[%s2769_s10 + $0x20] ss:$12 sps:$4 sm:$0xff]   ;;  %v2567_v18 = vld [vmem:[%s2769_s10 + $0x4] ss:$12 sps:$4 sm:$0xff]   ;;  %s3227_s13 = scalar_lea.vmem %s3283_s4, %s2533_s11 }
  0x12   : > { %2405 = vmatmul.mubr.msk.bf16.vlgmr.msra.gmra.mrb[0].mxu1 %vm469_vm1, %v2550_v10  ;;  %v2560_v19 = vld [vmem:[%s2769_s10 + $0x38] ss:$12 sps:$4 sm:$0xff]   ;;  %523 = vmatprep.mubr.bf16.mxu0 %v2567_v18  ;;  %v2565_v23 = vld [vmem:[%s2769_s10] ss:$12 sps:$4 sm:$0xff]   ;;  %v2568_v24 = vld [vmem:[%s2769_s10 + $0x50] ss:$12 sps:$4 sm:$0xff]  }
  0x13   : > { %2408 = vmatprep.mubr.msk.bf16.mxu1 %vm2679_vm0, %v2678_v1  ;;  %2200 = vmatpush3.bf16.msra.mxu1 %v2728_v3  ;;  %v2569_v25 = vld [vmem:[%s2769_s10 + $0x1c] ss:$12 sps:$4 sm:$0xff]   ;;  %v2572_v27 = vld [vmem:[%s2769_s10 + $0x18] ss:$12 sps:$4 sm:$0xff]   ;;  %v2573_v28 = vld [vmem:[%s2769_s10 + $0x34] ss:$12 sps:$4 sm:$0xff]  }
  0x14   : > { %2201 = vmatprep.subr.bf16.mxu1 %v2736_v4  ;;  %2139 = vmatpush3.bf16.msra.mxu0 %v2784_v11  ;;  %v2571_v26 = vld [vmem:[%s2769_s10 + $0x68] ss:$12 sps:$4 sm:$0xff]   ;;  %v2575_v29 = vld [vmem:[%s2769_s10 + $0x80] ss:$12 sps:$4 sm:$0xff]   ;;  %v2576_v30 = vld [vmem:[%s2769_s10 + $0x30] ss:$12 sps:$4 sm:$0xff]  }
  0x15   : > { %2140 = vmatprep.subr.bf16.mxu0 %v2792_v12  ;;  %v2577_v31 = vld [vmem:[%s2769_s10 + $0x4c] ss:$12 sps:$4 sm:$0xff]   ;;  %v2580_v33 = vld [vmem:[%s2769_s10 + $0x48] ss:$12 sps:$4 sm:$0xff]   ;;  %v2584_v35 = vld [vmem:[%s2769_s10 + $0x64] ss:$12 sps:$4 sm:$0xff]  }
  0x16   : > { %v2579_v32 = vld [vmem:[%s2769_s10 + $0x98] ss:$0 sps:$4 sm:$0x33]   ;;  %v2583_v34 = vld [vmem:[%s2769_s10 + $0xa0] ss:$12 sps:$4 sm:$0xff]  }
  0x17   : > { %2202 = vmatpush3.bf16.msra.mxu1 %v2751_v6  ;;  %v2581_v36 = vld [vmem:[%s2769_s10 + $0x9c] ss:$12 sps:$4 sm:$0xff]   ;;  %v2586_v37 = vld [vmem:[%s2769_s10 + $0x60] ss:$12 sps:$4 sm:$0xff]   ;;  %v2587_v38 = vld [vmem:[%s2769_s10 + $0xb8] ss:$12 sps:$4 sm:$0xff]  }
  0x18   : > { %2203 = vmatprep.subr.bf16.mxu1 %v2757_v7  ;;  %2141 = vmatpush3.bf16.msra.mxu0 %v2801_v14  ;;  %v2589_v39 = vld [vmem:[%s2769_s10 + $0x7c] ss:$12 sps:$4 sm:$0xff]   ;;  %v259_v40 = vld [vmem:[%s2769_s10 + $0x90] sm:$0x33]  ;;  %v2592_v42 = vld [vmem:[%s2769_s10 + $0x78] ss:$12 sps:$4 sm:$0xff]  }
  0x19   : > { %2142 = vmatprep.subr.bf16.mxu0 %v2807_v15  ;;  %v2591_v41 = vld [vmem:[%s2769_s10 + $0xb4] ss:$12 sps:$4 sm:$0xff]   ;;  %v2593_v43 = vld [vmem:[%s2769_s10 + $0xd0] ss:$12 sps:$4 sm:$0xff]   ;;  %v1878_v44 = vcombine.high %v259_v40, %v259_v40  ;;  %v2596_v45 = vld [vmem:[%s2769_s10 + $0xcc] ss:$12 sps:$4 sm:$0xff]   ;;  %v1877_v46 = vcombine.low %v259_v40, %v259_v40 }
  0x1a   : > { %2409 = vmatmul.mubr.msk.bf16.gmra.mrb[4].mxu1 %vm469_vm1, %v2555_v13  ;;  %v2598_v47 = vld [vmem:[%s2769_s10 + $0xe8] ss:$12 sps:$4 sm:$0xff]   ;;  %v2600_v48 = vld [vmem:[%s2769_s10 + $0xe4] ss:$12 sps:$4 sm:$0xff]   ;;  %v2602_v50 = vld [vmem:[%s2769_s10 + $0x100] ss:$12 sps:$4 sm:$0xff]  }
  0x1b   : > { %2412 = vmatprep.mubr.msk.bf16.mxu1 %vm2679_vm0, %v2678_v1  ;;  %2204 = vmatpush3.bf16.msra.mxu1 %v2763_v8  ;;  %v2601_v49 = vld [vmem:[%s2769_s10 + $0xa4] ss:$12 sps:$4 sm:$0xff]   ;;  %v2604_v51 = vld [vmem:[%s2769_s10 + $0xfc] ss:$12 sps:$4 sm:$0xff]   ;;  %v2608_v55 = vld [vmem:[%s2769_s10 + $0x114] ss:$12 sps:$4 sm:$0xff]  }
  0x1c   : > { %2205 = vmatprep.subr.bf16.mxu1 %v2774_v9  ;;  %2143 = vmatpush3.bf16.msra.mxu0 %v2816_v16  ;;  %v2605_v52 = vld [vmem:[%s2769_s10 + $0xbc] ss:$12 sps:$4 sm:$0xff]   ;;  %v2606_v53 = vld [vmem:[%s2769_s10 + $0x118] ss:$12 sps:$4 sm:$0xff]   ;;  %v1929_v54 = vld [vmem:[%s2769_s10 + $0x12c] sm:$0x33] }
  0x1d   : > { %2144 = vmatprep.subr.bf16.mxu0 %v2824_v17  ;;  %v2609_v56 = vld [vmem:[%s2769_s10 + $0xd4] ss:$12 sps:$4 sm:$0xff]   ;;  %v1950_v57 = vcombine.high %v1929_v54, %v1929_v54  ;;  %v1949_v58 = vcombine.low %v1929_v54, %v1929_v54  ;;  %v2612_v59 = vld [vmem:[%s2769_s10 + $0xec] ss:$12 sps:$4 sm:$0xff]   ;;  %v2615_v60 = vld [vmem:[%s2769_s10 + $0x13c] ss:$12 sps:$4 sm:$0xff]  }
  0x1e   : > { %v2613_v61 = vld [vmem:[%s2769_s10 + $0x138] ss:$12 sps:$4 sm:$0xff]   ;;  %v2617_v63 = vld [vmem:[%s2769_s10 + $0x154] ss:$12 sps:$4 sm:$0xff]   ;;  %v2620_v10 = vld [vmem:[%s2769_s10 + $0x11c] ss:$12 sps:$4 sm:$0xff]  }
  0x1f   : > { %2206 = vmatpush3.bf16.msra.mxu1 %v2784_v11  ;;  %v2616_v62 = vld [vmem:[%s2769_s10 + $0x104] ss:$12 sps:$4 sm:$0xff]   ;;  %v2621_v13 = vld [vmem:[%s2769_s10 + $0x16c] ss:$12 sps:$4 sm:$0xff]  }
  0x20   : > { %2207 = vmatprep.subr.bf16.mxu1 %v2792_v12  ;;  %2145 = vmatpush3.bf16.msra.mxu0 %v2834_v20  ;;  %v2625_v18 = vld [vmem:[%s2769_s10 + $0x184] ss:$12 sps:$4 sm:$0xff]  }
  0x21   : > { %2146 = vmatprep.subr.bf16.mxu0 %v2840_v21 }
  0x22   : > { %2413 = vmatmul.mubr.msk.bf16.gmra.mrb[8].mxu1 %vm469_vm1, %v2560_v19 }
  0x23   : > { %2416 = vmatprep.mubr.msk.bf16.mxu1 %vm2679_vm0, %v2678_v1  ;;  %2208 = vmatpush3.bf16.msra.mxu1 %v2801_v14 }
  0x24   : > { %2209 = vmatprep.subr.bf16.mxu1 %v2807_v15  ;;  %2147 = vmatpush3.bf16.msra.mxu0 %v2849_v22 }
  0x25   : > { %2432 = vmatprep.subr.bf16.mxu0 %v2678_v1 }
  0x27   : > { %2210 = vmatpush3.bf16.msra.mxu1 %v2816_v16  ;;  %524 = vmatmul.mubr.bf16.vlgmr.msra.gmra.mrb[0].mxu0 %v2565_v23  ;;  %v2643_v23 = vld [vmem:[%s2769_s10 + $0x1a0] ss:$12 sps:$4 sm:$0xff]  }
  0x28   : > { %2211 = vmatprep.subr.bf16.mxu1 %v2824_v17  ;;  %2433 = vmatpush3.bf16.msra.mxu0 %v2722_v2 }
  0x29   : > { %531 = vmatprep.mubr.bf16.mxu0 %v2569_v25  ;;  %2434 = vmatprep.subr.bf16.mxu0 %v2678_v1  ;;  %v2646_v25 = vld [vmem:[%s2769_s10 + $0x1ec] ss:$12 sps:$4 sm:$0xff]  }
  0x2a   : > { %2417 = vmatmul.mubr.msk.bf16.gmra.mrb[12].mxu1 %vm469_vm1, %v2568_v24  ;;  %v2644_v24 = vld [vmem:[%s2769_s10 + $0x1f0] ss:$12 sps:$4 sm:$0xff]  }
  0x2b   : > { %2420 = vmatprep.mubr.msk.bf16.mxu1 %vm2679_vm0, %v2678_v1  ;;  %2212 = vmatpush3.bf16.msra.mxu1 %v2834_v20 }
  0x2c   : > { %2213 = vmatprep.subr.bf16.mxu1 %v2840_v21  ;;  %2435 = vmatpush3.bf16.msra.mxu0 %v2743_v5 }
  0x2d   : > { %2464 = vmatprep.subr.bf16.mxu0 %v2678_v1 }
  0x2f   : > { %2214 = vmatpush3.bf16.msra.mxu1 %v2849_v22  ;;  %532 = vmatmul.mubr.bf16.gmra.mrb[4].mxu0 %v2572_v27  ;;  %v2648_v27 = vld [vmem:[%s2769_s10 + $0x208] ss:$12 sps:$4 sm:$0xff]  }
  0x30   : > { %2266 = vmatprep.subr.bf16.mxu1 %v2716_v0  ;;  %539 = vmatprep.mubr.bf16.mxu0 %v2573_v28  ;;  %v2651_v28 = vld [vmem:[%s2769_s10 + $0x1d0] ss:$0 sps:$4 sm:$0x33]  }
  0x32   : > { %2421 = vmatmul.mubr.msk.bf16.gmra.mrb[16].mxu1 %vm469_vm1, %v2571_v26  ;;  %v2647_v26 = vld [vmem:[%s2769_s10 + $0x1b8] ss:$12 sps:$4 sm:$0xff]  }
  0x33   : > { %2424 = vmatprep.mubr.msk.bf16.mxu1 %vm2679_vm0, %v2678_v1 }
  0x37   : > { %540 = vmatmul.mubr.bf16.gmra.mrb[8].mxu0 %v2576_v30  ;;  %v2655_v30 = vld [vmem:[%s2769_s10 + $0x1dc] ss:$12 sps:$4 sm:$0xff]  }
  0x38   : > { %547 = vmatprep.mubr.bf16.mxu0 %v2577_v31  ;;  %v2656_v31 = vld [vmem:[%s2769_s10 + $0x238] ss:$12 sps:$4 sm:$0xff]  }
  0x3a   : > { %2425 = vmatmul.mubr.msk.bf16.gmra.mrb[20].mxu1 %vm469_vm1, %v2575_v29  ;;  %v2652_v29 = vld [vmem:[%s2769_s10 + $0x220] ss:$12 sps:$4 sm:$0xff]  }
  0x3b   : > { %2428 = vmatprep.mubr.msk.bf16.mxu1 %vm2679_vm0, %v2678_v1 }
  0x3f   : > { %548 = vmatmul.mubr.bf16.gmra.mrb[12].mxu0 %v2580_v33  ;;  %v2659_v33 = vld [vmem:[%s2769_s10 + $0x1f4] ss:$12 sps:$4 sm:$0xff]  }
  0x40   : > { %555 = vmatprep.mubr.bf16.mxu0 %v2584_v35  ;;  %v2037_v35 = vld [vmem:[%s2769_s10 + $0x264] sm:$0x33] }
  0x41   : > { %v2057_v40 = vcombine.low %v2037_v35, %v2037_v35 }
  0x42   : > { %2429 = vmatmul.mubr.msk.bf16.gmra.mrb[24].mxu1 %vm469_vm1, %v2579_v32  ;;  %v2658_v32 = vld [vmem:[%s2769_s10 + $0x234] ss:$12 sps:$4 sm:$0xff]  }
  0x43   : > { %847 = vmatprep.mubr.bf16.mxu1 %v2583_v34  ;;  %v2660_v34 = vld [vmem:[%s2769_s10 + $0x250] ss:$12 sps:$4 sm:$0xff]  }
  0x47   : > { %556 = vmatmul.mubr.bf16.gmra.mrb[16].mxu0 %v2586_v37  ;;  %v2663_v37 = vld [vmem:[%s2769_s10 + $0x20c] ss:$12 sps:$4 sm:$0xff]  }
  0x48   : > { %563 = vmatprep.mubr.bf16.mxu0 %v2589_v39 }
  0x4a   : > { %848 = vmatmul.mubr.bf16.vlgmr.msra.gmra.mrb[28].mxu1 %v2581_v36  ;;  %v2662_v36 = vld [vmem:[%s2769_s10 + $0x24c] ss:$12 sps:$4 sm:$0xff]  }
  0x4b   : > { %855 = vmatprep.mubr.bf16.mxu1 %v2587_v38  ;;  %2267 = vmatpush3.bf16.msra.mxu1 %v2728_v3  ;;  %v2058_v38 = vcombine.high %v2037_v35, %v2037_v35 }
  0x4c   : > { %2268 = vmatprep.subr.bf16.mxu1 %v2736_v4 }
  0x4f   : > { %2269 = vmatpush3.bf16.msra.mxu1 %v2751_v6  ;;  %564 = vmatmul.mubr.bf16.gmra.mrb[20].mxu0 %v2592_v42 }
  0x50   : > { %2270 = vmatprep.subr.bf16.mxu1 %v2757_v7  ;;  %571 = vmatprep.mubr.bf16.mxu0 %v1878_v44 }
  0x52   : > { %856 = vmatmul.mubr.bf16.gmra.mrb[32].mxu1 %v2591_v41  ;;  %v2666_v41 = vld [vmem:[%s2769_s10 + $0x224] ss:$12 sps:$4 sm:$0xff]  }
  0x53   : > { %863 = vmatprep.mubr.bf16.mxu1 %v2593_v43  ;;  %2271 = vmatpush3.bf16.msra.mxu1 %v2763_v8 }
  0x54   : > { %2272 = vmatprep.subr.bf16.mxu1 %v2774_v9 }
  0x57   : > { %2273 = vmatpush3.bf16.msra.mxu1 %v2784_v11  ;;  %572 = vmatmul.mubr.bf16.gmra.mrb[24].mxu0 %v1877_v46  ;;  %v2667_v46 = vld [vmem:[%s2769_s10 + $0x26c] ss:$0 sps:$4 sm:$0x33]  }
  0x58   : > { %2274 = vmatprep.subr.bf16.mxu1 %v2792_v12  ;;  %2436 = vmatprep.mubr.msk.bf16.mxu0 %vm2679_vm0, %v2678_v1 }
  0x5a   : > { %864 = vmatmul.mubr.bf16.gmra.mrb[36].mxu1 %v2596_v45 }
  0x5b   : > { %871 = vmatprep.mubr.bf16.mxu1 %v2598_v47  ;;  %2275 = vmatpush3.bf16.msra.mxu1 %v2801_v14  ;;  %v2668_v47 = vld [vmem:[%s2769_s10 + $0x23c] ss:$12 sps:$4 sm:$0xff]  }
  0x5c   : > { %2276 = vmatprep.subr.bf16.mxu1 %v2807_v15 }
  0x5f   : > { %2277 = vmatpush3.bf16.msra.mxu1 %v2816_v16  ;;  %2437 = vmatmul.mubr.msk.bf16.vlgmr.msra.gmra.mrb[28].mxu0 %vm469_vm1, %v2601_v49 }
  0x60   : > { %2278 = vmatprep.subr.bf16.mxu1 %v2824_v17  ;;  %2465 = vmatpush3.bf16.msra.mxu0 %v2722_v2 }
  0x61   : > { %2440 = vmatprep.mubr.msk.bf16.mxu0 %vm2679_vm0, %v2678_v1  ;;  %2466 = vmatprep.subr.bf16.mxu0 %v2678_v1 }
  0x62   : > { %872 = vmatmul.mubr.bf16.gmra.mrb[40].mxu1 %v2600_v48 }
  0x63   : > { %879 = vmatprep.mubr.bf16.mxu1 %v2602_v50  ;;  %2279 = vmatpush3.bf16.msra.mxu1 %v2834_v20 }
  0x64   : > { %2280 = vmatprep.subr.bf16.mxu1 %v2840_v21  ;;  %2467 = vmatpush3.bf16.msra.mxu0 %v2743_v5 }
  0x65   : > { %2496 = vmatprep.subr.bf16.mxu0 %v2678_v1 }
  0x67   : > { %2281 = vmatpush3.bf16.msra.mxu1 %v2849_v22  ;;  %2441 = vmatmul.mubr.msk.bf16.gmra.mrb[32].mxu0 %vm469_vm1, %v2605_v52  ;;  %v2669_v52 = vld [vmem:[%s2769_s10 + $0x254] ss:$12 sps:$4 sm:$0xff]  }
  0x68   : > { %2333 = vmatprep.subr.bf16.mxu1 %v2716_v0  ;;  %2444 = vmatprep.mubr.msk.bf16.mxu0 %vm2679_vm0, %v2678_v1  ;;  %v2619_v0 = vld [vmem:[%s2769_s10 + $0x150] ss:$12 sps:$4 sm:$0xff]  }
  0x6a   : > { %880 = vmatmul.mubr.bf16.gmra.mrb[44].mxu1 %v2604_v51 }
  0x6b   : > { %887 = vmatprep.mubr.bf16.mxu1 %v2606_v53 }
  0x6f   : > { %2445 = vmatmul.mubr.msk.bf16.gmra.mrb[36].mxu0 %vm469_vm1, %v2609_v56 }
  0x70   : > { %2448 = vmatprep.mubr.msk.bf16.mxu0 %vm2679_vm0, %v2678_v1 }
  0x72   : > { %888 = vmatmul.mubr.bf16.gmra.mrb[48].mxu1 %v2608_v55 }
  0x73   : > { %895 = vmatprep.mubr.bf16.mxu1 %v1950_v57 }
  0x77   : > { %2449 = vmatmul.mubr.msk.bf16.gmra.mrb[40].mxu0 %vm469_vm1, %v2612_v59 }
  0x78   : > { %2452 = vmatprep.mubr.msk.bf16.mxu0 %vm2679_vm0, %v2678_v1 }
  0x7a   : > { %896 = vmatmul.mubr.bf16.gmra.mrb[52].mxu1 %v1949_v58 }
  0x7b   : > { %1184 = vmatprep.mubr.bf16.mxu1 %v2615_v60 }
  0x7f   : > { %2453 = vmatmul.mubr.msk.bf16.gmra.mrb[44].mxu0 %vm469_vm1, %v2616_v62 }
  0x80   : > { %2456 = vmatprep.mubr.msk.bf16.mxu0 %vm2679_vm0, %v2678_v1 }
  0x82   : > { %1185 = vmatmul.mubr.bf16.vlgmr.msra.gmra.mrb[56].mxu1 %v2613_v61 }
  0x83   : > { %1192 = vmatprep.mubr.bf16.mxu1 %v2617_v63  ;;  %2334 = vmatpush3.bf16.msra.mxu1 %v2728_v3  ;;  %v2623_v3 = vld [vmem:[%s2769_s10 + $0x168] ss:$12 sps:$4 sm:$0xff]  }
  0x84   : > { %2335 = vmatprep.subr.bf16.mxu1 %v2736_v4  ;;  %v2624_v4 = vld [vmem:[%s2769_s10 + $0x134] ss:$0 sps:$4 sm:$0x33]  }
  0x87   : > { %2336 = vmatpush3.bf16.msra.mxu1 %v2751_v6  ;;  %2457 = vmatmul.mubr.msk.bf16.gmra.mrb[48].mxu0 %vm469_vm1, %v2620_v10  ;;  %v2627_v6 = vld [vmem:[%s2769_s10 + $0x180] ss:$12 sps:$4 sm:$0xff]  }
  0x88   : > { %2337 = vmatprep.subr.bf16.mxu1 %v2757_v7  ;;  %2460 = vmatprep.mubr.msk.bf16.mxu0 %vm2679_vm0, %v2678_v1  ;;  %v2628_v7 = vld [vmem:[%s2769_s10 + $0x140] ss:$12 sps:$4 sm:$0xff]  }
  0x8a   : > { %1193 = vmatmul.mubr.bf16.gmra.mrb[60].mxu1 %v2619_v0 }
  0x8b   : > { %1200 = vmatprep.mubr.bf16.mxu1 %v2621_v13  ;;  %2338 = vmatpush3.bf16.msra.mxu1 %v2763_v8  ;;  %v2629_v8 = vld [vmem:[%s2769_s10 + $0x19c] ss:$12 sps:$4 sm:$0xff]  }
  0x8c   : > { %2339 = vmatprep.subr.bf16.mxu1 %v2774_v9  ;;  %v2631_v9 = vld [vmem:[%s2769_s10 + $0x198] ss:$12 sps:$4 sm:$0xff]  }
  0x8f   : > { %2340 = vmatpush3.bf16.msra.mxu1 %v2784_v11  ;;  %2461 = vmatmul.mubr.msk.bf16.gmra.mrb[52].mxu0 %vm469_vm1, %v2624_v4  ;;  %v2632_v11 = vld [vmem:[%s2769_s10 + $0x158] ss:$12 sps:$4 sm:$0xff]  }
  0x90   : > { %2341 = vmatprep.subr.bf16.mxu1 %v2792_v12  ;;  %2468 = vmatprep.mubr.msk.bf16.mxu0 %vm2679_vm0, %v2678_v1  ;;  %v2633_v12 = vld [vmem:[%s2769_s10 + $0x1b4] ss:$12 sps:$4 sm:$0xff]  }
  0x92   : > { %1201 = vmatmul.mubr.bf16.gmra.mrb[64].mxu1 %v2623_v3 }
  0x93   : > { %1208 = vmatprep.mubr.bf16.mxu1 %v2625_v18  ;;  %2342 = vmatpush3.bf16.msra.mxu1 %v2801_v14  ;;  %v1983_v14 = vld [vmem:[%s2769_s10 + $0x1c8] sm:$0x33] }
  0x94   : > { %2343 = vmatprep.subr.bf16.mxu1 %v2807_v15  ;;  %v2635_v15 = vld [vmem:[%s2769_s10 + $0x1b0] ss:$12 sps:$4 sm:$0xff]   ;;  %v2003_v19 = vcombine.low %v1983_v14, %v1983_v14 }
  0x97   : > { %2344 = vmatpush3.bf16.msra.mxu1 %v2816_v16  ;;  %2469 = vmatmul.mubr.msk.bf16.vlgmr.msra.gmra.mrb[56].mxu0 %vm469_vm1, %v2628_v7  ;;  %v2636_v16 = vld [vmem:[%s2769_s10 + $0x170] ss:$12 sps:$4 sm:$0xff]  }
  0x98   : > { %2345 = vmatprep.subr.bf16.mxu1 %v2824_v17  ;;  %2497 = vmatpush3.bf16.msra.mxu0 %v2722_v2  ;;  %v2004_v17 = vcombine.high %v1983_v14, %v1983_v14 }
  0x99   : > { %2472 = vmatprep.mubr.msk.bf16.mxu0 %vm2679_vm0, %v2678_v1  ;;  %2498 = vmatprep.subr.bf16.mxu0 %v2678_v1 }
  0x9a   : > { %1209 = vmatmul.mubr.bf16.gmra.mrb[68].mxu1 %v2627_v6 }
  0x9b   : > { %1216 = vmatprep.mubr.bf16.mxu1 %v2629_v8  ;;  %2346 = vmatpush3.bf16.msra.mxu1 %v2834_v20  ;;  %v2639_v20 = vld [vmem:[%s2769_s10 + $0x188] ss:$12 sps:$4 sm:$0xff]  }
  0x9c   : > { %2347 = vmatprep.subr.bf16.mxu1 %v2840_v21  ;;  %2499 = vmatpush3.bf16.msra.mxu0 %v2743_v5  ;;  %v2642_v21 = vld [vmem:[%s2769_s10 + $0x1d8] ss:$12 sps:$4 sm:$0xff]  }
  0x9f   : > { %2348 = vmatpush3.bf16.msra.mxu1 %v2849_v22  ;;  %2473 = vmatmul.mubr.msk.bf16.gmra.mrb[60].mxu0 %vm469_vm1, %v2632_v11  ;;  %v2640_v22 = vld [vmem:[%s2769_s10 + $0x1d4] ss:$12 sps:$4 sm:$0xff]  }
  0xa0   : > { %2528 = vmatprep.subr.bf16.mxu1 %v2678_v1  ;;  %2476 = vmatprep.mubr.msk.bf16.mxu0 %vm2679_vm0, %v2678_v1 }
  0xa2   : > { %1217 = vmatmul.mubr.bf16.gmra.mrb[72].mxu1 %v2631_v9 }
  0xa3   : > { %1224 = vmatprep.mubr.bf16.mxu1 %v2633_v12 }
  0xa7   : > { %2477 = vmatmul.mubr.msk.bf16.gmra.mrb[64].mxu0 %vm469_vm1, %v2636_v16 }
  0xa8   : > { %2480 = vmatprep.mubr.msk.bf16.mxu0 %vm2679_vm0, %v2678_v1 }
  0xaa   : > { %1225 = vmatmul.mubr.bf16.gmra.mrb[76].mxu1 %v2635_v15 }
  0xab   : > { %1232 = vmatprep.mubr.bf16.mxu1 %v2004_v17 }
  0xaf   : > { %2481 = vmatmul.mubr.msk.bf16.gmra.mrb[68].mxu0 %vm469_vm1, %v2639_v20 }
  0xb0   : > { %2484 = vmatprep.mubr.msk.bf16.mxu0 %vm2679_vm0, %v2678_v1 }
  0xb2   : > { %1233 = vmatmul.mubr.bf16.gmra.mrb[80].mxu1 %v2003_v19 }
  0xb3   : > { %1521 = vmatprep.mubr.bf16.mxu1 %v2642_v21 }
  0xb7   : > { %2485 = vmatmul.mubr.msk.bf16.gmra.mrb[72].mxu0 %vm469_vm1, %v2643_v23 }
  0xb8   : > { %2488 = vmatprep.mubr.msk.bf16.mxu0 %vm2679_vm0, %v2678_v1 }
  0xba   : > { %1522 = vmatmul.mubr.bf16.vlgmr.msra.gmra.mrb[84].mxu1 %v2640_v22 }
  0xbb   : > { %1529 = vmatprep.mubr.bf16.mxu1 %v2644_v24  ;;  %2530 = vmatpush3.bf16.msra.mxu1 %v2722_v2  ;;  %v2650_v2 = vld [vmem:[%s2769_s10 + $0x204] ss:$12 sps:$4 sm:$0xff]  }
  0xbc   : > { %2529 = vmatprep.subr.bf16.mxu1 %v2678_v1 }
  0xbf   : > { %2531 = vmatpush3.bf16.msra.mxu1 %v2743_v5  ;;  %2489 = vmatmul.mubr.msk.bf16.gmra.mrb[76].mxu0 %vm469_vm1, %v2647_v26  ;;  %v2654_v5 = vld [vmem:[%s2769_s10 + $0x21c] ss:$12 sps:$4 sm:$0xff]  }
  0xc0   : > { %2492 = vmatprep.mubr.msk.bf16.mxu0 %vm2679_vm0, %v2678_v1 }
  0xc2   : > { %1530 = vmatmul.mubr.bf16.gmra.mrb[88].mxu1 %v2646_v25 }
  0xc3   : > { %1537 = vmatprep.mubr.bf16.mxu1 %v2648_v27 }
  0xc7   : > { %2493 = vmatmul.mubr.msk.bf16.gmra.mrb[80].mxu0 %vm469_vm1, %v2651_v28 }
  0xc8   : > { %2500 = vmatprep.mubr.msk.bf16.mxu0 %vm2679_vm0, %v2678_v1 }
  0xca   : > { %1538 = vmatmul.mubr.bf16.gmra.mrb[92].mxu1 %v2650_v2 }
  0xcb   : > { %1545 = vmatprep.mubr.bf16.mxu1 %v2652_v29 }
  0xcf   : > { %2501 = vmatmul.mubr.msk.bf16.vlgmr.msra.gmra.mrb[84].mxu0 %vm469_vm1, %v2655_v30 }
  0xd0   : > { %2504 = vmatprep.mubr.msk.bf16.mxu0 %vm2679_vm0, %v2678_v1 }
  0xd2   : > { %1546 = vmatmul.mubr.bf16.gmra.mrb[96].mxu1 %v2654_v5 }
  0xd3   : > { %1553 = vmatprep.mubr.bf16.mxu1 %v2656_v31 }
  0xd7   : > { %2505 = vmatmul.mubr.msk.bf16.gmra.mrb[88].mxu0 %vm469_vm1, %v2659_v33 }
  0xd8   : > { %2508 = vmatprep.mubr.msk.bf16.mxu0 %vm2679_vm0, %v2678_v1 }
  0xda   : > { %1554 = vmatmul.mubr.bf16.gmra.mrb[100].mxu1 %v2658_v32 }
  0xdb   : > { %1561 = vmatprep.mubr.bf16.mxu1 %v2660_v34 }
  0xdf   : > { %2509 = vmatmul.mubr.msk.bf16.gmra.mrb[92].mxu0 %vm469_vm1, %v2663_v37 }
  0xe0   : > { %2512 = vmatprep.mubr.msk.bf16.mxu0 %vm2679_vm0, %v2678_v1 }
  0xe2   : > { %1562 = vmatmul.mubr.bf16.gmra.mrb[104].mxu1 %v2662_v36 }
  0xe3   : > { %1569 = vmatprep.mubr.bf16.mxu1 %v2058_v38 }
  0xe5   : > { %v613_v39 = vpop.f32.mrb[0].mxu1 }
  0xe6   : > { %v2406_v42 = vpop.f32.mrb[1].mxu1 }
  0xe7   : > { %v616_v43 = vpop.f32.mrb[2].mxu1  ;;  %2513 = vmatmul.mubr.msk.bf16.gmra.mrb[96].mxu0 %vm469_vm1, %v2666_v41 }
  0xe8   : > { %v2407_v44 = vpop.f32.mrb[3].mxu1  ;;  %2516 = vmatprep.mubr.msk.bf16.mxu0 %vm2679_vm0, %v2678_v1 }
  0xea   : > { %1570 = vmatmul.mubr.bf16.gmra.mrb[108].mxu1 %v2057_v40 }
  0xeb   : > { %2524 = vmatprep.mubr.msk.bf16.mxu1 %vm2679_vm0, %v2678_v1 }
  0xed   : > { %v621_v45 = vpop.f32.mrb[4].mxu1 }
  0xee   : > { %v2410_v48 = vpop.f32.mrb[5].mxu1 }
  0xef   : > { %v624_v49 = vpop.f32.mrb[6].mxu1  ;;  %2517 = vmatmul.mubr.msk.bf16.gmra.mrb[100].mxu0 %vm469_vm1, %v2668_v47 }
  0xf0   : > { %v2411_v50 = vpop.f32.mrb[7].mxu1  ;;  %2520 = vmatprep.mubr.msk.bf16.mxu0 %vm2679_vm0, %v2678_v1 }
  0xf2   : > { %2525 = vmatmul.mubr.msk.bf16.vlgmr.msra.gmra.mrb[112].mxu1 %vm469_vm1, %v2667_v46 }
  0xf5   : > { %v629_v51 = vpop.f32.mrb[8].mxu1 }
  0xf6   : > { %v2414_v53 = vpop.f32.mrb[9].mxu1 }
  0xf7   : > { %v632_v54 = vpop.f32.mrb[10].mxu1  ;;  %2521 = vmatmul.mubr.msk.bf16.gmra.mrb[104].mxu0 %vm469_vm1, %v2669_v52 }
  0xf8   : > { %v2415_v55 = vpop.f32.mrb[11].mxu1 }
  0xfa   : > { %v2148_v56 = vpop.f32.mrb[0].mxu0 }
  0xfb   : > { %v2149_v58 = vpop.f32.mrb[1].mxu0 }
  0xfc   : > { %v2150_v60 = vadd.f32 %v2149_v58, %v2148_v56  ;;  %v2151_v61 = vpop.f32.mrb[2].mxu0 }
  0xfd   : > { %v637_v57 = vpop.f32.mrb[12].mxu1  ;;  %v2152_v63 = vpop.f32.mrb[3].mxu0 }
  0xfe   : > { %v2418_v59 = vpop.f32.mrb[13].mxu1  ;;  %v3059_v10 = vadd.f32 %v2150_v60, %v613_v39  ;;  %v2153_v13 = vadd.f32 %v2152_v63, %v2151_v61 }
  0xff   : > { %v640_v62 = vpop.f32.mrb[14].mxu1 }
 0x100   : > { %v2419_v0 = vpop.f32.mrb[15].mxu1  ;;  %v3061_v1 = vadd.f32 %v2153_v13, %v616_v43 }
 0x102   : > { %v2154_v3 = vpop.f32.mrb[4].mxu0 }
 0x103   : > { %v2155_v18 = vpop.f32.mrb[5].mxu0 }
 0x104   : > { %v2156_v7 = vadd.f32 %v2155_v18, %v2154_v3  ;;  %v2157_v8 = vpop.f32.mrb[6].mxu0 }
 0x105   : > { %v645_v4 = vpop.f32.mrb[16].mxu1  ;;  %v2158_v11 = vpop.f32.mrb[7].mxu0 }
 0x106   : > { %v2422_v6 = vpop.f32.mrb[17].mxu1  ;;  %v3063_v14 = vadd.f32 %v2156_v7, %v621_v45  ;;  %v2159_v15 = vadd.f32 %v2158_v11, %v2157_v8 }
 0x107   : > { %v648_v9 = vpop.f32.mrb[18].mxu1 }
 0x108   : > { %v2423_v12 = vpop.f32.mrb[19].mxu1  ;;  %v3065_v16 = vadd.f32 %v2159_v15, %v624_v49 }
 0x10a   : > { %v2160_v17 = vpop.f32.mrb[8].mxu0 }
 0x10b   : > { %v2161_v20 = vpop.f32.mrb[9].mxu0 }
 0x10c   : > { %v2162_v22 = vadd.f32 %v2161_v20, %v2160_v17  ;;  %v2163_v23 = vpop.f32.mrb[10].mxu0 }
 0x10d   : > { %v653_v19 = vpop.f32.mrb[20].mxu1  ;;  %v2164_v25 = vpop.f32.mrb[11].mxu0 }
 0x10e   : > { %v2426_v21 = vpop.f32.mrb[21].mxu1  ;;  %v3067_v27 = vadd.f32 %v2162_v22, %v629_v51  ;;  %v2165_v2 = vadd.f32 %v2164_v25, %v2163_v23 }
 0x10f   : > { %v656_v24 = vpop.f32.mrb[22].mxu1 }
 0x110   : > { %v2427_v26 = vpop.f32.mrb[23].mxu1  ;;  %v3069_v28 = vadd.f32 %v2165_v2, %v632_v54 }
 0x112   : > { %v2166_v29 = vpop.f32.mrb[12].mxu0 }
 0x113   : > { %v2167_v30 = vpop.f32.mrb[13].mxu0 }
 0x114   : > { %v2168_v32 = vadd.f32 %v2167_v30, %v2166_v29  ;;  %v2169_v33 = vpop.f32.mrb[14].mxu0 }
 0x115   : > { %v661_v5 = vpop.f32.mrb[24].mxu1  ;;  %v2170_v35 = vpop.f32.mrb[15].mxu0 }
 0x116   : > { %v2430_v31 = vpop.f32.mrb[25].mxu1  ;;  %v3071_v37 = vadd.f32 %v2168_v32, %v637_v57  ;;  %v2171_v38 = vadd.f32 %v2170_v35, %v2169_v33 }
 0x117   : > { %v664_v34 = vpop.f32.mrb[26].mxu1 }
 0x118   : > { %v2431_v36 = vpop.f32.mrb[27].mxu1  ;;  %v3073_v39 = vadd.f32 %v2171_v38, %v640_v62 }
 0x11a   : > { %v2172_v40 = vpop.f32.mrb[16].mxu0 }
 0x11b   : > { %v2173_v42 = vpop.f32.mrb[17].mxu0 }
 0x11c   : > { %v2174_v44 = vadd.f32 %v2173_v42, %v2172_v40  ;;  %v2175_v45 = vpop.f32.mrb[18].mxu0 }
 0x11d   : > { %v2215_v41 = vpop.f32.mrb[28].mxu1  ;;  %v2176_v48 = vpop.f32.mrb[19].mxu0 }
 0x11e   : > { %v2216_v43 = vpop.f32.mrb[29].mxu1  ;;  %v3075_v50 = vadd.f32 %v2174_v44, %v645_v4  ;;  %v2177_v51 = vadd.f32 %v2176_v48, %v2175_v45 }
 0x11f   : > { %v2217_v46 = vadd.f32 %v2216_v43, %v2215_v41  ;;  %v2218_v47 = vpop.f32.mrb[30].mxu1 }
 0x120   : > { %v2219_v49 = vpop.f32.mrb[31].mxu1  ;;  %v3077_v53 = vadd.f32 %v2177_v51, %v648_v9 }
 0x121   : > { %v2220_v52 = vadd.f32 %v2219_v49, %v2218_v47 }
 0x122   : > { %v2178_v54 = vpop.f32.mrb[20].mxu0 }
 0x123   : > { %v2179_v56 = vpop.f32.mrb[21].mxu0 }
 0x124   : > { %v2180_v58 = vadd.f32 %v2179_v56, %v2178_v54  ;;  %v2181_v59 = vpop.f32.mrb[22].mxu0 }
 0x125   : > { %v2221_v55 = vpop.f32.mrb[32].mxu1  ;;  %v2182_v62 = vpop.f32.mrb[23].mxu0 }
 0x126   : > { %v2222_v57 = vpop.f32.mrb[33].mxu1  ;;  %v3079_v0 = vadd.f32 %v2180_v58, %v653_v19  ;;  %v2183_v13 = vadd.f32 %v2182_v62, %v2181_v59 }
 0x127   : > { %v2223_v60 = vadd.f32 %v2222_v57, %v2221_v55  ;;  %v2224_v61 = vpop.f32.mrb[34].mxu1 }
 0x128   : > { %v2225_v63 = vpop.f32.mrb[35].mxu1  ;;  %v3081_v4 = vadd.f32 %v2183_v13, %v656_v24 }
 0x129   : > { %v2226_v3 = vadd.f32 %v2225_v63, %v2224_v61 }
 0x12a   : > { %v2184_v18 = vpop.f32.mrb[24].mxu0 }
 0x12b   : > { %v2185_v7 = vpop.f32.mrb[25].mxu0 }
 0x12c   : > { %v2186_v9 = vadd.f32 %v2185_v7, %v2184_v18  ;;  %v2187_v11 = vpop.f32.mrb[26].mxu0 }
 0x12d   : > { %v2227_v6 = vpop.f32.mrb[36].mxu1  ;;  %v2188_v17 = vpop.f32.mrb[27].mxu0 }
 0x12e   : > { %v2228_v8 = vpop.f32.mrb[37].mxu1  ;;  %v3083_v21 = vadd.f32 %v2186_v9, %v661_v5 }
 0x12f   : > { %v2229_v12 = vadd.f32 %v2228_v8, %v2227_v6  ;;  %v2230_v15 = vpop.f32.mrb[38].mxu1 }
 0x130   : > { %v2231_v20 = vpop.f32.mrb[39].mxu1 }
 0x131   : > { %v2232_v22 = vadd.f32 %v2231_v20, %v2230_v15 }
 0x132   : > { %v937_v23 = vpop.f32.mrb[28].mxu0 }
 0x133   : > { %v3085_v25 = vadd.f32 %v2217_v46, %v937_v23  ;;  %v2438_v26 = vpop.f32.mrb[29].mxu0 }
 0x134   : > { %v940_v2 = vpop.f32.mrb[30].mxu0 }
 0x135   : > { %v2233_v19 = vpop.f32.mrb[40].mxu1  ;;  %v991_v31 = vmax.f32 %v3059_v10, %v3085_v25  ;;  %v3089_v32 = vadd.f32 %v2220_v52, %v940_v2  ;;  %v2439_v33 = vpop.f32.mrb[31].mxu0 }
 0x136   : > { %v2234_v24 = vpop.f32.mrb[41].mxu1 }
 0x137   : > { %v2235_v29 = vadd.f32 %v2234_v24, %v2233_v19  ;;  %v2236_v30 = vpop.f32.mrb[42].mxu1  ;;  %v992_v5 = vmax.f32 %v3061_v1, %v3089_v32 }
 0x138   : > { %v2237_v34 = vpop.f32.mrb[43].mxu1 }
 0x139   : > { %v2238_v35 = vadd.f32 %v2237_v34, %v2236_v30 }
 0x13a   : > { %v945_v36 = vpop.f32.mrb[32].mxu0 }
 0x13b   : > { %v3093_v40 = vadd.f32 %v2223_v60, %v945_v36  ;;  %v2442_v41 = vpop.f32.mrb[33].mxu0 }
 0x13c   : > { %v948_v43 = vpop.f32.mrb[34].mxu0 }
 0x13d   : > { %v2239_v38 = vpop.f32.mrb[44].mxu1  ;;  %v993_v46 = vmax.f32 %v3063_v14, %v3093_v40  ;;  %v3097_v47 = vadd.f32 %v2226_v3, %v948_v43  ;;  %v2443_v48 = vpop.f32.mrb[35].mxu0 }
 0x13e   : > { %v2240_v42 = vpop.f32.mrb[45].mxu1 }
 0x13f   : > { %v2241_v44 = vadd.f32 %v2240_v42, %v2239_v38  ;;  %v2242_v45 = vpop.f32.mrb[46].mxu1  ;;  %v994_v52 = vmax.f32 %v3065_v16, %v3097_v47 }
 0x140   : > { %v2243_v49 = vpop.f32.mrb[47].mxu1 }
 0x141   : > { %v2244_v51 = vadd.f32 %v2243_v49, %v2242_v45 }
 0x142   : > { %v953_v54 = vpop.f32.mrb[36].mxu0 }
 0x143   : > { %v3101_v56 = vadd.f32 %v2229_v12, %v953_v54  ;;  %v2446_v57 = vpop.f32.mrb[37].mxu0 }
 0x144   : > { %v956_v59 = vpop.f32.mrb[38].mxu0 }
 0x145   : > { %v2245_v55 = vpop.f32.mrb[48].mxu1  ;;  %v995_v62 = vmax.f32 %v3067_v27, %v3101_v56  ;;  %v3105_v63 = vadd.f32 %v2232_v22, %v956_v59  ;;  %v2447_v13 = vpop.f32.mrb[39].mxu0 }
 0x146   : > { %v2246_v58 = vpop.f32.mrb[49].mxu1 }
 0x147   : > { %v2247_v60 = vadd.f32 %v2246_v58, %v2245_v55  ;;  %v2248_v61 = vpop.f32.mrb[50].mxu1  ;;  %v996_v6 = vmax.f32 %v3069_v28, %v3105_v63 }
 0x148   : > { %v2249_v3 = vpop.f32.mrb[51].mxu1 }
 0x149   : > { %v2250_v18 = vadd.f32 %v2249_v3, %v2248_v61 }
 0x14a   : > { %v961_v7 = vpop.f32.mrb[40].mxu0 }
 0x14b   : > { %v3109_v9 = vadd.f32 %v2235_v29, %v961_v7  ;;  %v2450_v11 = vpop.f32.mrb[41].mxu0 }
 0x14c   : > { %v964_v15 = vpop.f32.mrb[42].mxu0 }
 0x14d   : > { %v2251_v8 = vpop.f32.mrb[52].mxu1  ;;  %v997_v23 = vmax.f32 %v3071_v37, %v3109_v9  ;;  %v3113_v22 = vadd.f32 %v2238_v35, %v964_v15  ;;  %v2451_v19 = vpop.f32.mrb[43].mxu0 }
 0x14e   : > { %v2252_v12 = vpop.f32.mrb[53].mxu1 }
 0x14f   : > { %v2253_v17 = vadd.f32 %v2252_v12, %v2251_v8  ;;  %v2254_v20 = vpop.f32.mrb[54].mxu1  ;;  %v998_v24 = vmax.f32 %v3073_v39, %v3113_v22 }
 0x150   : > { %v2255_v26 = vpop.f32.mrb[55].mxu1 }
 0x152   : > { %v969_v2 = vpop.f32.mrb[44].mxu0 }
 0x153   : > { %v3117_v33 = vadd.f32 %v2241_v44, %v969_v2  ;;  %v2454_v29 = vpop.f32.mrb[45].mxu0 }
 0x154   : > { %v972_v36 = vpop.f32.mrb[46].mxu0 }
 0x155   : > { %v2282_v30 = vpop.f32.mrb[56].mxu1  ;;  %v999_v42 = vmax.f32 %v3075_v50, %v3117_v33  ;;  %v3121_v43 = vadd.f32 %v2244_v51, %v972_v36  ;;  %v2455_v35 = vpop.f32.mrb[47].mxu0 }
 0x156   : > { %v2283_v34 = vpop.f32.mrb[57].mxu1 }
 0x157   : > { %v2284_v38 = vadd.f32 %v2283_v34, %v2282_v30  ;;  %v2285_v41 = vpop.f32.mrb[58].mxu1  ;;  %v1000_v49 = vmax.f32 %v3077_v53, %v3121_v43 }
 0x158   : > { %v2286_v45 = vpop.f32.mrb[59].mxu1 }
 0x159   : > { %v2287_v48 = vadd.f32 %v2286_v45, %v2285_v41 }
 0x15a   : > { %v977_v54 = vpop.f32.mrb[48].mxu0 }
 0x15b   : > { %v3125_v44 = vadd.f32 %v2247_v60, %v977_v54  ;;  %v2458_v57 = vpop.f32.mrb[49].mxu0 }
 0x15c   : > { %v980_v59 = vpop.f32.mrb[50].mxu0 }
 0x15d   : > { %v2288_v55 = vpop.f32.mrb[60].mxu1  ;;  %v1001_v3 = vmax.f32 %v3079_v0, %v3125_v44  ;;  %v3129_v51 = vadd.f32 %v2250_v18, %v980_v59  ;;  %v2459_v7 = vpop.f32.mrb[51].mxu0 }
 0x15e   : > { %v2289_v58 = vpop.f32.mrb[61].mxu1 }
 0x15f   : > { %v2290_v61 = vadd.f32 %v2289_v58, %v2288_v55  ;;  %v2291_v13 = vpop.f32.mrb[62].mxu1  ;;  %v1002_v12 = vmax.f32 %v3081_v4, %v3129_v51 }
 0x160   : > { %v2292_v8 = vpop.f32.mrb[63].mxu1 }
 0x161   : > { %v2293_v11 = vadd.f32 %v2292_v8, %v2291_v13 }
 0x162   : > { %v985_v15 = vpop.f32.mrb[52].mxu0 }
 0x163   : > { %v3133_v60 = vadd.f32 %v2253_v17, %v985_v15  ;;  %v2462_v19 = vpop.f32.mrb[53].mxu0 }
 0x164   : > { %v988_v2 = vpop.f32.mrb[54].mxu0 }
 0x165   : > { %v2294_v20 = vpop.f32.mrb[64].mxu1  ;;  %v1003_v34 = vmax.f32 %v3083_v21, %v3133_v60  ;;  %v2463_v18 = vpop.f32.mrb[55].mxu0 }
 0x166   : > { %v2295_v26 = vpop.f32.mrb[65].mxu1 }
 0x167   : > { %v2296_v30 = vadd.f32 %v2295_v26, %v2294_v20  ;;  %v2297_v29 = vpop.f32.mrb[66].mxu1 }
 0x168   : > { %v2298_v36 = vpop.f32.mrb[67].mxu1 }
 0x169   : > { %v2299_v41 = vadd.f32 %v2298_v36, %v2297_v29 }
 0x16a   : > { %v1274_v35 = vpop.f32.mrb[56].mxu0 }
 0x16b   : > { %v1275_v54 = vadd.f32 %v2284_v38, %v1274_v35  ;;  %v2470_v55 = vpop.f32.mrb[57].mxu0 }
 0x16c   : > { %v1277_v58 = vpop.f32.mrb[58].mxu0 }
 0x16d   : > { %v2300_v45 = vpop.f32.mrb[68].mxu1  ;;  %v3140_v13 = vmax.f32 %v991_v31, %v1275_v54  ;;  %v1278_v7 = vadd.f32 %v2287_v48, %v1277_v58  ;;  %v2471_v8 = vpop.f32.mrb[59].mxu0 }
 0x16e   : > { %v2301_v57 = vpop.f32.mrb[69].mxu1 }
 0x16f   : > { %v2302_v59 = vadd.f32 %v2301_v57, %v2300_v45  ;;  %v2303_v17 = vpop.f32.mrb[70].mxu1  ;;  %v3145_v19 = vmax.f32 %v992_v5, %v1278_v7 }
 0x170   : > { %v2304_v15 = vpop.f32.mrb[71].mxu1 }
 0x171   : > { %v2305_v20 = vadd.f32 %v2304_v15, %v2303_v17 }
 0x172   : > { %v1282_v38 = vpop.f32.mrb[60].mxu0 }
 0x173   : > { %v1283_v2 = vadd.f32 %v2290_v61, %v1282_v38  ;;  %v2474_v29 = vpop.f32.mrb[61].mxu0 }
 0x174   : > { %v1285_v36 = vpop.f32.mrb[62].mxu0 }
 0x175   : > { %v2306_v26 = vpop.f32.mrb[72].mxu1  ;;  %v3150_v10 = vmax.f32 %v993_v46, %v1283_v2  ;;  %v1286_v25 = vadd.f32 %v2293_v11, %v1285_v36  ;;  %v2475_v31 = vpop.f32.mrb[63].mxu0 }
 0x176   : > { %v2307_v18 = vpop.f32.mrb[73].mxu1 }
 0x177   : > { %v2308_v35 = vadd.f32 %v2307_v18, %v2306_v26  ;;  %v2309_v45 = vpop.f32.mrb[74].mxu1  ;;  %v3155_v1 = vmax.f32 %v994_v52, %v1286_v25 }
 0x178   : > { %v2310_v48 = vpop.f32.mrb[75].mxu1 }
 0x179   : > { %v2311_v54 = vadd.f32 %v2310_v48, %v2309_v45 }
 0x17a   : > { %v1290_v32 = vpop.f32.mrb[64].mxu0 }
 0x17b   : > { %v1291_v61 = vadd.f32 %v2296_v30, %v1290_v32  ;;  %v2478_v55 = vpop.f32.mrb[65].mxu0 }
 0x17c   : > { %v1293_v58 = vpop.f32.mrb[66].mxu0 }
 0x17d   : > { %v2312_v5 = vpop.f32.mrb[76].mxu1  ;;  %v3160_v14 = vmax.f32 %v995_v62, %v1291_v61  ;;  %v1294_v40 = vadd.f32 %v2299_v41, %v1293_v58  ;;  %v2479_v46 = vpop.f32.mrb[67].mxu0 }
 0x17e   : > { %v2313_v57 = vpop.f32.mrb[77].mxu1 }
 0x17f   : > { %v2314_v17 = vadd.f32 %v2313_v57, %v2312_v5  ;;  %v2315_v7 = vpop.f32.mrb[78].mxu1  ;;  %v3165_v16 = vmax.f32 %v996_v6, %v1294_v40 }
 0x180   : > { %v2316_v11 = vpop.f32.mrb[79].mxu1 }
 0x181   : > { %v2317_v8 = vadd.f32 %v2316_v11, %v2315_v7 }
 0x182   : > { %v1298_v47 = vpop.f32.mrb[68].mxu0 }
 0x183   : > { %v1299_v30 = vadd.f32 %v2302_v59, %v1298_v47  ;;  %v2482_v15 = vpop.f32.mrb[69].mxu0 }
 0x184   : > { %v1301_v26 = vpop.f32.mrb[70].mxu0  ;;  %v3205_v15 = vld [vmem:[%s3281_s2] ss:$0 sm:$0xff] }
 0x185   : > { %v2318_v52 = vpop.f32.mrb[80].mxu1  ;;  %v3170_v27 = vmax.f32 %v997_v23, %v1299_v30  ;;  %v1302_v56 = vadd.f32 %v2305_v20, %v1301_v26  ;;  %v2483_v62 = vpop.f32.mrb[71].mxu0 }
 0x186   : > { %v2319_v38 = vpop.f32.mrb[81].mxu1 }
 0x187   : > { %v2320_v2 = vadd.f32 %v2319_v38, %v2318_v52  ;;  %v2321_v29 = vpop.f32.mrb[82].mxu1  ;;  %v3175_v28 = vmax.f32 %v998_v24, %v1302_v56  ;;  %v3211_v56 = vld [vmem:[%s3282_s3] ss:$0 sm:$0xff] }
 0x188   : > { %v2322_v41 = vpop.f32.mrb[83].mxu1 }
 0x18a   : > { %v1306_v63 = vpop.f32.mrb[72].mxu0 }
 0x18b   : > { %v1307_v59 = vadd.f32 %v2308_v35, %v1306_v63  ;;  %v2486_v18 = vpop.f32.mrb[73].mxu0 }
 0x18c   : > { %v1309_v45 = vpop.f32.mrb[74].mxu0 }
 0x18d   : > { %v2349_v6 = vpop.f32.mrb[84].mxu1  ;;  %v3180_v37 = vmax.f32 %v999_v42, %v1307_v59  ;;  %v1310_v9 = vadd.f32 %v2311_v54, %v1309_v45  ;;  %v2487_v23 = vpop.f32.mrb[75].mxu0 }
 0x18e   : > { %v2350_v36 = vpop.f32.mrb[85].mxu1 }
 0x18f   : > { %v2351_v25 = vadd.f32 %v2350_v36, %v2349_v6  ;;  %v2352_v31 = vpop.f32.mrb[86].mxu1  ;;  %v3185_v39 = vmax.f32 %v1000_v49, %v1310_v9 }
 0x190   : > { %v2353_v20 = vpop.f32.mrb[87].mxu1 }
 0x191   : > { %v2354_v48 = vadd.f32 %v2353_v20, %v2352_v31 }
 0x192   : > { %v1314_v22 = vpop.f32.mrb[76].mxu0 }
 0x193   : > { %v1315_v35 = vadd.f32 %v2314_v17, %v1314_v22  ;;  %v2490_v32 = vpop.f32.mrb[77].mxu0 }
 0x194   : > { %v1317_v61 = vpop.f32.mrb[78].mxu0 }
 0x195   : > { %v2355_v24 = vpop.f32.mrb[88].mxu1  ;;  %v3190_v50 = vmax.f32 %v1001_v3, %v1315_v35  ;;  %v1318_v33 = vadd.f32 %v2317_v8, %v1317_v61  ;;  %v2491_v42 = vpop.f32.mrb[79].mxu0 }
 0x196   : > { %v2356_v5 = vpop.f32.mrb[89].mxu1 }
 0x197   : > { %v2357_v55 = vadd.f32 %v2356_v5, %v2355_v24  ;;  %v2358_v57 = vpop.f32.mrb[90].mxu1  ;;  %v3195_v53 = vmax.f32 %v1002_v12, %v1318_v33 }
 0x198   : > { %v2359_v54 = vpop.f32.mrb[91].mxu1 }
 0x199   : > { %v2360_v58 = vadd.f32 %v2359_v54, %v2358_v57 }
 0x19a   : > { %v1322_v43 = vpop.f32.mrb[80].mxu0 }
 0x19b   : > { %v1323_v17 = vadd.f32 %v2320_v2, %v1322_v43  ;;  %v2494_v7 = vpop.f32.mrb[81].mxu0 }
 0x19c   : > { %v1325_v46 = vpop.f32.mrb[82].mxu0 }
 0x19d   : > { %v2361_v49 = vpop.f32.mrb[92].mxu1  ;;  %v3200_v0 = vmax.f32 %v1003_v34, %v1323_v17  ;;  %v2495_v44 = vpop.f32.mrb[83].mxu0 }
 0x19e   : > { %v2362_v40 = vpop.f32.mrb[93].mxu1 }
 0x19f   : > { %v2363_v11 = vadd.f32 %v2362_v40, %v2361_v49  ;;  %v2364_v47 = vpop.f32.mrb[94].mxu1 }
 0x1a0   : > { %v2365_v3 = vpop.f32.mrb[95].mxu1 }
 0x1a1   : > { %v2366_v8 = vadd.f32 %v2365_v3, %v2364_v47 }
 0x1a2   : > { %v1611_v52 = vpop.f32.mrb[84].mxu0 }
 0x1a3   : > { %v1612_v51 = vadd.f32 %v2351_v25, %v1611_v52  ;;  %v2502_v12 = vpop.f32.mrb[85].mxu0 }
 0x1a4   : > { %v1614_v38 = vpop.f32.mrb[86].mxu0 }
 0x1a5   : > { %v2367_v4 = vpop.f32.mrb[96].mxu1  ;;  %v1665_v21 = vmax.f32 %v3140_v13, %v1612_v51  ;;  %v1615_v60 = vadd.f32 %v2354_v48, %v1614_v38  ;;  %v2503_v34 = vpop.f32.mrb[87].mxu0 }
 0x1a6   : > { %v2368_v30 = vpop.f32.mrb[97].mxu1 }
 0x1a7   : > { %v2369_v26 = vadd.f32 %v2368_v30, %v2367_v4  ;;  %v2370_v2 = vpop.f32.mrb[98].mxu1  ;;  %v1685_v41 = vmul.f32 %v3205_v15, %v1665_v21  ;;  %v1666_v63 = vmax.f32 %v3145_v19, %v1615_v60 }
 0x1a8   : > { %v2371_v29 = vpop.f32.mrb[99].mxu1 }
 0x1a9   : > { %v3213_v62 = vadd.f32 %v2371_v29, %v2370_v2  ;;  %v1705_v6 = vadd.f32 %v3211_v56, %v1685_v41  ;;  %v1686_v59 = vmul.f32 %v3205_v15, %v1666_v63 }
 0x1aa   : > { %v1619_v13 = vpop.f32.mrb[88].mxu0 }
 0x1ab   : > { %v1706_v36 = vadd.f32 %v3211_v56, %v1686_v59  ;;  %v1620_v45 = vadd.f32 %v2357_v55, %v1619_v13  ;;  %v2506_v25 = vpop.f32.mrb[89].mxu0  ;;  %v1718_v48 = vmax.f32 %v1705_v6, 0.0 }
 0x1ac   : > { %v1622_v9 = vpop.f32.mrb[90].mxu0 }
 0x1ad   : > { %v2373_v18 = vpop.f32.mrb[100].mxu1  ;;  %v1719_v22 = vmax.f32 %v1706_v36, 0.0  ;;  %v1667_v19 = vmax.f32 %v3150_v10, %v1620_v45  ;;  %v1623_v24 = vadd.f32 %v2360_v58, %v1622_v9  ;;  %v2507_v35 = vpop.f32.mrb[91].mxu0 }
 0x1ae   : > { %v2374_v31 = vpop.f32.mrb[101].mxu1 }
 0x1af   : > { %v3221_v23 = vadd.f32 %v2374_v31, %v2373_v18  ;;  %v2376_v20 = vpop.f32.mrb[102].mxu1  ;;  %v2100_v61 = vpack.c.bf16 %v1719_v22, %v1718_v48  ;;  %v1687_v55 = vmul.f32 %v3205_v15, %v1667_v19  ;;  %v1668_v57 = vmax.f32 %v3155_v1, %v1623_v24 }
 0x1b0   : > { %v2377_v32 = vpop.f32.mrb[103].mxu1 }
 0x1b1   : > { %v3229_v5 = vadd.f32 %v2377_v32, %v2376_v20  ;;  %2101 = vst [vmem:[%s3227_s13] sm:$0xff] %v2100_v61   ;;  %v1707_v33 = vadd.f32 %v3211_v56, %v1687_v55  ;;  %v1688_v10 = vmul.f32 %v3205_v15, %v1668_v57 }
 0x1b2   : > { %v1627_v42 = vpop.f32.mrb[92].mxu0 }
 0x1b3   : > { %v1708_v58 = vadd.f32 %v3211_v56, %v1688_v10  ;;  %v1628_v43 = vadd.f32 %v2363_v11, %v1627_v42  ;;  %v2510_v49 = vpop.f32.mrb[93].mxu0  ;;  %v1720_v47 = vmax.f32 %v1707_v33, 0.0 }
 0x1b4   : > { %v1630_v7 = vpop.f32.mrb[94].mxu0 }
 0x1b5   : > { %v2379_v54 = vpop.f32.mrb[104].mxu1  ;;  %v1721_v44 = vmax.f32 %v1708_v58, 0.0  ;;  %v1669_v1 = vmax.f32 %v3160_v14, %v1628_v43  ;;  %v1631_v3 = vadd.f32 %v2366_v8, %v1630_v7  ;;  %v2511_v52 = vpop.f32.mrb[95].mxu0 }
 0x1b6   : > { %v2380_v17 = vpop.f32.mrb[105].mxu1 }
 0x1b7   : > { %v3237_v40 = vadd.f32 %v2380_v17, %v2379_v54  ;;  %v2382_v46 = vpop.f32.mrb[106].mxu1  ;;  %v2105_v12 = vpack.c.bf16 %v1721_v44, %v1720_v47  ;;  %v1689_v30 = vmul.f32 %v3205_v15, %v1669_v1  ;;  %v1670_v11 = vmax.f32 %v3165_v16, %v1631_v3 }
 0x1b8   : > { %v2383_v4 = vpop.f32.mrb[107].mxu1 }
 0x1b9   : > { %v2384_v51 = vadd.f32 %v2383_v4, %v2382_v46  ;;  %2127 = vst [vmem:[%s3227_s13 + $0x8] sm:$0xff] %v2105_v12   ;;  %v1709_v38 = vadd.f32 %v3211_v56, %v1689_v30  ;;  %v1690_v2 = vmul.f32 %v3205_v15, %v1670_v11 }
 0x1ba   : > { %v1635_v21 = vpop.f32.mrb[96].mxu0 }
 0x1bb   : > { %v1710_v34 = vadd.f32 %v3211_v56, %v1690_v2  ;;  %v1636_v14 = vadd.f32 %v2369_v26, %v1635_v21  ;;  %v2514_v8 = vpop.f32.mrb[97].mxu0  ;;  %v1722_v59 = vmax.f32 %v1709_v38, 0.0 }
 0x1bc   : > { %v1638_v41 = vpop.f32.mrb[98].mxu0 }
 0x1bd   : > { %v2385_v60 = vpop.f32.mrb[108].mxu1  ;;  %v1723_v13 = vmax.f32 %v1710_v34, 0.0  ;;  %v1671_v16 = vmax.f32 %v3170_v27, %v1636_v14  ;;  %v1639_v18 = vadd.f32 %v3213_v62, %v1638_v41  ;;  %v2515_v36 = vpop.f32.mrb[99].mxu0 }
 0x1be   : > { %v2386_v29 = vpop.f32.mrb[109].mxu1 }
 0x1bf   : > { %v2387_v63 = vadd.f32 %v2386_v29, %v2385_v60  ;;  %v2388_v6 = vpop.f32.mrb[110].mxu1  ;;  %v2110_v25 = vpack.c.bf16 %v1723_v13, %v1722_v59  ;;  %v1691_v31 = vmul.f32 %v3205_v15, %v1671_v16  ;;  %v1672_v9 = vmax.f32 %v3175_v28, %v1639_v18 }
 0x1c0   : > { %v2389_v45 = vpop.f32.mrb[111].mxu1 }
 0x1c1   : > { %2128 = vst [vmem:[%s3227_s13 + $0x10] sm:$0xff] %v2110_v25   ;;  %v1711_v26 = vadd.f32 %v3211_v56, %v1691_v31  ;;  %v1692_v20 = vmul.f32 %v3205_v15, %v1672_v9 }
 0x1c2   : > { %v1643_v22 = vpop.f32.mrb[100].mxu0 }
 0x1c3   : > { %v1712_v19 = vadd.f32 %v3211_v56, %v1692_v20  ;;  %v1644_v27 = vadd.f32 %v3221_v23, %v1643_v22  ;;  %v2518_v62 = vpop.f32.mrb[101].mxu0  ;;  %v1724_v32 = vmax.f32 %v1711_v26, 0.0 }
 0x1c4   : > { %v1646_v61 = vpop.f32.mrb[102].mxu0 }
 0x1c5   : > { %v1659_v48 = vpop.f32.mrb[112].mxu1  ;;  %v1725_v57 = vmax.f32 %v1712_v19, 0.0  ;;  %v1673_v33 = vmax.f32 %v3180_v37, %v1644_v27  ;;  %v1647_v10 = vadd.f32 %v3229_v5, %v1646_v61  ;;  %v2519_v42 = vpop.f32.mrb[103].mxu0 }
 0x1c6   : > { %v1660_v24 = vadd.f32 %v2387_v63, %v1659_v48  ;;  %v2526_v35 = vpop.f32.mrb[113].mxu1 }
 0x1c7   : > { %v1662_v55 = vpop.f32.mrb[114].mxu1  ;;  %v2115_v58 = vpack.c.bf16 %v1725_v57, %v1724_v32  ;;  %v1693_v23 = vmul.f32 %v3205_v15, %v1673_v33  ;;  %v1674_v49 = vmax.f32 %v3185_v39, %v1647_v10 }
 0x1c8   : > { %v1677_v28 = vmax.f32 %v3200_v0, %v1660_v24  ;;  %v2527_v54 = vpop.f32.mrb[115].mxu1 }
 0x1c9   : > { %2129 = vst [vmem:[%s3227_s13 + $0x18] sm:$0xff] %v2115_v58   ;;  %v1713_v7 = vadd.f32 %v3211_v56, %v1693_v23  ;;  %v1694_v0 = vmul.f32 %v3205_v15, %v1674_v49 }
 0x1ca   : > { %v1697_v43 = vmul.f32 %v3205_v15, %v1677_v28  ;;  %v1651_v37 = vpop.f32.mrb[104].mxu0 }
 0x1cb   : > { %v1714_v46 = vadd.f32 %v3211_v56, %v1694_v0  ;;  %v1652_v47 = vadd.f32 %v3237_v40, %v1651_v37  ;;  %v2522_v44 = vpop.f32.mrb[105].mxu0  ;;  %v1726_v1 = vmax.f32 %v1713_v7, 0.0 }
 0x1cc   : > { %v1717_v17 = vadd.f32 %v3211_v56, %v1697_v43  ;;  %v1654_v3 = vpop.f32.mrb[106].mxu0 }
 0x1cd   : > { %v1727_v39 = vmax.f32 %v1714_v46, 0.0  ;;  %v1675_v4 = vmax.f32 %v3190_v50, %v1652_v47  ;;  %v1655_v12 = vadd.f32 %v2384_v51, %v1654_v3  ;;  %v2523_v30 = vpop.f32.mrb[107].mxu0 }
 0x1ce   : > { %v1730_v5 = vmax.f32 %v1717_v17, 0.0 }
 0x1cf   : > { %v2120_v11 = vpack.c.bf16 %v1727_v39, %v1726_v1  ;;  %v1695_v38 = vmul.f32 %v3205_v15, %v1675_v4  ;;  %v1676_v2 = vmax.f32 %v3195_v53, %v1655_v12 }
 0x1d0   : > { %v2096_v52 = vpack.c.bf16 %v1730_v5, %v1730_v5 }
 0x1d1   : > { %2130 = vst [vmem:[%s3227_s13 + $0x20] sm:$0xff] %v2120_v11   ;;  %v1715_v21 = vadd.f32 %v3211_v56, %v1695_v38  ;;  %v1696_v40 = vmul.f32 %v3205_v15, %v1676_v2 }
 0x1d2   : > { %1796 = vst [vmem:[%s3227_s13 + $0x30] sm:$0x3] %v2096_v52 }
 0x1d3   : > { %v1716_v60 = vadd.f32 %v3211_v56, %v1696_v40  ;;  %v1728_v34 = vmax.f32 %v1715_v21, 0.0 }
 0x1d5   : > { %v1729_v14 = vmax.f32 %v1716_v60, 0.0 }
 0x1d7   : > { %v2125_v8 = vpack.c.bf16 %v1729_v14, %v1728_v34 }
 0x1d9   : > { %2131 = vst [vmem:[%s3227_s13 + $0x28] sm:$0xff] %v2125_v8  }
 0x1da PF: > { %s14_s15 = sadd.s32 1, %s2676_s15  }
 0x1db   : > { %p11_p4 = scmp.ge.s32.totalorder %s14_s15, 4  }
 0x1dd   :  { %13 = sbr.rel (!%p11_p4) target bundleno = 1 (0x1), region = 69 }

// kernel: cnn_encoder_forward.6
= control target key start
LH: loop header
LB: loop body
LE: loop exit
PB: predicated region body
PF: predicated region fallthrough
CT: control target
= control target key end

     0   :  { %s1664_s15 = smov 0   ;;  %s2069_s0 = inlined_call_operand.vmem [shape: bf16[2,4,16,576], index: 0, kind: input, shape index: {}]   ;;  %s2070_s1 = inlined_call_operand.vmem [shape: bf16[576,128], index: 1, kind: input, shape index: {}]   ;;  %s2071_s2 = inlined_call_operand.vmem [shape: f32[1,128], index: 2, kind: input, shape index: {}]   ;;  %s2072_s3 = inlined_call_operand.vmem [shape: f32[1,128], index: 3, kind: input, shape index: {}]   ;;  %s2073_s4 = inlined_call_operand.vmem [shape: bf16[2,16,128], index: 4, kind: output, shape index: {}]  }
   0x1 LB: > { %s1210_s16 = sadd.s32 4294967295, %s1635_s15   ;;  %p1214_p0 = scmp.ge.s32.totalorder %s1635_s15, 1  ;;  %s1635_s15 = sphi %s1664_s15, %s14_s15  }
   0x2   : > { %p162_p1 = scmp.lt.s32.totalorder %s1635_s15, 3 }
   0x4   : > { %p163_p2 = pnand %p1214_p0, %p162_p1 }
   0x5   : > { %v1675_v0 = vld [vmem:[%s2070_s1 + $0x40] sm:$0xff] (!%p163_p2)   ;;  %v1698_v4 = vld [vmem:[%s2070_s1 + $0x48] sm:$0xff] (!%p163_p2)   ;;  %v1722_v8 = vld [vmem:[%s2070_s1 + $0x50] sm:$0xff] (!%p163_p2)   ;;  %p188_p3 = scmp.lt.s32.totalorder (!%p163_p2), %s1210_s16, 1  ;;  %v1637_v34 = vmov (!%p163_p2), 0.0   ;;  %vm1638_vm0 = vmmov (!%p163_p2), 0  }
   0x6   : > { %166 = sbr.rel (%p163_p2) target bundleno = 399 (0x18f), region = 36  ;;  %v1680_v1 = vld [vmem:[%s2070_s1 + $0xc0] sm:$0xff] (!%p163_p2)   ;;  %1310 = vmatprep.subr.bf16.mxu0 (!%p163_p2), %v1675_v0  ;;  %v1704_v5 = vld [vmem:[%s2070_s1 + $0xc8] sm:$0xff] (!%p163_p2)   ;;  %v1728_v9 = vld [vmem:[%s2070_s1 + $0xd0] sm:$0xff] (!%p163_p2)   ;;  %vm518_vm1 = vcmask (!%p163_p2), 523264  }
   0x7   : > { %v1686_v2 = vld [vmem:[%s2070_s1] sm:$0xff] (!%p163_p2)   ;;  %1332 = vmatprep.subr.bf16.mxu1 (!%p163_p2), %v1680_v1  ;;  %v1710_v6 = vld [vmem:[%s2070_s1 + $0x8] sm:$0xff] (!%p163_p2)   ;;  %v1734_v10 = vld [vmem:[%s2070_s1 + $0x10] sm:$0xff] (!%p163_p2)  }
   0x8   : > { %v1692_v3 = vld [vmem:[%s2070_s1 + $0x80] sm:$0xff] (!%p163_p2)   ;;  %1311 = vmatpush3.bf16.msra.mxu0 (!%p163_p2), %v1686_v2  ;;  %v1716_v7 = vld [vmem:[%s2070_s1 + $0x88] sm:$0xff] (!%p163_p2)   ;;  %v1740_v11 = vld [vmem:[%s2070_s1 + $0x90] sm:$0xff] (!%p163_p2)  }
   0x9   : > { %1333 = vmatpush3.bf16.msra.mxu1 (!%p163_p2), %v1692_v3  ;;  %1312 = vmatprep.subr.bf16.mxu0 (!%p163_p2), %v1698_v4  ;;  %v1746_v12 = vld [vmem:[%s2070_s1 + $0x58] sm:$0xff] (!%p163_p2)   ;;  %v1770_v16 = vld [vmem:[%s2070_s1 + $0x60] sm:$0xff] (!%p163_p2)   ;;  %v1796_v20 = vld [vmem:[%s2070_s1 + $0x68] sm:$0xff] (!%p163_p2)  }
   0xa   : > { %1334 = vmatprep.subr.bf16.mxu1 (!%p163_p2), %v1704_v5  ;;  %v1752_v13 = vld [vmem:[%s2070_s1 + $0xd8] sm:$0xff] (!%p163_p2)   ;;  %v1776_v17 = vld [vmem:[%s2070_s1 + $0xe0] sm:$0xff] (!%p163_p2)   ;;  %v1802_v21 = vld [vmem:[%s2070_s1 + $0xe8] sm:$0xff] (!%p163_p2)  }
   0xb   : > { %v1758_v14 = vld [vmem:[%s2070_s1 + $0x18] sm:$0xff] (!%p163_p2)   ;;  %v1784_v18 = vld [vmem:[%s2070_s1 + $0x20] sm:$0xff] (!%p163_p2)   ;;  %v1812_v22 = vld [vmem:[%s2070_s1 + $0x28] sm:$0xff] (!%p163_p2)  }
   0xc   : > { %1313 = vmatpush3.bf16.msra.mxu0 (!%p163_p2), %v1710_v6  ;;  %v1764_v15 = vld [vmem:[%s2070_s1 + $0x98] sm:$0xff] (!%p163_p2)   ;;  %v1790_v19 = vld [vmem:[%s2070_s1 + $0xa0] sm:$0xff] (!%p163_p2)   ;;  %v1818_v23 = vld [vmem:[%s2070_s1 + $0xa8] sm:$0xff] (!%p163_p2)  }
   0xd   : > { %1335 = vmatpush3.bf16.msra.mxu1 %v1716_v7  ;;  %1314 = vmatprep.subr.bf16.mxu0 %v1722_v8  ;;  %s2075_s16 = smov (!%p188_p3, %s1210_s16), 1  ;;  %v1824_v24 = vld [vmem:[%s2070_s1 + $0x70] sm:$0xff]   ;;  %v1849_v28 = vld [vmem:[%s2070_s1 + $0x78] sm:$0xff]   ;;  %v1885_v37 = vld [vmem:[%s2070_s1 + $0x100] sm:$0xff]  }
   0xe   : > { %1336 = vmatprep.subr.bf16.mxu1 %v1728_v9  ;;  %v1830_v25 = vld [vmem:[%s2070_s1 + $0xf0] sm:$0xff]   ;;  %s1554_s21 = smul.u32 160, %s2075_s16  ;;  %v1855_v29 = vld [vmem:[%s2070_s1 + $0xf8] sm:$0xff]   ;;  %v1891_v38 = vld [vmem:[%s2070_s1 + $0x108] sm:$0xff]   ;;  %s1302_s25 = sshll.u32 %s2075_s16, 3 }
   0xf   : > { %v1837_v26 = vld [vmem:[%s2070_s1 + $0x30] sm:$0xff]   ;;  %v1866_v30 = vld [vmem:[%s2070_s1 + $0x38] sm:$0xff]   ;;  %s197_s28 = scalar_lea.vmem %s2073_s4, %s1302_s25 }
  0x10   : > { %1315 = vmatpush3.bf16.msra.mxu0 %v1734_v10  ;;  %v1843_v27 = vld [vmem:[%s2070_s1 + $0xb0] sm:$0xff]   ;;  %s1860_s6 = scalar_lea.vmem %s2069_s0, %s1554_s21  ;;  %v1872_v31 = vld [vmem:[%s2070_s1 + $0xb8] sm:$0xff]  }
  0x11   : > { %1337 = vmatpush3.bf16.msra.mxu1 %v1740_v11  ;;  %1316 = vmatprep.subr.bf16.mxu0 %v1746_v12  ;;  %v1597_v32 = vld [vmem:[%s1860_s6] ss:$20 sps:$4 sm:$0xff]   ;;  %v1599_v33 = vld [vmem:[%s1860_s6 + $0x4] ss:$20 sps:$4 sm:$0xff]   ;;  %v1600_v35 = vld [vmem:[%s1860_s6 + $0x8] ss:$20 sps:$4 sm:$0xff]  }
  0x12   : > { %1338 = vmatprep.subr.bf16.mxu1 %v1752_v13  ;;  %v1602_v36 = vld [vmem:[%s1860_s6 + $0xc] ss:$20 sps:$4 sm:$0xff]   ;;  %554 = vmatprep.mubr.bf16.mxu0 %v1599_v33  ;;  %v1903_v40 = vld [vmem:[%s2070_s1 + $0x110] sm:$0xff]   ;;  %v1912_v41 = vld [vmem:[%s2070_s1 + $0x118] sm:$0xff]  }
  0x13   : > { %595 = vmatprep.mubr.bf16.mxu1 %v1602_v36  ;;  %v1610_v39 = vld [vmem:[%s1860_s6 + $0x2c] ss:$20 sps:$4 sm:$0xff]   ;;  %v1607_v42 = vld [vmem:[%s1860_s6 + $0x10] ss:$20 sps:$4 sm:$0xff]   ;;  %v1613_v43 = vld [vmem:[%s1860_s6 + $0x34] ss:$20 sps:$4 sm:$0xff]  }
  0x14   : > { %1317 = vmatpush3.bf16.msra.mxu0 %v1758_v14  ;;  %v1608_v44 = vld [vmem:[%s1860_s6 + $0x28] ss:$20 sps:$4 sm:$0xff]   ;;  %v1611_v45 = vld [vmem:[%s1860_s6 + $0x30] ss:$20 sps:$4 sm:$0xff]   ;;  %v1614_v46 = vld [vmem:[%s1860_s6 + $0x38] ss:$20 sps:$4 sm:$0xff]  }
  0x15   : > { %1339 = vmatpush3.bf16.msra.mxu1 %v1764_v15  ;;  %1318 = vmatprep.subr.bf16.mxu0 %v1770_v16  ;;  %v1617_v47 = vld [vmem:[%s1860_s6 + $0x54] ss:$20 sps:$4 sm:$0xff]   ;;  %v1620_v48 = vld [vmem:[%s1860_s6 + $0x5c] ss:$20 sps:$4 sm:$0xff]   ;;  %v1618_v50 = vld [vmem:[%s1860_s6 + $0x58] ss:$20 sps:$4 sm:$0xff]  }
  0x16   : > { %1340 = vmatprep.subr.bf16.mxu1 %v1776_v17  ;;  %v1615_v49 = vld [vmem:[%s1860_s6 + $0x50] ss:$20 sps:$4 sm:$0xff]   ;;  %v1621_v52 = vld [vmem:[%s1860_s6 + $0x60] ss:$20 sps:$4 sm:$0xff]   ;;  %v1622_v54 = vld [vmem:[%s1860_s6 + $0x78] ss:$20 sps:$4 sm:$0xff]  }
  0x17   : > { %v1624_v51 = vld [vmem:[%s1860_s6 + $0x7c] ss:$20 sps:$4 sm:$0xff]   ;;  %v1627_v53 = vld [vmem:[%s1860_s6 + $0x84] ss:$20 sps:$4 sm:$0xff]   ;;  %v1625_v55 = vld [vmem:[%s1860_s6 + $0x80] ss:$20 sps:$4 sm:$0xff]  }
  0x18   : > { %1319 = vmatpush3.bf16.msra.mxu0 %v1784_v18  ;;  %v1628_v56 = vld [vmem:[%s1860_s6 + $0x88] ss:$20 sps:$4 sm:$0xff]  }
  0x19   : > { %1341 = vmatpush3.bf16.msra.mxu1 %v1790_v19  ;;  %1320 = vmatprep.subr.bf16.mxu0 %v1796_v20 }
  0x1a   : > { %1342 = vmatprep.subr.bf16.mxu1 %v1802_v21 }
  0x1c   : > { %1321 = vmatpush3.bf16.msra.mxu0 %v1812_v22 }
  0x1d   : > { %1343 = vmatpush3.bf16.msra.mxu1 %v1818_v23  ;;  %1322 = vmatprep.subr.bf16.mxu0 %v1824_v24 }
  0x1e   : > { %1344 = vmatprep.subr.bf16.mxu1 %v1830_v25 }
  0x20   : > { %1323 = vmatpush3.bf16.msra.mxu0 %v1837_v26 }
  0x21   : > { %1345 = vmatpush3.bf16.msra.mxu1 %v1843_v27  ;;  %1324 = vmatprep.subr.bf16.mxu0 %v1849_v28 }
  0x22   : > { %1346 = vmatprep.subr.bf16.mxu1 %v1855_v29 }
  0x24   : > { %1325 = vmatpush3.bf16.msra.mxu0 %v1866_v30 }
  0x25   : > { %1347 = vmatpush3.bf16.msra.mxu1 %v1872_v31  ;;  %1506 = vmatprep.subr.bf16.mxu0 %v1637_v34 }
  0x26   : > { %1359 = vmatprep.subr.bf16.mxu1 %v1675_v0 }
  0x27   : > { %555 = vmatmul.mubr.bf16.vlgmr.msra.gmra.mrb[0].mxu0 %v1597_v32 }
  0x28   : > { %596 = vmatmul.mubr.bf16.vlgmr.msra.gmra.mrb[0].mxu1 %v1600_v35  ;;  %1507 = vmatpush3.bf16.msra.mxu0 %v1885_v37 }
  0x29   : > { %1360 = vmatpush3.bf16.msra.mxu1 %v1686_v2  ;;  %1508 = vmatprep.subr.bf16.mxu0 %v1637_v34 }
  0x2a   : > { %1361 = vmatprep.subr.bf16.mxu1 %v1698_v4  ;;  %1514 = vmatprep.mubr.msk.bf16.mxu0 %vm1638_vm0, %v1637_v34 }
  0x2b   : > { %712 = vmatprep.mubr.bf16.mxu1 %v1610_v39 }
  0x2c   : > { %1509 = vmatpush3.bf16.msra.mxu0 %v1891_v38 }
  0x2d   : > { %1362 = vmatpush3.bf16.msra.mxu1 %v1710_v6  ;;  %1510 = vmatprep.subr.bf16.mxu0 %v1637_v34 }
  0x2e   : > { %1363 = vmatprep.subr.bf16.mxu1 %v1722_v8 }
  0x30   : > { %1511 = vmatpush3.bf16.msra.mxu0 %v1903_v40 }
  0x31   : > { %1364 = vmatpush3.bf16.msra.mxu1 %v1734_v10  ;;  %1512 = vmatprep.subr.bf16.mxu0 %v1637_v34 }
  0x32   : > { %1365 = vmatprep.subr.bf16.mxu1 %v1746_v12 }
  0x34   : > { %1513 = vmatpush3.bf16.msra.mxu0 %v1912_v41 }
  0x35   : > { %1366 = vmatpush3.bf16.msra.mxu1 %v1758_v14  ;;  %1381 = vmatprep.subr.bf16.mxu0 %v1680_v1 }
  0x36   : > { %1367 = vmatprep.subr.bf16.mxu1 %v1770_v16 }
  0x37   : > { %1515 = vmatmul.mubr.msk.bf16.vlgmr.msra.gmra.mrb[4].mxu0 %vm518_vm1, %v1607_v42 }
  0x38   : > { %1382 = vmatpush3.bf16.msra.mxu0 %v1692_v3  ;;  %753 = vmatprep.mubr.bf16.mxu0 %v1613_v43 }
  0x39   : > { %1368 = vmatpush3.bf16.msra.mxu1 %v1784_v18  ;;  %1383 = vmatprep.subr.bf16.mxu0 %v1704_v5 }
  0x3a   : > { %1369 = vmatprep.subr.bf16.mxu1 %v1796_v20 }
  0x3c   : > { %1384 = vmatpush3.bf16.msra.mxu0 %v1716_v7 }
  0x3d   : > { %1370 = vmatpush3.bf16.msra.mxu1 %v1812_v22  ;;  %1385 = vmatprep.subr.bf16.mxu0 %v1728_v9 }
  0x3e   : > { %1371 = vmatprep.subr.bf16.mxu1 %v1824_v24 }
  0x40   : > { %1386 = vmatpush3.bf16.msra.mxu0 %v1740_v11 }
  0x41   : > { %1372 = vmatpush3.bf16.msra.mxu1 %v1837_v26  ;;  %1387 = vmatprep.subr.bf16.mxu0 %v1752_v13 }
  0x42   : > { %1373 = vmatprep.subr.bf16.mxu1 %v1849_v28 }
  0x44   : > { %1388 = vmatpush3.bf16.msra.mxu0 %v1764_v15 }
  0x45   : > { %1374 = vmatpush3.bf16.msra.mxu1 %v1866_v30  ;;  %1389 = vmatprep.subr.bf16.mxu0 %v1776_v17 }
  0x46   : > { %1518 = vmatprep.subr.bf16.mxu1 %v1637_v34 }
  0x48   : > { %713 = vmatmul.mubr.bf16.vlgmr.msra.gmra.mrb[4].mxu1 %v1608_v44  ;;  %1390 = vmatpush3.bf16.msra.mxu0 %v1790_v19 }
  0x49   : > { %1519 = vmatpush3.bf16.msra.mxu1 %v1885_v37  ;;  %1391 = vmatprep.subr.bf16.mxu0 %v1802_v21 }
  0x4a   : > { %1520 = vmatprep.subr.bf16.mxu1 %v1637_v34  ;;  %1526 = vmatprep.mubr.msk.bf16.mxu1 %vm1638_vm0, %v1637_v34 }
  0x4c   : > { %1392 = vmatpush3.bf16.msra.mxu0 %v1818_v23 }
  0x4d   : > { %1521 = vmatpush3.bf16.msra.mxu1 %v1891_v38  ;;  %1393 = vmatprep.subr.bf16.mxu0 %v1830_v25 }
  0x4e   : > { %1522 = vmatprep.subr.bf16.mxu1 %v1637_v34 }
  0x50   : > { %1394 = vmatpush3.bf16.msra.mxu0 %v1843_v27 }
  0x51   : > { %1523 = vmatpush3.bf16.msra.mxu1 %v1903_v40  ;;  %1395 = vmatprep.subr.bf16.mxu0 %v1855_v29 }
  0x52   : > { %1524 = vmatprep.subr.bf16.mxu1 %v1637_v34 }
  0x54   : > { %1396 = vmatpush3.bf16.msra.mxu0 %v1872_v31 }
  0x55   : > { %1525 = vmatpush3.bf16.msra.mxu1 %v1912_v41  ;;  %1408 = vmatprep.subr.bf16.mxu0 %v1675_v0 }
  0x56   : > { %1430 = vmatprep.subr.bf16.mxu1 %v1680_v1 }
  0x57   : > { %754 = vmatmul.mubr.bf16.vlgmr.msra.gmra.mrb[8].mxu0 %v1611_v45 }
  0x58   : > { %1527 = vmatmul.mubr.msk.bf16.vlgmr.msra.gmra.mrb[8].mxu1 %vm518_vm1, %v1614_v46  ;;  %1409 = vmatpush3.bf16.msra.mxu0 %v1686_v2 }
  0x59   : > { %1431 = vmatpush3.bf16.msra.mxu1 %v1692_v3  ;;  %1410 = vmatprep.subr.bf16.mxu0 %v1698_v4 }
  0x5a   : > { %1432 = vmatprep.subr.bf16.mxu1 %v1704_v5  ;;  %872 = vmatprep.mubr.bf16.mxu0 %v1617_v47 }
  0x5b   : > { %913 = vmatprep.mubr.bf16.mxu1 %v1620_v48 }
  0x5c   : > { %1411 = vmatpush3.bf16.msra.mxu0 %v1710_v6 }
  0x5d   : > { %1433 = vmatpush3.bf16.msra.mxu1 %v1716_v7  ;;  %1412 = vmatprep.subr.bf16.mxu0 %v1722_v8 }
  0x5e   : > { %1434 = vmatprep.subr.bf16.mxu1 %v1728_v9 }
  0x60   : > { %1413 = vmatpush3.bf16.msra.mxu0 %v1734_v10 }
  0x61   : > { %1435 = vmatpush3.bf16.msra.mxu1 %v1740_v11  ;;  %1414 = vmatprep.subr.bf16.mxu0 %v1746_v12 }
  0x62   : > { %1436 = vmatprep.subr.bf16.mxu1 %v1752_v13 }
  0x64   : > { %1415 = vmatpush3.bf16.msra.mxu0 %v1758_v14 }
  0x65   : > { %1437 = vmatpush3.bf16.msra.mxu1 %v1764_v15  ;;  %1416 = vmatprep.subr.bf16.mxu0 %v1770_v16 }
  0x66   : > { %1438 = vmatprep.subr.bf16.mxu1 %v1776_v17 }
  0x68   : > { %1417 = vmatpush3.bf16.msra.mxu0 %v1784_v18 }
  0x69   : > { %1439 = vmatpush3.bf16.msra.mxu1 %v1790_v19  ;;  %1418 = vmatprep.subr.bf16.mxu0 %v1796_v20 }
  0x6a   : > { %1440 = vmatprep.subr.bf16.mxu1 %v1802_v21 }
  0x6c   : > { %1419 = vmatpush3.bf16.msra.mxu0 %v1812_v22 }
  0x6d   : > { %1441 = vmatpush3.bf16.msra.mxu1 %v1818_v23  ;;  %1420 = vmatprep.subr.bf16.mxu0 %v1824_v24 }
  0x6e   : > { %1442 = vmatprep.subr.bf16.mxu1 %v1830_v25 }
  0x70   : > { %1421 = vmatpush3.bf16.msra.mxu0 %v1837_v26 }
  0x71   : > { %1443 = vmatpush3.bf16.msra.mxu1 %v1843_v27  ;;  %1422 = vmatprep.subr.bf16.mxu0 %v1849_v28 }
  0x72   : > { %1444 = vmatprep.subr.bf16.mxu1 %v1855_v29 }
  0x74   : > { %1423 = vmatpush3.bf16.msra.mxu0 %v1866_v30 }
  0x75   : > { %1445 = vmatpush3.bf16.msra.mxu1 %v1872_v31  ;;  %1530 = vmatprep.subr.bf16.mxu0 %v1637_v34 }
  0x76   : > { %1457 = vmatprep.subr.bf16.mxu1 %v1675_v0 }
  0x77   : > { %873 = vmatmul.mubr.bf16.vlgmr.msra.gmra.mrb[12].mxu0 %v1615_v49 }
  0x78   : > { %914 = vmatmul.mubr.bf16.vlgmr.msra.gmra.mrb[12].mxu1 %v1618_v50  ;;  %1531 = vmatpush3.bf16.msra.mxu0 %v1885_v37 }
  0x79   : > { %1458 = vmatpush3.bf16.msra.mxu1 %v1686_v2  ;;  %1532 = vmatprep.subr.bf16.mxu0 %v1637_v34 }
  0x7a   : > { %1459 = vmatprep.subr.bf16.mxu1 %v1698_v4  ;;  %1538 = vmatprep.mubr.msk.bf16.mxu0 %vm1638_vm0, %v1637_v34 }
  0x7b   : > { %1032 = vmatprep.mubr.bf16.mxu1 %v1624_v51 }
  0x7c   : > { %1533 = vmatpush3.bf16.msra.mxu0 %v1891_v38 }
  0x7d   : > { %1460 = vmatpush3.bf16.msra.mxu1 %v1710_v6  ;;  %1534 = vmatprep.subr.bf16.mxu0 %v1637_v34 }
  0x7e   : > { %1461 = vmatprep.subr.bf16.mxu1 %v1722_v8 }
  0x80   : > { %1535 = vmatpush3.bf16.msra.mxu0 %v1903_v40 }
  0x81   : > { %1462 = vmatpush3.bf16.msra.mxu1 %v1734_v10  ;;  %1536 = vmatprep.subr.bf16.mxu0 %v1637_v34 }
  0x82   : > { %1463 = vmatprep.subr.bf16.mxu1 %v1746_v12 }
  0x84   : > { %1537 = vmatpush3.bf16.msra.mxu0 %v1912_v41 }
  0x85   : > { %1464 = vmatpush3.bf16.msra.mxu1 %v1758_v14  ;;  %1479 = vmatprep.subr.bf16.mxu0 %v1680_v1 }
  0x86   : > { %1465 = vmatprep.subr.bf16.mxu1 %v1770_v16 }
  0x87   : > { %1539 = vmatmul.mubr.msk.bf16.vlgmr.msra.gmra.mrb[16].mxu0 %vm518_vm1, %v1621_v52 }
  0x88   : > { %1480 = vmatpush3.bf16.msra.mxu0 %v1692_v3  ;;  %1073 = vmatprep.mubr.bf16.mxu0 %v1627_v53 }
  0x89   : > { %1466 = vmatpush3.bf16.msra.mxu1 %v1784_v18  ;;  %1481 = vmatprep.subr.bf16.mxu0 %v1704_v5 }
  0x8a   : > { %1467 = vmatprep.subr.bf16.mxu1 %v1796_v20 }
  0x8c   : > { %1482 = vmatpush3.bf16.msra.mxu0 %v1716_v7 }
  0x8d   : > { %1468 = vmatpush3.bf16.msra.mxu1 %v1812_v22  ;;  %1483 = vmatprep.subr.bf16.mxu0 %v1728_v9 }
  0x8e   : > { %1469 = vmatprep.subr.bf16.mxu1 %v1824_v24 }
  0x90   : > { %1484 = vmatpush3.bf16.msra.mxu0 %v1740_v11 }
  0x91   : > { %1470 = vmatpush3.bf16.msra.mxu1 %v1837_v26  ;;  %1485 = vmatprep.subr.bf16.mxu0 %v1752_v13 }
  0x92   : > { %1471 = vmatprep.subr.bf16.mxu1 %v1849_v28 }
  0x94   : > { %1486 = vmatpush3.bf16.msra.mxu0 %v1764_v15 }
  0x95   : > { %1472 = vmatpush3.bf16.msra.mxu1 %v1866_v30  ;;  %1487 = vmatprep.subr.bf16.mxu0 %v1776_v17 }
  0x96   : > { %1542 = vmatprep.subr.bf16.mxu1 %v1637_v34 }
  0x98   : > { %1488 = vmatpush3.bf16.msra.mxu0 %v1790_v19  ;;  %1033 = vmatmul.mubr.bf16.vlgmr.msra.gmra.mrb[16].mxu1 %v1622_v54 }
  0x99   : > { %1543 = vmatpush3.bf16.msra.mxu1 %v1885_v37  ;;  %1489 = vmatprep.subr.bf16.mxu0 %v1802_v21 }
  0x9a   : > { %1544 = vmatprep.subr.bf16.mxu1 %v1637_v34  ;;  %1550 = vmatprep.mubr.msk.bf16.mxu1 %vm1638_vm0, %v1637_v34 }
  0x9c   : > { %1490 = vmatpush3.bf16.msra.mxu0 %v1818_v23 }
  0x9d   : > { %1545 = vmatpush3.bf16.msra.mxu1 %v1891_v38  ;;  %1491 = vmatprep.subr.bf16.mxu0 %v1830_v25 }
  0x9e   : > { %1546 = vmatprep.subr.bf16.mxu1 %v1637_v34 }
  0xa0   : > { %1492 = vmatpush3.bf16.msra.mxu0 %v1843_v27 }
  0xa1   : > { %1547 = vmatpush3.bf16.msra.mxu1 %v1903_v40  ;;  %1493 = vmatprep.subr.bf16.mxu0 %v1855_v29 }
  0xa2   : > { %1548 = vmatprep.subr.bf16.mxu1 %v1637_v34 }
  0xa4   : > { %1494 = vmatpush3.bf16.msra.mxu0 %v1872_v31 }
  0xa5   : > { %1549 = vmatpush3.bf16.msra.mxu1 %v1912_v41 }
  0xa7   : > { %1074 = vmatmul.mubr.bf16.vlgmr.msra.gmra.mrb[20].mxu0 %v1625_v55 }
  0xa8   : > { %1551 = vmatmul.mubr.msk.bf16.vlgmr.msra.gmra.mrb[20].mxu1 %vm518_vm1, %v1628_v56 }
  0xfa   : > { %v1326_v57 = vpop.f32.mrb[0].mxu0 }
  0xfb   : > { %v1348_v58 = vpop.f32.mrb[0].mxu1  ;;  %v1327_v59 = vpop.f32.mrb[1].mxu0 }
  0xfc   : > { %v1328_v60 = vadd.f32 %v1327_v59, %v1326_v57  ;;  %v1349_v61 = vpop.f32.mrb[1].mxu1  ;;  %v1329_v62 = vpop.f32.mrb[2].mxu0 }
  0xfd   : > { %v1350_v63 = vadd.f32 %v1349_v61, %v1348_v58  ;;  %v1351_v0 = vpop.f32.mrb[2].mxu1  ;;  %v1330_v1 = vpop.f32.mrb[3].mxu0 }
  0xfe   : > { %v1331_v2 = vadd.f32 %v1330_v1, %v1329_v62  ;;  %v1352_v3 = vpop.f32.mrb[3].mxu1 }
  0xff   : > { %v1353_v4 = vadd.f32 %v1352_v3, %v1351_v0  ;;  %v598_v5 = vadd.f32 %v1350_v63, %v1328_v60 }
 0x101   : > { %v601_v6 = vadd.f32 %v1353_v4, %v1331_v2 }
 0x10a   : > { %v638_v7 = vpop.f32.mrb[4].mxu0 }
 0x10b   : > { %v639_v8 = vadd.f32 %v638_v7, %v598_v5  ;;  %v1516_v9 = vpop.f32.mrb[5].mxu0 }
 0x10c   : > { %v641_v10 = vpop.f32.mrb[6].mxu0 }
 0x10d   : > { %v642_v11 = vadd.f32 %v641_v10, %v601_v6  ;;  %v1517_v12 = vpop.f32.mrb[7].mxu0 }
 0x10e   : > { %v1296_v12 = vld [vmem:[%s2071_s2] ss:$0 sm:$0xff] }
 0x11b   : > { %v1375_v13 = vpop.f32.mrb[4].mxu1 }
 0x11c   : > { %v1376_v14 = vpop.f32.mrb[5].mxu1 }
 0x11d   : > { %v1377_v15 = vadd.f32 %v1376_v14, %v1375_v13  ;;  %v1378_v16 = vpop.f32.mrb[6].mxu1 }
 0x11e   : > { %v1379_v17 = vpop.f32.mrb[7].mxu1 }
 0x11f   : > { %v1380_v18 = vadd.f32 %v1379_v17, %v1378_v16 }
 0x12a   : > { %v1397_v19 = vpop.f32.mrb[8].mxu0 }
 0x12b   : > { %v1398_v20 = vpop.f32.mrb[9].mxu0  ;;  %v796_v21 = vpop.f32.mrb[8].mxu1 }
 0x12c   : > { %v1399_v22 = vadd.f32 %v1398_v20, %v1397_v19  ;;  %v1400_v23 = vpop.f32.mrb[10].mxu0  ;;  %v1528_v24 = vpop.f32.mrb[9].mxu1 }
 0x12d   : > { %v1401_v25 = vpop.f32.mrb[11].mxu0  ;;  %v799_v26 = vpop.f32.mrb[10].mxu1 }
 0x12e   : > { %v1402_v27 = vadd.f32 %v1401_v25, %v1400_v23  ;;  %v756_v28 = vadd.f32 %v1399_v22, %v1377_v15  ;;  %v1529_v29 = vpop.f32.mrb[11].mxu1  ;;  %v1297_v15 = vld [vmem:[%s2072_s3] ss:$0 sm:$0xff] }
 0x130   : > { %v797_v30 = vadd.f32 %v796_v21, %v756_v28  ;;  %v759_v31 = vadd.f32 %v1402_v27, %v1380_v18 }
 0x132   : > { %v803_v32 = vmax.f32 %v639_v8, %v797_v30  ;;  %v800_v33 = vadd.f32 %v799_v26, %v759_v31 }
 0x134   : > { %v804_v34 = vmax.f32 %v642_v11, %v800_v33 }
 0x14a   : > { %v1424_v35 = vpop.f32.mrb[12].mxu0 }
 0x14b   : > { %v1446_v36 = vpop.f32.mrb[12].mxu1  ;;  %v1425_v37 = vpop.f32.mrb[13].mxu0 }
 0x14c   : > { %v1426_v38 = vadd.f32 %v1425_v37, %v1424_v35  ;;  %v1447_v39 = vpop.f32.mrb[13].mxu1  ;;  %v1427_v40 = vpop.f32.mrb[14].mxu0 }
 0x14d   : > { %v1448_v41 = vadd.f32 %v1447_v39, %v1446_v36  ;;  %v1449_v42 = vpop.f32.mrb[14].mxu1  ;;  %v1428_v43 = vpop.f32.mrb[15].mxu0 }
 0x14e   : > { %v1429_v44 = vadd.f32 %v1428_v43, %v1427_v40  ;;  %v1450_v45 = vpop.f32.mrb[15].mxu1 }
 0x14f   : > { %v1451_v46 = vadd.f32 %v1450_v45, %v1449_v42  ;;  %v916_v47 = vadd.f32 %v1448_v41, %v1426_v38 }
 0x151   : > { %v919_v48 = vadd.f32 %v1451_v46, %v1429_v44 }
 0x15a   : > { %v956_v49 = vpop.f32.mrb[16].mxu0 }
 0x15b   : > { %v957_v50 = vadd.f32 %v956_v49, %v916_v47  ;;  %v1540_v51 = vpop.f32.mrb[17].mxu0 }
 0x15c   : > { %v959_v52 = vpop.f32.mrb[18].mxu0 }
 0x15d   : > { %v963_v53 = vmax.f32 %v803_v32, %v957_v50  ;;  %v960_v54 = vadd.f32 %v959_v52, %v919_v48  ;;  %v1541_v55 = vpop.f32.mrb[19].mxu0 }
 0x15f   : > { %v964_v56 = vmax.f32 %v804_v34, %v960_v54 }
 0x16b   : > { %v1473_v57 = vpop.f32.mrb[16].mxu1 }
 0x16c   : > { %v1474_v58 = vpop.f32.mrb[17].mxu1 }
 0x16d   : > { %v1475_v59 = vadd.f32 %v1474_v58, %v1473_v57  ;;  %v1476_v60 = vpop.f32.mrb[18].mxu1 }
 0x16e   : > { %v1477_v61 = vpop.f32.mrb[19].mxu1 }
 0x16f   : > { %v1478_v62 = vadd.f32 %v1477_v61, %v1476_v60 }
 0x17a   : > { %v1495_v63 = vpop.f32.mrb[20].mxu0 }
 0x17b   : > { %v1496_v0 = vpop.f32.mrb[21].mxu0  ;;  %v1116_v1 = vpop.f32.mrb[20].mxu1 }
 0x17c   : > { %v1497_v2 = vadd.f32 %v1496_v0, %v1495_v63  ;;  %v1498_v3 = vpop.f32.mrb[22].mxu0  ;;  %v1552_v4 = vpop.f32.mrb[21].mxu1 }
 0x17d   : > { %v1499_v5 = vpop.f32.mrb[23].mxu0  ;;  %v1119_v6 = vpop.f32.mrb[22].mxu1 }
 0x17e   : > { %v1076_v7 = vadd.f32 %v1497_v2, %v1475_v59  ;;  %v1500_v8 = vadd.f32 %v1499_v5, %v1498_v3  ;;  %v1553_v9 = vpop.f32.mrb[23].mxu1 }
 0x180   : > { %v1117_v10 = vadd.f32 %v1116_v1, %v1076_v7  ;;  %v1079_v11 = vadd.f32 %v1500_v8, %v1478_v62 }
 0x182   : > { %v1123_v13 = vmax.f32 %v963_v53, %v1117_v10  ;;  %v1120_v14 = vadd.f32 %v1119_v6, %v1079_v11 }
 0x184   : > { %v1132_v16 = vmul.f32 %v1296_v12, %v1123_v13  ;;  %v1124_v17 = vmax.f32 %v964_v56, %v1120_v14 }
 0x186   : > { %v1141_v18 = vadd.f32 %v1297_v15, %v1132_v16  ;;  %v1133_v19 = vmul.f32 %v1296_v12, %v1124_v17 }
 0x188   : > { %v1142_v20 = vadd.f32 %v1297_v15, %v1133_v19  ;;  %v1143_v21 = vmax.f32 %v1141_v18, 0.0 }
 0x18a   : > { %v1144_v22 = vmax.f32 %v1142_v20, 0.0 }
 0x18c   : > { %v1308_v23 = vpack.c.bf16 %v1144_v22, %v1143_v21 }
 0x18e   : > { %1309 = vst [vmem:[%s197_s28] sm:$0xff] %v1308_v23  }
 0x18f PF: > { %s14_s15 = sadd.s32 1, %s1635_s15  }
 0x190   : > { %p11_p4 = scmp.ge.s32.totalorder %s14_s15, 4  }
 0x192   :  { %13 = sbr.rel (!%p11_p4) target bundleno = 1 (0x1), region = 69 }

// kernel: cnn_encoder_forward.7
= control target key start
LH: loop header
LB: loop body
LE: loop exit
PB: predicated region body
PF: predicated region fallthrough
CT: control target
= control target key end

     0   :  { %v2094_v21 = vmov 1966171168   ;;  %v304_v23 = vlaneseq  ;;  %vm2096_vm0 = vmmov 0   ;;  %s2565_s1 = inlined_call_operand.vmem [shape: bf16[2176,128], index: 1, kind: input, shape index: {}]   ;;  %s2566_s0 = inlined_call_operand.vmem [shape: bf16[2,2176], index: 0, kind: input, shape index: {}]   ;;  %s2567_s2 = inlined_call_operand.vmem [shape: f32[1,128], index: 2, kind: input, shape index: {}]   ;;  %s2568_s3 = inlined_call_operand.vmem [shape: f32[2,128], index: 3, kind: output, shape index: {}]  }
   0x1   :  { %v1956_v0 = vld [vmem:[%s2565_s1 + $0x40] sm:$0xff]   ;;  %v1960_v4 = vld [vmem:[%s2565_s1 + $0x48] sm:$0xff]   ;;  %v1964_v8 = vld [vmem:[%s2565_s1 + $0x50] sm:$0xff]   ;;  %v302_v22 = vunpack.c.l.s4 %v2094_v21 }
   0x2   :  { %v1957_v1 = vld [vmem:[%s2565_s1] sm:$0xff]   ;;  %1748 = vmatprep.subr.bf16.mxu0 %v1956_v0  ;;  %v1961_v5 = vld [vmem:[%s2565_s1 + $0x8] sm:$0xff]   ;;  %v1965_v9 = vld [vmem:[%s2565_s1 + $0x10] sm:$0xff]   ;;  %v305_v29 = vshrl.u32 %v304_v23, 7 }
   0x3   :  { %v1958_v2 = vld [vmem:[%s2565_s1 + $0xc0] sm:$0xff]   ;;  %1749 = vmatpush3.bf16.msra.mxu0 %v1957_v1  ;;  %v1962_v6 = vld [vmem:[%s2565_s1 + $0xc8] sm:$0xff]   ;;  %v1966_v10 = vld [vmem:[%s2565_s1 + $0xd0] sm:$0xff]   ;;  %v303_v28 = vunpack.c.0.s8 %v302_v22 }
   0x4   :  { %v1959_v3 = vld [vmem:[%s2565_s1 + $0x80] sm:$0xff]   ;;  %1770 = vmatprep.subr.bf16.mxu1 %v1958_v2  ;;  %1750 = vmatprep.subr.bf16.mxu0 %v1960_v4  ;;  %v1963_v7 = vld [vmem:[%s2565_s1 + $0x88] sm:$0xff]   ;;  %v1967_v11 = vld [vmem:[%s2565_s1 + $0x90] sm:$0xff]  }
   0x5   :  { %1771 = vmatpush3.bf16.msra.mxu1 %v1959_v3  ;;  %v1968_v12 = vld [vmem:[%s2565_s1 + $0x58] sm:$0xff]   ;;  %v1972_v16 = vld [vmem:[%s2565_s1 + $0x60] sm:$0xff]   ;;  %v1976_v20 = vld [vmem:[%s2565_s1 + $0x68] sm:$0xff]   ;;  %v2204_v34 = vsub.s32 %v303_v28, %v305_v29 }
   0x6   :  { %1772 = vmatprep.subr.bf16.mxu1 %v1962_v6  ;;  %v1969_v13 = vld [vmem:[%s2565_s1 + $0x18] sm:$0xff]   ;;  %v1973_v17 = vld [vmem:[%s2565_s1 + $0x20] sm:$0xff]   ;;  %v1977_v24 = vld [vmem:[%s2565_s1 + $0x28] sm:$0xff]  }
   0x7   :  { %1751 = vmatpush3.bf16.msra.mxu0 %v1961_v5  ;;  %v1970_v14 = vld [vmem:[%s2565_s1 + $0xd8] sm:$0xff]   ;;  %v1974_v18 = vld [vmem:[%s2565_s1 + $0xe0] sm:$0xff]   ;;  %v1978_v25 = vld [vmem:[%s2565_s1 + $0xe8] sm:$0xff]  }
   0x8   :  { %1752 = vmatprep.subr.bf16.mxu0 %v1964_v8  ;;  %v1971_v15 = vld [vmem:[%s2565_s1 + $0x98] sm:$0xff]   ;;  %v1975_v19 = vld [vmem:[%s2565_s1 + $0xa0] sm:$0xff]   ;;  %v1979_v26 = vld [vmem:[%s2565_s1 + $0xa8] sm:$0xff]  }
   0x9   :  { %1773 = vmatpush3.bf16.msra.mxu1 %v1963_v7  ;;  %v1980_v27 = vld [vmem:[%s2565_s1 + $0x70] sm:$0xff]   ;;  %v1984_v33 = vld [vmem:[%s2565_s1 + $0x78] sm:$0xff]   ;;  %v15_v37 = vld [vmem:[%s2566_s0] sm:$0xff] }
   0xa   :  { %1774 = vmatprep.subr.bf16.mxu1 %v1966_v10  ;;  %v1981_v30 = vld [vmem:[%s2565_s1 + $0x30] sm:$0xff]   ;;  %v1985_v35 = vld [vmem:[%s2565_s1 + $0x38] sm:$0xff]   ;;  %v300_v38 = vcombine.high %v15_v37, %v15_v37  ;;  %v307_v39 = vrot.slane %v15_v37, %v2204_v34  ;;  %v1989_v41 = vld [vmem:[%s2565_s1 + $0x140] sm:$0xff]  }
   0xb   :  { %1753 = vmatpush3.bf16.msra.mxu0 %v1965_v9  ;;  %v1982_v31 = vld [vmem:[%s2565_s1 + $0xf0] sm:$0xff]   ;;  %v1986_v36 = vld [vmem:[%s2565_s1 + $0xf8] sm:$0xff]   ;;  %v1991_v45 = vld [vmem:[%s2565_s1 + $0x1c0] sm:$0xff]  }
   0xc   :  { %1754 = vmatprep.subr.bf16.mxu0 %v1968_v12  ;;  %v1983_v32 = vld [vmem:[%s2565_s1 + $0xb0] sm:$0xff]   ;;  %v1988_v40 = vld [vmem:[%s2565_s1 + $0xb8] sm:$0xff]   ;;  %v315_v42 = vcombine.high %v307_v39, %v307_v39  ;;  %v323_v43 = vrot.slane %v307_v39, %v2204_v34  ;;  %v2224_v44 = vrot.slane %v300_v38, %v2204_v34  ;;  %v1990_v47 = vld [vmem:[%s2565_s1 + $0x100] sm:$0xff]  }
   0xd   :  { %1775 = vmatpush3.bf16.msra.mxu1 %v1967_v11  ;;  %v1993_v50 = vld [vmem:[%s2565_s1 + $0x148] sm:$0xff]   ;;  %v1992_v52 = vld [vmem:[%s2565_s1 + $0x180] sm:$0xff]   ;;  %v1997_v57 = vld [vmem:[%s2565_s1 + $0x150] sm:$0xff]  }
   0xe   :  { %1776 = vmatprep.subr.bf16.mxu1 %v1970_v14  ;;  %v337_v46 = vrot.slane %v315_v42, %v2204_v34  ;;  %v316_v48 = vcombine.high %v2224_v44, %v2224_v44  ;;  %v345_v49 = vcombine.high %v323_v43, %v323_v43  ;;  %v1995_v54 = vld [vmem:[%s2565_s1 + $0x1c8] sm:$0xff]   ;;  %v1999_v59 = vld [vmem:[%s2565_s1 + $0x1d0] sm:$0xff]   ;;  %v2001_v61 = vld [vmem:[%s2565_s1 + $0x158] sm:$0xff]  }
   0xf   :  { %1755 = vmatpush3.bf16.msra.mxu0 %v1969_v13  ;;  %v1994_v55 = vld [vmem:[%s2565_s1 + $0x108] sm:$0xff]   ;;  %v1998_v60 = vld [vmem:[%s2565_s1 + $0x110] sm:$0xff]   ;;  %v2003_v63 = vld [vmem:[%s2565_s1 + $0x1d8] sm:$0xff]  }
  0x10   :  { %1756 = vmatprep.subr.bf16.mxu0 %v1972_v16  ;;  %1277 = vmatprep.mubr.bf16.mxu0 %v337_v46  ;;  %v347_v51 = vcombine.high %v337_v46, %v337_v46  ;;  %v344_v53 = vrot.slane %v316_v48, %v2204_v34  ;;  %v1996_v58 = vld [vmem:[%s2565_s1 + $0x188] sm:$0xff]   ;;  %v2000_v62 = vld [vmem:[%s2565_s1 + $0x190] sm:$0xff]   ;;  %v2002_v0 = vld [vmem:[%s2565_s1 + $0x118] sm:$0xff]  }
  0x11   :  { %1777 = vmatpush3.bf16.msra.mxu1 %v1971_v15  ;;  %v2005_v1 = vld [vmem:[%s2565_s1 + $0x160] sm:$0xff]   ;;  %v2004_v2 = vld [vmem:[%s2565_s1 + $0x198] sm:$0xff]   ;;  %v2009_v5 = vld [vmem:[%s2565_s1 + $0x168] sm:$0xff]  }
  0x12   :  { %1778 = vmatprep.subr.bf16.mxu1 %v1974_v18  ;;  %1317 = vmatprep.mubr.bf16.mxu1 %v347_v51  ;;  %v348_v56 = vcombine.high %v344_v53, %v344_v53  ;;  %v2007_v3 = vld [vmem:[%s2565_s1 + $0x1e0] sm:$0xff]   ;;  %v2011_v7 = vld [vmem:[%s2565_s1 + $0x1e8] sm:$0xff]   ;;  %v2013_v9 = vld [vmem:[%s2565_s1 + $0x170] sm:$0xff]  }
  0x13   :  { %1757 = vmatpush3.bf16.msra.mxu0 %v1973_v17  ;;  %v2006_v4 = vld [vmem:[%s2565_s1 + $0x120] sm:$0xff]   ;;  %v2010_v8 = vld [vmem:[%s2565_s1 + $0x128] sm:$0xff]   ;;  %v2015_v11 = vld [vmem:[%s2565_s1 + $0x1f0] sm:$0xff]   ;;  %v330_v17 = vrot.slane %v2224_v44, %v2204_v34 }
  0x14   :  { %1758 = vmatprep.subr.bf16.mxu0 %v1976_v20  ;;  %v2008_v6 = vld [vmem:[%s2565_s1 + $0x1a0] sm:$0xff]   ;;  %v2012_v10 = vld [vmem:[%s2565_s1 + $0x1a8] sm:$0xff]   ;;  %v2014_v12 = vld [vmem:[%s2565_s1 + $0x130] sm:$0xff]  }
  0x15   :  { %1779 = vmatpush3.bf16.msra.mxu1 %v1975_v19  ;;  %v2017_v13 = vld [vmem:[%s2565_s1 + $0x178] sm:$0xff]   ;;  %v2016_v14 = vld [vmem:[%s2565_s1 + $0x1b0] sm:$0xff]   ;;  %v2021_v18 = vld [vmem:[%s2565_s1 + $0x240] sm:$0xff]   ;;  %v346_v22 = vcombine.high %v330_v17, %v330_v17 }
  0x16   :  { %1780 = vmatprep.subr.bf16.mxu1 %v1978_v25  ;;  %v2019_v15 = vld [vmem:[%s2565_s1 + $0x1f8] sm:$0xff]   ;;  %v2023_v20 = vld [vmem:[%s2565_s1 + $0x2c0] sm:$0xff]   ;;  %v2025_v23 = vld [vmem:[%s2565_s1 + $0x248] sm:$0xff]  }
  0x17   :  { %1759 = vmatpush3.bf16.msra.mxu0 %v1977_v24  ;;  %v2018_v16 = vld [vmem:[%s2565_s1 + $0x138] sm:$0xff]   ;;  %v2022_v21 = vld [vmem:[%s2565_s1 + $0x200] sm:$0xff]   ;;  %v2027_v25 = vld [vmem:[%s2565_s1 + $0x2c8] sm:$0xff]  }
  0x18   :  { %1760 = vmatprep.subr.bf16.mxu0 %v1980_v27  ;;  %v2020_v19 = vld [vmem:[%s2565_s1 + $0x1b8] sm:$0xff]   ;;  %v2024_v24 = vld [vmem:[%s2565_s1 + $0x280] sm:$0xff]   ;;  %v2029_v27 = vld [vmem:[%s2565_s1 + $0x250] sm:$0xff]  }
  0x19   :  { %1781 = vmatpush3.bf16.msra.mxu1 %v1979_v26  ;;  %v2026_v26 = vld [vmem:[%s2565_s1 + $0x208] sm:$0xff]   ;;  %v2031_v29 = vld [vmem:[%s2565_s1 + $0x2d0] sm:$0xff]   ;;  %v2036_v37 = vld [vmem:[%s2565_s1 + $0x298] sm:$0xff]  }
  0x1a   :  { %1782 = vmatprep.subr.bf16.mxu1 %v1982_v31  ;;  %v2028_v28 = vld [vmem:[%s2565_s1 + $0x288] sm:$0xff]   ;;  %v2033_v31 = vld [vmem:[%s2565_s1 + $0x258] sm:$0xff]   ;;  %v2039_v38 = vld [vmem:[%s2565_s1 + $0x2e0] sm:$0xff]  }
  0x1b   :  { %1761 = vmatpush3.bf16.msra.mxu0 %v1981_v30  ;;  %v2030_v30 = vld [vmem:[%s2565_s1 + $0x210] sm:$0xff]   ;;  %v2038_v39 = vld [vmem:[%s2565_s1 + $0x220] sm:$0xff]   ;;  %v2043_v42 = vld [vmem:[%s2565_s1 + $0x2e8] sm:$0xff]  }
  0x1c   :  { %1762 = vmatprep.subr.bf16.mxu0 %v1984_v33  ;;  %v2035_v33 = vld [vmem:[%s2565_s1 + $0x2d8] sm:$0xff]   ;;  %v2045_v44 = vld [vmem:[%s2565_s1 + $0x270] sm:$0xff]   ;;  %v16_v51 = vld [vmem:[%s2566_s0 + $0x8] sm:$0xff] }
  0x1d   :  { %1783 = vmatpush3.bf16.msra.mxu1 %v1983_v32  ;;  %v2032_v32 = vld [vmem:[%s2565_s1 + $0x290] sm:$0xff]   ;;  %v2049_v48 = vld [vmem:[%s2565_s1 + $0x278] sm:$0xff]  }
  0x1e   :  { %1784 = vmatprep.subr.bf16.mxu1 %v1986_v36  ;;  %v2037_v36 = vld [vmem:[%s2565_s1 + $0x260] sm:$0xff]   ;;  %v2047_v46 = vld [vmem:[%s2565_s1 + $0x2f0] sm:$0xff]  }
  0x1f   :  { %1763 = vmatpush3.bf16.msra.mxu0 %v1985_v35  ;;  %v2034_v35 = vld [vmem:[%s2565_s1 + $0x218] sm:$0xff]  }
  0x20   :  { %1792 = vmatprep.subr.bf16.mxu0 %v1989_v41  ;;  %v2040_v41 = vld [vmem:[%s2565_s1 + $0x2a0] sm:$0xff]  }
  0x21   :  { %1785 = vmatpush3.bf16.msra.mxu1 %v1988_v40  ;;  %v2041_v40 = vld [vmem:[%s2565_s1 + $0x268] sm:$0xff]  }
  0x22   :  { %1814 = vmatprep.subr.bf16.mxu1 %v1991_v45  ;;  %1278 = vmatmul.mubr.bf16.vlgmr.msra.gmra.mrb[0].mxu0 %v323_v43  ;;  %v2042_v43 = vld [vmem:[%s2565_s1 + $0x228] sm:$0xff]  }
  0x23   :  { %1793 = vmatpush3.bf16.msra.mxu0 %v1990_v47  ;;  %1357 = vmatprep.mubr.bf16.mxu0 %v344_v53  ;;  %v2044_v45 = vld [vmem:[%s2565_s1 + $0x2a8] sm:$0xff]   ;;  %v2046_v47 = vld [vmem:[%s2565_s1 + $0x230] sm:$0xff]   ;;  %v356_v53 = vrot.slane %v16_v51, %v2204_v34 }
  0x24   :  { %1318 = vmatmul.mubr.bf16.vlgmr.msra.gmra.mrb[0].mxu1 %v345_v49  ;;  %1794 = vmatprep.subr.bf16.mxu0 %v1993_v50  ;;  %v2048_v49 = vld [vmem:[%s2565_s1 + $0x2b0] sm:$0xff]   ;;  %v2051_v50 = vld [vmem:[%s2565_s1 + $0x2f8] sm:$0xff]  }
  0x25   :  { %1815 = vmatpush3.bf16.msra.mxu1 %v1992_v52  ;;  %1397 = vmatprep.mubr.bf16.mxu1 %v348_v56  ;;  %v2050_v52 = vld [vmem:[%s2565_s1 + $0x238] sm:$0xff]   ;;  %v364_v56 = vcombine.high %v356_v53, %v356_v53 }
  0x26   :  { %1816 = vmatprep.subr.bf16.mxu1 %v1995_v54  ;;  %v349_v54 = vcombine.high %v16_v51, %v16_v51 }
  0x27   :  { %1795 = vmatpush3.bf16.msra.mxu0 %v1994_v55  ;;  %v2053_v55 = vld [vmem:[%s2565_s1 + $0x340] sm:$0xff]  }
  0x28   :  { %1796 = vmatprep.subr.bf16.mxu0 %v1997_v57  ;;  %v2052_v57 = vld [vmem:[%s2565_s1 + $0x2b8] sm:$0xff]  }
  0x29   :  { %1817 = vmatpush3.bf16.msra.mxu1 %v1996_v58  ;;  %v372_v58 = vrot.slane %v356_v53, %v2204_v34 }
  0x2a   :  { %1818 = vmatprep.subr.bf16.mxu1 %v1999_v59  ;;  %v2430_v59 = vrot.slane %v349_v54, %v2204_v34 }
  0x2b   :  { %1797 = vmatpush3.bf16.msra.mxu0 %v1998_v60  ;;  %v2055_v60 = vld [vmem:[%s2565_s1 + $0x3c0] sm:$0xff]  }
  0x2c   :  { %1798 = vmatprep.subr.bf16.mxu0 %v2001_v61  ;;  %v386_v61 = vrot.slane %v364_v56, %v2204_v34 }
  0x2d   :  { %1819 = vmatpush3.bf16.msra.mxu1 %v2000_v62  ;;  %v2054_v62 = vld [vmem:[%s2565_s1 + $0x300] sm:$0xff]  }
  0x2e   :  { %1820 = vmatprep.subr.bf16.mxu1 %v2003_v63  ;;  %v365_v63 = vcombine.high %v2430_v59, %v2430_v59 }
  0x2f   :  { %1799 = vmatpush3.bf16.msra.mxu0 %v2002_v0  ;;  %v394_v0 = vcombine.high %v372_v58, %v372_v58 }
  0x30   :  { %1800 = vmatprep.subr.bf16.mxu0 %v2005_v1  ;;  %v2057_v1 = vld [vmem:[%s2565_s1 + $0x348] sm:$0xff]  }
  0x31   :  { %1821 = vmatpush3.bf16.msra.mxu1 %v2004_v2  ;;  %v396_v2 = vcombine.high %v386_v61, %v386_v61 }
  0x32   :  { %1822 = vmatprep.subr.bf16.mxu1 %v2007_v3  ;;  %v2056_v3 = vld [vmem:[%s2565_s1 + $0x380] sm:$0xff]  }
  0x33   :  { %1801 = vmatpush3.bf16.msra.mxu0 %v2006_v4  ;;  %v393_v4 = vrot.slane %v365_v63, %v2204_v34 }
  0x34   :  { %1802 = vmatprep.subr.bf16.mxu0 %v2009_v5  ;;  %v2059_v5 = vld [vmem:[%s2565_s1 + $0x3c8] sm:$0xff]  }
  0x35   :  { %1823 = vmatpush3.bf16.msra.mxu1 %v2008_v6  ;;  %v2058_v6 = vld [vmem:[%s2565_s1 + $0x308] sm:$0xff]  }
  0x36   :  { %1824 = vmatprep.subr.bf16.mxu1 %v2011_v7  ;;  %v397_v7 = vcombine.high %v393_v4, %v393_v4 }
  0x37   :  { %1803 = vmatpush3.bf16.msra.mxu0 %v2010_v8  ;;  %v2061_v8 = vld [vmem:[%s2565_s1 + $0x350] sm:$0xff]  }
  0x38   :  { %1804 = vmatprep.subr.bf16.mxu0 %v2013_v9  ;;  %v2060_v9 = vld [vmem:[%s2565_s1 + $0x388] sm:$0xff]  }
  0x39   :  { %1825 = vmatpush3.bf16.msra.mxu1 %v2012_v10  ;;  %v2063_v10 = vld [vmem:[%s2565_s1 + $0x3d0] sm:$0xff]  }
  0x3a   :  { %1826 = vmatprep.subr.bf16.mxu1 %v2015_v11  ;;  %v2062_v11 = vld [vmem:[%s2565_s1 + $0x310] sm:$0xff]  }
  0x3b   :  { %1805 = vmatpush3.bf16.msra.mxu0 %v2014_v12  ;;  %v2065_v12 = vld [vmem:[%s2565_s1 + $0x358] sm:$0xff]  }
  0x3c   :  { %1806 = vmatprep.subr.bf16.mxu0 %v2017_v13  ;;  %v2064_v13 = vld [vmem:[%s2565_s1 + $0x390] sm:$0xff]  }
  0x3d   :  { %1827 = vmatpush3.bf16.msra.mxu1 %v2016_v14  ;;  %v2067_v14 = vld [vmem:[%s2565_s1 + $0x3d8] sm:$0xff]  }
  0x3e   :  { %1828 = vmatprep.subr.bf16.mxu1 %v2019_v15  ;;  %v2066_v15 = vld [vmem:[%s2565_s1 + $0x318] sm:$0xff]  }
  0x3f   :  { %1807 = vmatpush3.bf16.msra.mxu0 %v2018_v16  ;;  %v2069_v16 = vld [vmem:[%s2565_s1 + $0x360] sm:$0xff]  }
  0x40   :  { %1836 = vmatprep.subr.bf16.mxu0 %v2021_v18  ;;  %v2071_v18 = vld [vmem:[%s2565_s1 + $0x3e0] sm:$0xff]  }
  0x41   :  { %1829 = vmatpush3.bf16.msra.mxu1 %v2020_v19  ;;  %v2070_v19 = vld [vmem:[%s2565_s1 + $0x320] sm:$0xff]  }
  0x42   :  { %1358 = vmatmul.mubr.bf16.vlgmr.msra.gmra.mrb[4].mxu0 %v330_v17  ;;  %1858 = vmatprep.subr.bf16.mxu1 %v2023_v20  ;;  %v2068_v17 = vld [vmem:[%s2565_s1 + $0x398] sm:$0xff]   ;;  %v2073_v20 = vld [vmem:[%s2565_s1 + $0x368] sm:$0xff]  }
  0x43   :  { %1837 = vmatpush3.bf16.msra.mxu0 %v2022_v21  ;;  %1437 = vmatprep.mubr.bf16.mxu0 %v386_v61  ;;  %v2072_v21 = vld [vmem:[%s2565_s1 + $0x3a0] sm:$0xff]  }
  0x44   :  { %1398 = vmatmul.mubr.bf16.vlgmr.msra.gmra.mrb[4].mxu1 %v346_v22  ;;  %1838 = vmatprep.subr.bf16.mxu0 %v2025_v23  ;;  %v2075_v22 = vld [vmem:[%s2565_s1 + $0x3e8] sm:$0xff]  }
  0x45   :  { %1859 = vmatpush3.bf16.msra.mxu1 %v2024_v24  ;;  %1477 = vmatprep.mubr.bf16.mxu1 %v396_v2  ;;  %v2074_v23 = vld [vmem:[%s2565_s1 + $0x328] sm:$0xff]   ;;  %v2077_v24 = vld [vmem:[%s2565_s1 + $0x370] sm:$0xff]  }
  0x46   :  { %1860 = vmatprep.subr.bf16.mxu1 %v2027_v25  ;;  %v2076_v25 = vld [vmem:[%s2565_s1 + $0x3a8] sm:$0xff]  }
  0x47   :  { %1839 = vmatpush3.bf16.msra.mxu0 %v2026_v26  ;;  %v2079_v26 = vld [vmem:[%s2565_s1 + $0x3f0] sm:$0xff]  }
  0x48   :  { %1840 = vmatprep.subr.bf16.mxu0 %v2029_v27  ;;  %v2078_v27 = vld [vmem:[%s2565_s1 + $0x330] sm:$0xff]  }
  0x49   :  { %1861 = vmatpush3.bf16.msra.mxu1 %v2028_v28  ;;  %v2081_v28 = vld [vmem:[%s2565_s1 + $0x378] sm:$0xff]  }
  0x4a   :  { %1862 = vmatprep.subr.bf16.mxu1 %v2031_v29  ;;  %v2080_v29 = vld [vmem:[%s2565_s1 + $0x3b0] sm:$0xff]  }
  0x4b   :  { %1841 = vmatpush3.bf16.msra.mxu0 %v2030_v30  ;;  %v2083_v30 = vld [vmem:[%s2565_s1 + $0x3f8] sm:$0xff]  }
  0x4c   :  { %1842 = vmatprep.subr.bf16.mxu0 %v2033_v31  ;;  %v2082_v31 = vld [vmem:[%s2565_s1 + $0x338] sm:$0xff]  }
  0x4d   :  { %1863 = vmatpush3.bf16.msra.mxu1 %v2032_v32  ;;  %v379_v32 = vrot.slane %v2430_v59, %v2204_v34 }
  0x4e   :  { %1864 = vmatprep.subr.bf16.mxu1 %v2035_v33  ;;  %v2085_v33 = vld [vmem:[%s2565_s1 + $0x3b8] sm:$0xff]  }
  0x4f   :  { %1843 = vmatpush3.bf16.msra.mxu0 %v2034_v35  ;;  %v2086_v35 = vld [vmem:[%s2565_s1 + $0x400] sm:$0xff]  }
  0x50   :  { %1844 = vmatprep.subr.bf16.mxu0 %v2037_v36  ;;  %v2095_v36 = vmov 0.0  }
  0x51   :  { %1865 = vmatpush3.bf16.msra.mxu1 %v2036_v37  ;;  %v395_v37 = vcombine.high %v379_v32, %v379_v32 }
  0x52   :  { %1866 = vmatprep.subr.bf16.mxu1 %v2039_v38  ;;  %v2087_v38 = vld [vmem:[%s2565_s1 + $0x408] sm:$0xff]  }
  0x53   :  { %1845 = vmatpush3.bf16.msra.mxu0 %v2038_v39  ;;  %v2088_v39 = vld [vmem:[%s2565_s1 + $0x410] sm:$0xff]  }
  0x54   :  { %1846 = vmatprep.subr.bf16.mxu0 %v2041_v40  ;;  %v2089_v40 = vld [vmem:[%s2565_s1 + $0x418] sm:$0xff]  }
  0x55   :  { %1867 = vmatpush3.bf16.msra.mxu1 %v2040_v41  ;;  %v2090_v41 = vld [vmem:[%s2565_s1 + $0x420] sm:$0xff]  }
  0x56   :  { %1868 = vmatprep.subr.bf16.mxu1 %v2043_v42  ;;  %v2091_v42 = vld [vmem:[%s2565_s1 + $0x428] sm:$0xff]  }
  0x57   :  { %1847 = vmatpush3.bf16.msra.mxu0 %v2042_v43  ;;  %v2092_v43 = vld [vmem:[%s2565_s1 + $0x430] sm:$0xff]  }
  0x58   :  { %1848 = vmatprep.subr.bf16.mxu0 %v2045_v44  ;;  %v2093_v44 = vld [vmem:[%s2565_s1 + $0x438] sm:$0xff]  }
  0x59   :  { %1869 = vmatpush3.bf16.msra.mxu1 %v2044_v45  ;;  %v1611_v45 = vld.sshfl [vmem:[%s2566_s0 + $0x10] sm:$0x1 pattern:$0x75316420] }
  0x5a   :  { %1870 = vmatprep.subr.bf16.mxu1 %v2047_v46  ;;  %v411_v46 = vrot.slane %v1611_v45, %v2204_v34 }
  0x5b   :  { %1849 = vmatpush3.bf16.msra.mxu0 %v2046_v47 }
  0x5c   :  { %1850 = vmatprep.subr.bf16.mxu0 %v2049_v48  ;;  %v1610_v48 = vld [vmem:[%s2567_s2] ss:$0 sm:$0xff] }
  0x5d   :  { %1871 = vmatpush3.bf16.msra.mxu1 %v2048_v49 }
  0x5e   :  { %1872 = vmatprep.subr.bf16.mxu1 %v2051_v50 }
  0x5f   :  { %1851 = vmatpush3.bf16.msra.mxu0 %v2050_v52 }
  0x60   :  { %1880 = vmatprep.subr.bf16.mxu0 %v2053_v55 }
  0x61   :  { %1873 = vmatpush3.bf16.msra.mxu1 %v2052_v57 }
  0x62   :  { %1438 = vmatmul.mubr.bf16.vlgmr.msra.gmra.mrb[8].mxu0 %v372_v58  ;;  %1902 = vmatprep.subr.bf16.mxu1 %v2055_v60 }
  0x63   :  { %1881 = vmatpush3.bf16.msra.mxu0 %v2054_v62  ;;  %1517 = vmatprep.mubr.bf16.mxu0 %v393_v4 }
  0x64   :  { %1478 = vmatmul.mubr.bf16.vlgmr.msra.gmra.mrb[8].mxu1 %v394_v0  ;;  %1882 = vmatprep.subr.bf16.mxu0 %v2057_v1 }
  0x65   :  { %1903 = vmatpush3.bf16.msra.mxu1 %v2056_v3  ;;  %1557 = vmatprep.mubr.bf16.mxu1 %v397_v7 }
  0x66   :  { %1904 = vmatprep.subr.bf16.mxu1 %v2059_v5 }
  0x67   :  { %1883 = vmatpush3.bf16.msra.mxu0 %v2058_v6 }
  0x68   :  { %1884 = vmatprep.subr.bf16.mxu0 %v2061_v8 }
  0x69   :  { %1905 = vmatpush3.bf16.msra.mxu1 %v2060_v9 }
  0x6a   :  { %1906 = vmatprep.subr.bf16.mxu1 %v2063_v10 }
  0x6b   :  { %1885 = vmatpush3.bf16.msra.mxu0 %v2062_v11 }
  0x6c   :  { %1886 = vmatprep.subr.bf16.mxu0 %v2065_v12 }
  0x6d   :  { %1907 = vmatpush3.bf16.msra.mxu1 %v2064_v13 }
  0x6e   :  { %1908 = vmatprep.subr.bf16.mxu1 %v2067_v14 }
  0x6f   :  { %1887 = vmatpush3.bf16.msra.mxu0 %v2066_v15 }
  0x70   :  { %1888 = vmatprep.subr.bf16.mxu0 %v2069_v16 }
  0x71   :  { %1909 = vmatpush3.bf16.msra.mxu1 %v2068_v17 }
  0x72   :  { %1910 = vmatprep.subr.bf16.mxu1 %v2071_v18 }
  0x73   :  { %1889 = vmatpush3.bf16.msra.mxu0 %v2070_v19 }
  0x74   :  { %1890 = vmatprep.subr.bf16.mxu0 %v2073_v20 }
  0x75   :  { %1911 = vmatpush3.bf16.msra.mxu1 %v2072_v21 }
  0x76   :  { %1912 = vmatprep.subr.bf16.mxu1 %v2075_v22 }
  0x77   :  { %1891 = vmatpush3.bf16.msra.mxu0 %v2074_v23 }
  0x78   :  { %1892 = vmatprep.subr.bf16.mxu0 %v2077_v24 }
  0x79   :  { %1913 = vmatpush3.bf16.msra.mxu1 %v2076_v25 }
  0x7a   :  { %1914 = vmatprep.subr.bf16.mxu1 %v2079_v26 }
  0x7b   :  { %1893 = vmatpush3.bf16.msra.mxu0 %v2078_v27 }
  0x7c   :  { %1894 = vmatprep.subr.bf16.mxu0 %v2081_v28 }
  0x7d   :  { %1915 = vmatpush3.bf16.msra.mxu1 %v2080_v29 }
  0x7e   :  { %1916 = vmatprep.subr.bf16.mxu1 %v2083_v30 }
  0x7f   :  { %1895 = vmatpush3.bf16.msra.mxu0 %v2082_v31 }
  0x80   :  { %1933 = vmatprep.subr.bf16.mxu0 %v2095_v36 }
  0x81   :  { %1917 = vmatpush3.bf16.msra.mxu1 %v2085_v33 }
  0x82   :  { %1518 = vmatmul.mubr.bf16.vlgmr.msra.gmra.mrb[12].mxu0 %v379_v32 }
  0x83   :  { %1934 = vmatpush3.bf16.msra.mxu0 %v2086_v35  ;;  %1949 = vmatprep.mubr.msk.bf16.mxu0 %vm2096_vm0, %v2095_v36 }
  0x84   :  { %1558 = vmatmul.mubr.bf16.vlgmr.msra.gmra.mrb[12].mxu1 %v395_v37  ;;  %1935 = vmatprep.subr.bf16.mxu0 %v2095_v36 }
  0x87   :  { %1936 = vmatpush3.bf16.msra.mxu0 %v2087_v38 }
  0x88   :  { %1937 = vmatprep.subr.bf16.mxu0 %v2095_v36 }
  0x8b   :  { %1938 = vmatpush3.bf16.msra.mxu0 %v2088_v39 }
  0x8c   :  { %1939 = vmatprep.subr.bf16.mxu0 %v2095_v36 }
  0x8f   :  { %1940 = vmatpush3.bf16.msra.mxu0 %v2089_v40 }
  0x90   :  { %1941 = vmatprep.subr.bf16.mxu0 %v2095_v36 }
  0x93   :  { %1942 = vmatpush3.bf16.msra.mxu0 %v2090_v41 }
  0x94   :  { %1943 = vmatprep.subr.bf16.mxu0 %v2095_v36 }
  0x97   :  { %1944 = vmatpush3.bf16.msra.mxu0 %v2091_v42 }
  0x98   :  { %1945 = vmatprep.subr.bf16.mxu0 %v2095_v36 }
  0x9b   :  { %1946 = vmatpush3.bf16.msra.mxu0 %v2092_v43 }
  0x9c   :  { %1947 = vmatprep.subr.bf16.mxu0 %v2095_v36 }
  0x9f   :  { %1948 = vmatpush3.bf16.msra.mxu0 %v2093_v44 }
  0xa2   :  { %1950 = vmatmul.mubr.bf16.vlgmr.msra.gmra.mrb[16].mxu0 %v411_v46 }
  0xf5   :  { %v1764_v47 = vpop.f32.mrb[0].mxu0 }
  0xf6   :  { %v1765_v49 = vpop.f32.mrb[1].mxu0 }
  0xf7   :  { %v1766_v50 = vadd.f32 %v1765_v49, %v1764_v47  ;;  %v1767_v51 = vpop.f32.mrb[2].mxu0  ;;  %v1786_v52 = vpop.f32.mrb[0].mxu1 }
  0xf8   :  { %v1768_v53 = vpop.f32.mrb[3].mxu0  ;;  %v1787_v54 = vpop.f32.mrb[1].mxu1 }
  0xf9   :  { %v1280_v55 = vadd.f32 %v1766_v50, %v1610_v48  ;;  %v1788_v56 = vadd.f32 %v1787_v54, %v1786_v52  ;;  %v1789_v57 = vpop.f32.mrb[2].mxu1 }
  0xfa   :  { %v1790_v58 = vpop.f32.mrb[3].mxu1 }
  0xfb   :  { %v1320_v59 = vadd.f32 %v1788_v56, %v1280_v55 }
 0x115   :  { %v1808_v60 = vpop.f32.mrb[4].mxu0 }
 0x116   :  { %v1809_v34 = vpop.f32.mrb[5].mxu0 }
 0x117   :  { %v1810_v61 = vadd.f32 %v1809_v34, %v1808_v60  ;;  %v1811_v62 = vpop.f32.mrb[6].mxu0  ;;  %v1830_v63 = vpop.f32.mrb[4].mxu1 }
 0x118   :  { %v1812_v0 = vpop.f32.mrb[7].mxu0  ;;  %v1831_v1 = vpop.f32.mrb[5].mxu1 }
 0x119   :  { %v1360_v2 = vadd.f32 %v1810_v61, %v1320_v59  ;;  %v1832_v3 = vadd.f32 %v1831_v1, %v1830_v63  ;;  %v1833_v4 = vpop.f32.mrb[6].mxu1 }
 0x11a   :  { %v1834_v5 = vpop.f32.mrb[7].mxu1 }
 0x11b   :  { %v1400_v6 = vadd.f32 %v1832_v3, %v1360_v2 }
 0x135   :  { %v1852_v7 = vpop.f32.mrb[8].mxu0 }
 0x136   :  { %v1853_v8 = vpop.f32.mrb[9].mxu0 }
 0x137   :  { %v1854_v9 = vadd.f32 %v1853_v8, %v1852_v7  ;;  %v1855_v10 = vpop.f32.mrb[10].mxu0  ;;  %v1874_v11 = vpop.f32.mrb[8].mxu1 }
 0x138   :  { %v1856_v12 = vpop.f32.mrb[11].mxu0  ;;  %v1875_v13 = vpop.f32.mrb[9].mxu1 }
 0x139   :  { %v1440_v14 = vadd.f32 %v1854_v9, %v1400_v6  ;;  %v1876_v15 = vadd.f32 %v1875_v13, %v1874_v11  ;;  %v1877_v16 = vpop.f32.mrb[10].mxu1 }
 0x13a   :  { %v1878_v17 = vpop.f32.mrb[11].mxu1 }
 0x13b   :  { %v1480_v18 = vadd.f32 %v1876_v15, %v1440_v14 }
 0x155   :  { %v1896_v19 = vpop.f32.mrb[12].mxu0 }
 0x156   :  { %v1897_v20 = vpop.f32.mrb[13].mxu0 }
 0x157   :  { %v1898_v21 = vadd.f32 %v1897_v20, %v1896_v19  ;;  %v1899_v22 = vpop.f32.mrb[14].mxu0  ;;  %v1918_v23 = vpop.f32.mrb[12].mxu1 }
 0x158   :  { %v1900_v24 = vpop.f32.mrb[15].mxu0  ;;  %v1919_v25 = vpop.f32.mrb[13].mxu1 }
 0x159   :  { %v1520_v26 = vadd.f32 %v1898_v21, %v1480_v18  ;;  %v1920_v27 = vadd.f32 %v1919_v25, %v1918_v23  ;;  %v1921_v28 = vpop.f32.mrb[14].mxu1 }
 0x15a   :  { %v1922_v29 = vpop.f32.mrb[15].mxu1 }
 0x15b   :  { %v1560_v30 = vadd.f32 %v1920_v27, %v1520_v26 }
 0x175   :  { %v1599_v31 = vpop.f32.mrb[16].mxu0 }
 0x176   :  { %v1600_v32 = vadd.f32 %v1599_v31, %v1560_v30  ;;  %v1951_v33 = vpop.f32.mrb[17].mxu0 }
 0x177   :  { %v1602_v35 = vpop.f32.mrb[18].mxu0 }
 0x178   :  { %1605 = vst [vmem:[%s2568_s3] sm:$0x3] %v1600_v32  ;;  %v1952_v36 = vpop.f32.mrb[19].mxu0 }

</bundles_post_ra>
